<compile_context>
chip_gen: v7x
topology: tpu7x:2x2x1
jax: 0.10.0
libtpu: 0.0.40
codegen_flags: <defaults>
</compile_context>

<pallas_src>
import math

import jax
import jax.numpy as jnp
from jax import lax
from jax.experimental import pallas as pl
from jax.experimental.pallas import tpu as pltpu

EPS = 1e-6
_INV_SQRT_2PI = 0.3989422804014327
_INV_SQRT_2 = 0.7071067811865476

_LANE = 128
_MAX_TILE = 2048  # per-step batch tile cap; activations stay << VMEM budget


def _erf_from_gauss(x, exp_neg_x2):
    """Abramowitz & Stegun 7.1.26 erf(x), reusing a precomputed exp(-x*x).

    |err| < 1.5e-7; uses only ops guaranteed to lower on Mosaic
    (abs/mul/add/div/where).  Shared by the kernel and the JAX reference so
    the approximation error cancels exactly in the test.
    """
    a1, a2, a3, a4, a5 = (0.254829592, -0.284496736, 1.421413741,
                          -1.453152027, 1.061405429)
    p = 0.3275911
    s = jnp.where(x < 0.0, -1.0, 1.0)
    ax = jnp.abs(x)
    t = 1.0 / (1.0 + p * ax)          # exact divide (approx rcp broke accuracy)
    poly = t * (a1 + t * (a2 + t * (a3 + t * (a4 + t * a5))))
    return s * (1.0 - poly * exp_neg_x2)


def _relu_moments(m, v):
    """Mean/variance of relu(X) for X ~ N(m, v), elementwise (layout-agnostic)."""
    var = v + EPS
    inv_sv = lax.rsqrt(var)               # EUP rsqrt (no sqrt + divide)
    sv = var * inv_sv                      # = sqrt(var)
    mu = m * inv_sv
    e = jnp.exp(-0.5 * mu * mu)            # shared: normal pdf AND erf tail
    cdf = 0.5 * (1.0 + _erf_from_gauss(mu * _INV_SQRT_2, e))
    pdf = _INV_SQRT_2PI * e
    z_mean = sv * (pdf + mu * cdf)                    # E[relu(X)]
    ez2 = var * ((mu * mu + 1.0) * cdf + mu * pdf)    # E[relu(X)^2]
    z_var = jnp.maximum(ez2 - z_mean * z_mean, 0.0)
    return z_mean, z_var


# -----------------------------------------------------------------------------
# Kernel: feature-major (features on sublanes, batch on lanes).
#   x_ref      : (d_in, tile)
#   w*_ref     : (out, in)        -- transposed weights
#   w*vf_ref   : (out, 2*in)      -- [W_var ; W_var + W*W] stacked then transposed
#   b*_ref     : (out, 1)         -- broadcast along lanes
#   out_ref    : (2*n_classes, tile) -- rows [0:n) = mean, rows [n:2n) = var
# -----------------------------------------------------------------------------
def dvi_mlp_kernel(x_ref,
                   w1_ref, w1v_ref, b1_ref, b1v_ref,
                   w2_ref, w2vf_ref, b2_ref, b2v_ref,
                   w3_ref, w3vf_ref, b3_ref, b3v_ref,
                   out_ref):
    x = x_ref[...]                                           # (d_in, tile)

    # Layer 1: LinearGaussian(input_size -> hid, certain=True)
    m = jnp.dot(w1_ref[...], x, preferred_element_type=jnp.float32) + b1_ref[...]
    v = (jnp.dot(w1v_ref[...], x * x, preferred_element_type=jnp.float32)
         + b1v_ref[...])

    # Layer 2: ReluGaussian(hid -> hid)
    zm, zv = _relu_moments(m, v)
    z2 = jnp.concatenate([zm * zm, zv], axis=0)              # (2*hid, tile)
    m = jnp.dot(w2_ref[...], zm, preferred_element_type=jnp.float32) + b2_ref[...]
    v = (jnp.dot(w2vf_ref[...], z2, preferred_element_type=jnp.float32)
         + b2v_ref[...])

    # Layer 3: ReluGaussian(hid -> n_classes)
    zm, zv = _relu_moments(m, v)
    z2 = jnp.concatenate([zm * zm, zv], axis=0)              # (2*hid, tile)
    m = jnp.dot(w3_ref[...], zm, preferred_element_type=jnp.float32) + b3_ref[...]
    v = (jnp.dot(w3vf_ref[...], z2, preferred_element_type=jnp.float32)
         + b3v_ref[...])

    # Single lane-dense packed store: mean rows then var rows.
    out_ref[...] = jnp.concatenate([m, v], axis=0)


def _full_spec(arr):
    nd = arr.ndim
    return pl.BlockSpec(arr.shape, lambda i, _nd=nd: (0,) * _nd)


def _ceil_div(a, b):
    return -(-a // b)


def _num_tensorcores():
    """2 on v7x (2 TCs/chip -> 2-step parallel grid), else 1 (v5e/v6e/CPU)."""
    try:
        kind = jax.devices()[0].device_kind.lower()
    except Exception:
        return 1
    if "v7" in kind or "7x" in kind:
        return 2
    return 1


def _choose_tiling(batch, n_cores, max_tile):
    padded = max(_LANE, _ceil_div(batch, _LANE) * _LANE)     # batch on lanes
    n_steps = max(n_cores, _ceil_div(padded, max_tile))
    n_steps = _ceil_div(n_steps, n_cores) * n_cores          # keep TCs balanced
    tile = _ceil_div(padded, n_steps * _LANE) * _LANE        # lane-aligned tile
    padded = tile * n_steps
    return padded, tile, n_steps


def dvi_mlp_forward(x, params, *, max_tile=_MAX_TILE):
    """params: dict with w1, w1_logvar, b1, b1_logvar, ..., w3, ..., b3_logvar."""
    b, d_in = x.shape
    hid = params["w1"].shape[1]
    n_classes = params["w3"].shape[1]

    # ---- hoisted weight transforms (once, outside the grid loop) ----
    w1_t = params["w1"].T                                    # (hid, d_in)
    w1v_t = jnp.exp(params["w1_logvar"]).T                   # (hid, d_in)
    b1_t = params["b1"].T                                    # (hid, 1)
    b1v_t = jnp.exp(params["b1_logvar"]).T                   # (hid, 1)

    def relu_layer_operands(w, w_lv, bias, b_lv):
        w_var = jnp.exp(w_lv)
        w_vps = w_var + w * w
        wvf_t = jnp.concatenate([w_var, w_vps], axis=0).T    # (out, 2*in)
        return w.T, wvf_t, bias.T, jnp.exp(b_lv).T

    w2_t, w2vf_t, b2_t, b2v_t = relu_layer_operands(
        params["w2"], params["w2_logvar"], params["b2"], params["b2_logvar"])
    w3_t, w3vf_t, b3_t, b3v_t = relu_layer_operands(
        params["w3"], params["w3_logvar"], params["b3"], params["b3_logvar"])

    weight_args = [w1_t, w1v_t, b1_t, b1v_t,
                   w2_t, w2vf_t, b2_t, b2v_t,
                   w3_t, w3vf_t, b3_t, b3v_t]

    # ---- generation-aware batch tiling (batch sits on the lane axis) ----
    n_cores = _num_tensorcores()
    padded_b, tile, grid_b = _choose_tiling(b, n_cores, max_tile)

    x_t = x.T                                                # (d_in, b)
    if padded_b != b:
        x_t = jnp.pad(x_t, ((0, 0), (0, padded_b - b)))

    # Advisory cost estimate so XLA schedules the prep / output slice around us.
    flops = int(2 * padded_b * (2 * d_in * hid + 3 * hid * hid
                                + 3 * hid * n_classes) + 40 * padded_b * hid)
    transcendentals = int(4 * padded_b * hid)                # 2 relu blocks
    bytes_accessed = int(4 * (x_t.size + 2 * n_classes * padded_b
                              + sum(a.size for a in weight_args)))

    out = pl.pallas_call(
        dvi_mlp_kernel,
        out_shape=jax.ShapeDtypeStruct((2 * n_classes, padded_b), jnp.float32),
        grid=(grid_b,),
        in_specs=([pl.BlockSpec((d_in, tile), lambda i: (0, i))]
                  + [_full_spec(a) for a in weight_args]),
        out_specs=pl.BlockSpec((2 * n_classes, tile), lambda i: (0, i)),
        compiler_params=pltpu.CompilerParams(
            dimension_semantics=("parallel",)),
        cost_estimate=pl.CostEstimate(flops=flops,
                                      transcendentals=transcendentals,
                                      bytes_accessed=bytes_accessed),
    )(x_t, *weight_args)

    y_mean = out[:n_classes, :b].T
    y_var = out[n_classes:, :b].T
    return y_mean, y_var


# ---------------------------------------------------------------------------
# Deterministic parameter initialization (matches the shapes/init style of
# LinearGaussian: xavier_normal W, normal bias, uniform(-10,-7) logvars).
# ---------------------------------------------------------------------------
def _init_linear_gaussian(key, in_f, out_f):
    k_w, k_b, k_wlv, k_blv = jax.random.split(key, 4)
    std = math.sqrt(2.0 / (in_f + out_f))
    w = std * jax.random.normal(k_w, (in_f, out_f), jnp.float32)
    b = jax.random.normal(k_b, (1, out_f), jnp.float32)
    w_lv = jax.random.uniform(k_wlv, (in_f, out_f), jnp.float32, -10.0, -7.0)
    b_lv = jax.random.uniform(k_blv, (1, out_f), jnp.float32, -10.0, -7.0)
    return w, w_lv, b, b_lv


def _reference_forward(x, p):
    """Pure-JAX batch-major reference of the same moment-propagation forward."""
    w1v, b1v = jnp.exp(p["w1_logvar"]), jnp.exp(p["b1_logvar"])
    m = x @ p["w1"] + p["b1"]
    v = (x * x) @ w1v + b1v
    for wk, wlk, bk, blk in (("w2", "w2_logvar", "b2", "b2_logvar"),
                             ("w3", "w3_logvar", "b3", "b3_logvar")):
        zm, zv = _relu_moments(m, v)
        wv, bv = jnp.exp(p[wlk]), jnp.exp(p[blk])
        m = zm @ p[wk] + p[bk]
        v = (zm * zm) @ wv + zv @ (wv + p[wk] * p[wk]) + bv
    return m, v


if __name__ == "__main__":
    batch, input_size, hid_size, n_classes = 512, 4, 32, 4

    key = jax.random.PRNGKey(0)
    k_x, k_l1, k_l2, k_l3 = jax.random.split(key, 4)

    x = jax.random.normal(k_x, (batch, input_size), jnp.float32)

    w1, w1lv, b1, b1lv = _init_linear_gaussian(k_l1, input_size, hid_size)
    w2, w2lv, b2, b2lv = _init_linear_gaussian(k_l2, hid_size, hid_size)
    w3, w3lv, b3, b3lv = _init_linear_gaussian(k_l3, hid_size, n_classes)

    params = dict(w1=w1, w1_logvar=w1lv, b1=b1, b1_logvar=b1lv,
                  w2=w2, w2_logvar=w2lv, b2=b2, b2_logvar=b2lv,
                  w3=w3, w3_logvar=w3lv, b3=b3, b3_logvar=b3lv)

    y_mean, y_var = dvi_mlp_forward(x, params)
    y_mean = jax.block_until_ready(y_mean)
    y_var = jax.block_until_ready(y_var)

    ref_mean, ref_var = _reference_forward(x, params)
    assert y_mean.shape == (batch, n_classes) and y_var.shape == (batch, n_classes)
    assert jnp.allclose(y_mean, ref_mean, rtol=2e-3, atol=1e-5), "mean mismatch"
    assert jnp.allclose(y_var, ref_var, rtol=2e-3, atol=1e-5), "var mismatch"
    assert bool(jnp.all(y_var >= 0.0)), "negative variance"

    print("KERNEL_OK")
</pallas_src>

<mosaic_0001>
module attributes {stable_mosaic.version = 11 : i64} {
  func.func @dvi_mlp_kernel(%arg0: i32, %arg1: memref<4x512xf32, #tpu.memory_space<vmem>>, %arg2: memref<32x4xf32, #tpu.memory_space<vmem>>, %arg3: memref<32x4xf32, #tpu.memory_space<vmem>>, %arg4: memref<32x1xf32, #tpu.memory_space<vmem>>, %arg5: memref<32x1xf32, #tpu.memory_space<vmem>>, %arg6: memref<32x32xf32, #tpu.memory_space<vmem>>, %arg7: memref<32x64xf32, #tpu.memory_space<vmem>>, %arg8: memref<32x1xf32, #tpu.memory_space<vmem>>, %arg9: memref<32x1xf32, #tpu.memory_space<vmem>>, %arg10: memref<4x32xf32, #tpu.memory_space<vmem>>, %arg11: memref<4x64xf32, #tpu.memory_space<vmem>>, %arg12: memref<4x1xf32, #tpu.memory_space<vmem>>, %arg13: memref<4x1xf32, #tpu.memory_space<vmem>>, %arg14: memref<8x512xf32, #tpu.memory_space<vmem>>) attributes {dimension_semantics = [#tpu.dimension_semantics<parallel>], iteration_bounds = array<i64: 1>, scalar_prefetch = 0 : i64, scratch_operands = 0 : i64, tpu.core_type = #tpu.core_type<tc>, window_params = [{transform_indices = @transform_0, window_bounds = array<i64: 4, 512>}, {pipeline_mode = #tpu.pipeline_mode<synchronous>, transform_indices = @transform_1, window_bounds = array<i64: 32, 4>}, {pipeline_mode = #tpu.pipeline_mode<synchronous>, transform_indices = @transform_2, window_bounds = array<i64: 32, 4>}, {pipeline_mode = #tpu.pipeline_mode<synchronous>, transform_indices = @transform_3, window_bounds = array<i64: 32, 1>}, {pipeline_mode = #tpu.pipeline_mode<synchronous>, transform_indices = @transform_4, window_bounds = array<i64: 32, 1>}, {pipeline_mode = #tpu.pipeline_mode<synchronous>, transform_indices = @transform_5, window_bounds = array<i64: 32, 32>}, {pipeline_mode = #tpu.pipeline_mode<synchronous>, transform_indices = @transform_6, window_bounds = array<i64: 32, 64>}, {pipeline_mode = #tpu.pipeline_mode<synchronous>, transform_indices = @transform_7, window_bounds = array<i64: 32, 1>}, {pipeline_mode = #tpu.pipeline_mode<synchronous>, transform_indices = @transform_8, window_bounds = array<i64: 32, 1>}, {pipeline_mode = #tpu.pipeline_mode<synchronous>, transform_indices = @transform_9, window_bounds = array<i64: 4, 32>}, {pipeline_mode = #tpu.pipeline_mode<synchronous>, transform_indices = @transform_10, window_bounds = array<i64: 4, 64>}, {pipeline_mode = #tpu.pipeline_mode<synchronous>, transform_indices = @transform_11, window_bounds = array<i64: 4, 1>}, {pipeline_mode = #tpu.pipeline_mode<synchronous>, transform_indices = @transform_12, window_bounds = array<i64: 4, 1>}, {transform_indices = @transform_13, window_bounds = array<i64: 8, 512>}]} {
    %c0 = arith.constant 0 : index
    %c0_0 = arith.constant 0 : index
    %0 = vector.load %arg1[%c0, %c0_0] : memref<4x512xf32, #tpu.memory_space<vmem>>, vector<4x512xf32>
    %c0_1 = arith.constant 0 : index
    %c0_2 = arith.constant 0 : index
    %1 = vector.load %arg2[%c0_1, %c0_2] : memref<32x4xf32, #tpu.memory_space<vmem>>, vector<32x4xf32>
    %cst = arith.constant dense<0.000000e+00> : vector<32x512xf32>
    %2 = tpu.matmul %1, %0, %cst {dimension_numbers = #tpu.dot_dimension_numbers<[1], [0], [0], [1], [0, 0, 1, 1], [], []>} : vector<32x4xf32>, vector<4x512xf32>, vector<32x512xf32> -> vector<32x512xf32>
    %c0_3 = arith.constant 0 : index
    %c0_4 = arith.constant 0 : index
    %3 = vector.load %arg4[%c0_3, %c0_4] : memref<32x1xf32, #tpu.memory_space<vmem>>, vector<32x1xf32>
    %4 = vector.broadcast %3 : vector<32x1xf32> to vector<32x512xf32>
    %5 = arith.addf %2, %4 : vector<32x512xf32>
    %c0_5 = arith.constant 0 : index
    %c0_6 = arith.constant 0 : index
    %6 = vector.load %arg3[%c0_5, %c0_6] : memref<32x4xf32, #tpu.memory_space<vmem>>, vector<32x4xf32>
    %7 = arith.mulf %0, %0 : vector<4x512xf32>
    %cst_7 = arith.constant dense<0.000000e+00> : vector<32x512xf32>
    %8 = tpu.matmul %6, %7, %cst_7 {dimension_numbers = #tpu.dot_dimension_numbers<[1], [0], [0], [1], [0, 0, 1, 1], [], []>} : vector<32x4xf32>, vector<4x512xf32>, vector<32x512xf32> -> vector<32x512xf32>
    %c0_8 = arith.constant 0 : index
    %c0_9 = arith.constant 0 : index
    %9 = vector.load %arg5[%c0_8, %c0_9] : memref<32x1xf32, #tpu.memory_space<vmem>>, vector<32x1xf32>
    %10 = vector.broadcast %9 : vector<32x1xf32> to vector<32x512xf32>
    %11 = arith.addf %8, %10 : vector<32x512xf32>
    %cst_10 = arith.constant 9.99999997E-7 : f32
    %12 = vector.broadcast %cst_10 : f32 to vector<32x512xf32>
    %13 = arith.addf %11, %12 : vector<32x512xf32>
    %14 = math.rsqrt %13 : vector<32x512xf32>
    %15 = arith.mulf %13, %14 : vector<32x512xf32>
    %16 = arith.mulf %5, %14 : vector<32x512xf32>
    %cst_11 = arith.constant -5.000000e-01 : f32
    %17 = vector.broadcast %cst_11 : f32 to vector<32x512xf32>
    %18 = arith.mulf %17, %16 : vector<32x512xf32>
    %19 = arith.mulf %18, %16 : vector<32x512xf32>
    %20 = math.exp %19 : vector<32x512xf32>
    %cst_12 = arith.constant 0.707106769 : f32
    %21 = vector.broadcast %cst_12 : f32 to vector<32x512xf32>
    %22 = arith.mulf %16, %21 : vector<32x512xf32>
    %cst_13 = arith.constant 0.000000e+00 : f32
    %23 = vector.broadcast %cst_13 : f32 to vector<32x512xf32>
    %24 = arith.cmpf olt, %22, %23 : vector<32x512xf32>
    %cst_14 = arith.constant -1.000000e+00 : f32
    %cst_15 = arith.constant 1.000000e+00 : f32
    %25 = vector.broadcast %cst_14 : f32 to vector<32x512xf32>
    %26 = vector.broadcast %cst_15 : f32 to vector<32x512xf32>
    %27 = arith.select %24, %25, %26 : vector<32x512xi1>, vector<32x512xf32>
    %28 = math.absf %22 : vector<32x512xf32>
    %cst_16 = arith.constant 0.327591091 : f32
    %29 = vector.broadcast %cst_16 : f32 to vector<32x512xf32>
    %30 = arith.mulf %29, %28 : vector<32x512xf32>
    %cst_17 = arith.constant 1.000000e+00 : f32
    %31 = vector.broadcast %cst_17 : f32 to vector<32x512xf32>
    %32 = arith.addf %31, %30 : vector<32x512xf32>
    %cst_18 = arith.constant 1.000000e+00 : f32
    %33 = vector.broadcast %cst_18 : f32 to vector<32x512xf32>
    %34 = arith.divf %33, %32 : vector<32x512xf32>
    %cst_19 = arith.constant 1.06140542 : f32
    %35 = vector.broadcast %cst_19 : f32 to vector<32x512xf32>
    %36 = arith.mulf %34, %35 : vector<32x512xf32>
    %cst_20 = arith.constant -1.45315206 : f32
    %37 = vector.broadcast %cst_20 : f32 to vector<32x512xf32>
    %38 = arith.addf %37, %36 : vector<32x512xf32>
    %39 = arith.mulf %34, %38 : vector<32x512xf32>
    %cst_21 = arith.constant 1.42141378 : f32
    %40 = vector.broadcast %cst_21 : f32 to vector<32x512xf32>
    %41 = arith.addf %40, %39 : vector<32x512xf32>
    %42 = arith.mulf %34, %41 : vector<32x512xf32>
    %cst_22 = arith.constant -0.284496725 : f32
    %43 = vector.broadcast %cst_22 : f32 to vector<32x512xf32>
    %44 = arith.addf %43, %42 : vector<32x512xf32>
    %45 = arith.mulf %34, %44 : vector<32x512xf32>
    %cst_23 = arith.constant 0.254829586 : f32
    %46 = vector.broadcast %cst_23 : f32 to vector<32x512xf32>
    %47 = arith.addf %46, %45 : vector<32x512xf32>
    %48 = arith.mulf %34, %47 : vector<32x512xf32>
    %49 = arith.mulf %48, %20 : vector<32x512xf32>
    %cst_24 = arith.constant 1.000000e+00 : f32
    %50 = vector.broadcast %cst_24 : f32 to vector<32x512xf32>
    %51 = arith.subf %50, %49 : vector<32x512xf32>
    %52 = arith.mulf %27, %51 : vector<32x512xf32>
    %cst_25 = arith.constant 1.000000e+00 : f32
    %53 = vector.broadcast %cst_25 : f32 to vector<32x512xf32>
    %54 = arith.addf %53, %52 : vector<32x512xf32>
    %cst_26 = arith.constant 5.000000e-01 : f32
    %55 = vector.broadcast %cst_26 : f32 to vector<32x512xf32>
    %56 = arith.mulf %55, %54 : vector<32x512xf32>
    %cst_27 = arith.constant 0.398942292 : f32
    %57 = vector.broadcast %cst_27 : f32 to vector<32x512xf32>
    %58 = arith.mulf %57, %20 : vector<32x512xf32>
    %59 = arith.mulf %16, %56 : vector<32x512xf32>
    %60 = arith.addf %58, %59 : vector<32x512xf32>
    %61 = arith.mulf %15, %60 : vector<32x512xf32>
    %62 = arith.mulf %16, %16 : vector<32x512xf32>
    %cst_28 = arith.constant 1.000000e+00 : f32
    %63 = vector.broadcast %cst_28 : f32 to vector<32x512xf32>
    %64 = arith.addf %62, %63 : vector<32x512xf32>
    %65 = arith.mulf %64, %56 : vector<32x512xf32>
    %66 = arith.mulf %16, %58 : vector<32x512xf32>
    %67 = arith.addf %65, %66 : vector<32x512xf32>
    %68 = arith.mulf %13, %67 : vector<32x512xf32>
    %69 = arith.mulf %61, %61 : vector<32x512xf32>
    %70 = arith.subf %68, %69 : vector<32x512xf32>
    %cst_29 = arith.constant 0.000000e+00 : f32
    %71 = vector.broadcast %cst_29 : f32 to vector<32x512xf32>
    %72 = arith.maximumf %70, %71 : vector<32x512xf32>
    %73 = arith.mulf %61, %61 : vector<32x512xf32>
    %74 = tpu.concatenate %73, %72 in 0 : vector<32x512xf32>, vector<32x512xf32> -> vector<64x512xf32>
    %c0_30 = arith.constant 0 : index
    %c0_31 = arith.constant 0 : index
    %75 = vector.load %arg6[%c0_30, %c0_31] : memref<32x32xf32, #tpu.memory_space<vmem>>, vector<32x32xf32>
    %cst_32 = arith.constant dense<0.000000e+00> : vector<32x512xf32>
    %76 = tpu.matmul %75, %61, %cst_32 {dimension_numbers = #tpu.dot_dimension_numbers<[1], [0], [0], [1], [0, 0, 1, 1], [], []>} : vector<32x32xf32>, vector<32x512xf32>, vector<32x512xf32> -> vector<32x512xf32>
    %c0_33 = arith.constant 0 : index
    %c0_34 = arith.constant 0 : index
    %77 = vector.load %arg8[%c0_33, %c0_34] : memref<32x1xf32, #tpu.memory_space<vmem>>, vector<32x1xf32>
    %78 = vector.broadcast %77 : vector<32x1xf32> to vector<32x512xf32>
    %79 = arith.addf %76, %78 : vector<32x512xf32>
    %c0_35 = arith.constant 0 : index
    %c0_36 = arith.constant 0 : index
    %80 = vector.load %arg7[%c0_35, %c0_36] : memref<32x64xf32, #tpu.memory_space<vmem>>, vector<32x64xf32>
    %cst_37 = arith.constant dense<0.000000e+00> : vector<32x512xf32>
    %81 = tpu.matmul %80, %74, %cst_37 {dimension_numbers = #tpu.dot_dimension_numbers<[1], [0], [0], [1], [0, 0, 1, 1], [], []>} : vector<32x64xf32>, vector<64x512xf32>, vector<32x512xf32> -> vector<32x512xf32>
    %c0_38 = arith.constant 0 : index
    %c0_39 = arith.constant 0 : index
    %82 = vector.load %arg9[%c0_38, %c0_39] : memref<32x1xf32, #tpu.memory_space<vmem>>, vector<32x1xf32>
    %83 = vector.broadcast %82 : vector<32x1xf32> to vector<32x512xf32>
    %84 = arith.addf %81, %83 : vector<32x512xf32>
    %cst_40 = arith.constant 9.99999997E-7 : f32
    %85 = vector.broadcast %cst_40 : f32 to vector<32x512xf32>
    %86 = arith.addf %84, %85 : vector<32x512xf32>
    %87 = math.rsqrt %86 : vector<32x512xf32>
    %88 = arith.mulf %86, %87 : vector<32x512xf32>
    %89 = arith.mulf %79, %87 : vector<32x512xf32>
    %cst_41 = arith.constant -5.000000e-01 : f32
    %90 = vector.broadcast %cst_41 : f32 to vector<32x512xf32>
    %91 = arith.mulf %90, %89 : vector<32x512xf32>
    %92 = arith.mulf %91, %89 : vector<32x512xf32>
    %93 = math.exp %92 : vector<32x512xf32>
    %cst_42 = arith.constant 0.707106769 : f32
    %94 = vector.broadcast %cst_42 : f32 to vector<32x512xf32>
    %95 = arith.mulf %89, %94 : vector<32x512xf32>
    %cst_43 = arith.constant 0.000000e+00 : f32
    %96 = vector.broadcast %cst_43 : f32 to vector<32x512xf32>
    %97 = arith.cmpf olt, %95, %96 : vector<32x512xf32>
    %cst_44 = arith.constant -1.000000e+00 : f32
    %cst_45 = arith.constant 1.000000e+00 : f32
    %98 = vector.broadcast %cst_44 : f32 to vector<32x512xf32>
    %99 = vector.broadcast %cst_45 : f32 to vector<32x512xf32>
    %100 = arith.select %97, %98, %99 : vector<32x512xi1>, vector<32x512xf32>
    %101 = math.absf %95 : vector<32x512xf32>
    %cst_46 = arith.constant 0.327591091 : f32
    %102 = vector.broadcast %cst_46 : f32 to vector<32x512xf32>
    %103 = arith.mulf %102, %101 : vector<32x512xf32>
    %cst_47 = arith.constant 1.000000e+00 : f32
    %104 = vector.broadcast %cst_47 : f32 to vector<32x512xf32>
    %105 = arith.addf %104, %103 : vector<32x512xf32>
    %cst_48 = arith.constant 1.000000e+00 : f32
    %106 = vector.broadcast %cst_48 : f32 to vector<32x512xf32>
    %107 = arith.divf %106, %105 : vector<32x512xf32>
    %cst_49 = arith.constant 1.06140542 : f32
    %108 = vector.broadcast %cst_49 : f32 to vector<32x512xf32>
    %109 = arith.mulf %107, %108 : vector<32x512xf32>
    %cst_50 = arith.constant -1.45315206 : f32
    %110 = vector.broadcast %cst_50 : f32 to vector<32x512xf32>
    %111 = arith.addf %110, %109 : vector<32x512xf32>
    %112 = arith.mulf %107, %111 : vector<32x512xf32>
    %cst_51 = arith.constant 1.42141378 : f32
    %113 = vector.broadcast %cst_51 : f32 to vector<32x512xf32>
    %114 = arith.addf %113, %112 : vector<32x512xf32>
    %115 = arith.mulf %107, %114 : vector<32x512xf32>
    %cst_52 = arith.constant -0.284496725 : f32
    %116 = vector.broadcast %cst_52 : f32 to vector<32x512xf32>
    %117 = arith.addf %116, %115 : vector<32x512xf32>
    %118 = arith.mulf %107, %117 : vector<32x512xf32>
    %cst_53 = arith.constant 0.254829586 : f32
    %119 = vector.broadcast %cst_53 : f32 to vector<32x512xf32>
    %120 = arith.addf %119, %118 : vector<32x512xf32>
    %121 = arith.mulf %107, %120 : vector<32x512xf32>
    %122 = arith.mulf %121, %93 : vector<32x512xf32>
    %cst_54 = arith.constant 1.000000e+00 : f32
    %123 = vector.broadcast %cst_54 : f32 to vector<32x512xf32>
    %124 = arith.subf %123, %122 : vector<32x512xf32>
    %125 = arith.mulf %100, %124 : vector<32x512xf32>
    %cst_55 = arith.constant 1.000000e+00 : f32
    %126 = vector.broadcast %cst_55 : f32 to vector<32x512xf32>
    %127 = arith.addf %126, %125 : vector<32x512xf32>
    %cst_56 = arith.constant 5.000000e-01 : f32
    %128 = vector.broadcast %cst_56 : f32 to vector<32x512xf32>
    %129 = arith.mulf %128, %127 : vector<32x512xf32>
    %cst_57 = arith.constant 0.398942292 : f32
    %130 = vector.broadcast %cst_57 : f32 to vector<32x512xf32>
    %131 = arith.mulf %130, %93 : vector<32x512xf32>
    %132 = arith.mulf %89, %129 : vector<32x512xf32>
    %133 = arith.addf %131, %132 : vector<32x512xf32>
    %134 = arith.mulf %88, %133 : vector<32x512xf32>
    %135 = arith.mulf %89, %89 : vector<32x512xf32>
    %cst_58 = arith.constant 1.000000e+00 : f32
    %136 = vector.broadcast %cst_58 : f32 to vector<32x512xf32>
    %137 = arith.addf %135, %136 : vector<32x512xf32>
    %138 = arith.mulf %137, %129 : vector<32x512xf32>
    %139 = arith.mulf %89, %131 : vector<32x512xf32>
    %140 = arith.addf %138, %139 : vector<32x512xf32>
    %141 = arith.mulf %86, %140 : vector<32x512xf32>
    %142 = arith.mulf %134, %134 : vector<32x512xf32>
    %143 = arith.subf %141, %142 : vector<32x512xf32>
    %cst_59 = arith.constant 0.000000e+00 : f32
    %144 = vector.broadcast %cst_59 : f32 to vector<32x512xf32>
    %145 = arith.maximumf %143, %144 : vector<32x512xf32>
    %146 = arith.mulf %134, %134 : vector<32x512xf32>
    %147 = tpu.concatenate %146, %145 in 0 : vector<32x512xf32>, vector<32x512xf32> -> vector<64x512xf32>
    %c0_60 = arith.constant 0 : index
    %c0_61 = arith.constant 0 : index
    %148 = vector.load %arg10[%c0_60, %c0_61] : memref<4x32xf32, #tpu.memory_space<vmem>>, vector<4x32xf32>
    %cst_62 = arith.constant dense<0.000000e+00> : vector<4x512xf32>
    %149 = tpu.matmul %148, %134, %cst_62 {dimension_numbers = #tpu.dot_dimension_numbers<[1], [0], [0], [1], [0, 0, 1, 1], [], []>} : vector<4x32xf32>, vector<32x512xf32>, vector<4x512xf32> -> vector<4x512xf32>
    %c0_63 = arith.constant 0 : index
    %c0_64 = arith.constant 0 : index
    %150 = vector.load %arg12[%c0_63, %c0_64] : memref<4x1xf32, #tpu.memory_space<vmem>>, vector<4x1xf32>
    %151 = vector.broadcast %150 : vector<4x1xf32> to vector<4x512xf32>
    %152 = arith.addf %149, %151 : vector<4x512xf32>
    %c0_65 = arith.constant 0 : index
    %c0_66 = arith.constant 0 : index
    %153 = vector.load %arg11[%c0_65, %c0_66] : memref<4x64xf32, #tpu.memory_space<vmem>>, vector<4x64xf32>
    %cst_67 = arith.constant dense<0.000000e+00> : vector<4x512xf32>
    %154 = tpu.matmul %153, %147, %cst_67 {dimension_numbers = #tpu.dot_dimension_numbers<[1], [0], [0], [1], [0, 0, 1, 1], [], []>} : vector<4x64xf32>, vector<64x512xf32>, vector<4x512xf32> -> vector<4x512xf32>
    %c0_68 = arith.constant 0 : index
    %c0_69 = arith.constant 0 : index
    %155 = vector.load %arg13[%c0_68, %c0_69] : memref<4x1xf32, #tpu.memory_space<vmem>>, vector<4x1xf32>
    %156 = vector.broadcast %155 : vector<4x1xf32> to vector<4x512xf32>
    %157 = arith.addf %154, %156 : vector<4x512xf32>
    %158 = tpu.concatenate %152, %157 in 0 : vector<4x512xf32>, vector<4x512xf32> -> vector<8x512xf32>
    %c0_70 = arith.constant 0 : index
    %c0_71 = arith.constant 0 : index
    %159 = vector.load %arg14[%c0_70, %c0_71] : memref<8x512xf32, #tpu.memory_space<vmem>>, vector<8x512xf32>
    tpu.vector_store %arg14[%c0_70, %c0_71], %158 {strides = array<i32>} : memref<8x512xf32, #tpu.memory_space<vmem>>, vector<8x512xf32>,
    return
  }
  func.func @transform_0(%arg0: i32) -> (i32, i32) {
    %c0_i32 = arith.constant 0 : i32
    %c0_i32_0 = arith.constant 0 : i32
    return %c0_i32, %arg0 : i32, i32
  }
  func.func @transform_1(%arg0: i32) -> (i32, i32) {
    %c0_i32 = arith.constant 0 : i32
    %c0_i32_0 = arith.constant 0 : i32
    %c0_i32_1 = arith.constant 0 : i32
    return %c0_i32, %c0_i32_0 : i32, i32
  }
  func.func @transform_2(%arg0: i32) -> (i32, i32) {
    %c0_i32 = arith.constant 0 : i32
    %c0_i32_0 = arith.constant 0 : i32
    %c0_i32_1 = arith.constant 0 : i32
    return %c0_i32, %c0_i32_0 : i32, i32
  }
  func.func @transform_3(%arg0: i32) -> (i32, i32) {
    %c0_i32 = arith.constant 0 : i32
    %c0_i32_0 = arith.constant 0 : i32
    %c0_i32_1 = arith.constant 0 : i32
    return %c0_i32, %c0_i32_0 : i32, i32
  }
  func.func @transform_4(%arg0: i32) -> (i32, i32) {
    %c0_i32 = arith.constant 0 : i32
    %c0_i32_0 = arith.constant 0 : i32
    %c0_i32_1 = arith.constant 0 : i32
    return %c0_i32, %c0_i32_0 : i32, i32
  }
  func.func @transform_5(%arg0: i32) -> (i32, i32) {
    %c0_i32 = arith.constant 0 : i32
    %c0_i32_0 = arith.constant 0 : i32
    %c0_i32_1 = arith.constant 0 : i32
    return %c0_i32, %c0_i32_0 : i32, i32
  }
  func.func @transform_6(%arg0: i32) -> (i32, i32) {
    %c0_i32 = arith.constant 0 : i32
    %c0_i32_0 = arith.constant 0 : i32
    %c0_i32_1 = arith.constant 0 : i32
    return %c0_i32, %c0_i32_0 : i32, i32
  }
  func.func @transform_7(%arg0: i32) -> (i32, i32) {
    %c0_i32 = arith.constant 0 : i32
    %c0_i32_0 = arith.constant 0 : i32
    %c0_i32_1 = arith.constant 0 : i32
    return %c0_i32, %c0_i32_0 : i32, i32
  }
  func.func @transform_8(%arg0: i32) -> (i32, i32) {
    %c0_i32 = arith.constant 0 : i32
    %c0_i32_0 = arith.constant 0 : i32
    %c0_i32_1 = arith.constant 0 : i32
    return %c0_i32, %c0_i32_0 : i32, i32
  }
  func.func @transform_9(%arg0: i32) -> (i32, i32) {
    %c0_i32 = arith.constant 0 : i32
    %c0_i32_0 = arith.constant 0 : i32
    %c0_i32_1 = arith.constant 0 : i32
    return %c0_i32, %c0_i32_0 : i32, i32
  }
  func.func @transform_10(%arg0: i32) -> (i32, i32) {
    %c0_i32 = arith.constant 0 : i32
    %c0_i32_0 = arith.constant 0 : i32
    %c0_i32_1 = arith.constant 0 : i32
    return %c0_i32, %c0_i32_0 : i32, i32
  }
  func.func @transform_11(%arg0: i32) -> (i32, i32) {
    %c0_i32 = arith.constant 0 : i32
    %c0_i32_0 = arith.constant 0 : i32
    %c0_i32_1 = arith.constant 0 : i32
    return %c0_i32, %c0_i32_0 : i32, i32
  }
  func.func @transform_12(%arg0: i32) -> (i32, i32) {
    %c0_i32 = arith.constant 0 : i32
    %c0_i32_0 = arith.constant 0 : i32
    %c0_i32_1 = arith.constant 0 : i32
    return %c0_i32, %c0_i32_0 : i32, i32
  }
  func.func @transform_13(%arg0: i32) -> (i32, i32) {
    %c0_i32 = arith.constant 0 : i32
    %c0_i32_0 = arith.constant 0 : i32
    return %c0_i32, %arg0 : i32, i32
  }
}

</mosaic_0001>

<bundles_post_ra>
// kernel: tpu_custom_call.1
= control target key start
LH: loop header
LB: loop body
LE: loop exit
PB: predicated region body
PF: predicated region fallthrough
CT: control target
= control target key end

     0   :  { %vm92_vm0 = vcmask 1043456   ;;  %v5264_v6 = vmov 0.0   ;;  %vm79_vm1 = vcmask 31744   ;;  %s5250_s0 = inlined_call_operand.vmem [shape: f32[4,512], index: 0, kind: input, shape index: {}]   ;;  %s5251_s1 = inlined_call_operand.vmem [shape: f32[32,4], index: 1, kind: input, shape index: {}]   ;;  %s5252_s2 = inlined_call_operand.vmem [shape: f32[32,4], index: 2, kind: input, shape index: {}]   ;;  %s5253_s3 = inlined_call_operand.vmem [shape: f32[32,1], index: 3, kind: input, shape index: {}]   ;;  %s5254_s4 = inlined_call_operand.vmem [shape: f32[32,1], index: 4, kind: input, shape index: {}]   ;;  %s5255_s5 = inlined_call_operand.vmem [shape: f32[32,32], index: 5, kind: input, shape index: {}]   ;;  %s5256_s6 = inlined_call_operand.vmem [shape: f32[32,64], index: 6, kind: input, shape index: {}]   ;;  %s5257_s7 = inlined_call_operand.vmem [shape: f32[32,1], index: 7, kind: input, shape index: {}]   ;;  %s5258_s8 = inlined_call_operand.vmem [shape: f32[32,1], index: 8, kind: input, shape index: {}]   ;;  %s5259_s9 = inlined_call_operand.vmem [shape: f32[4,32], index: 9, kind: input, shape index: {}]   ;;  %s5260_s10 = inlined_call_operand.vmem [shape: f32[4,64], index: 10, kind: input, shape index: {}]   ;;  %s5261_s11 = inlined_call_operand.vmem [shape: f32[4,1], index: 11, kind: input, shape index: {}]   ;;  %s5262_s12 = inlined_call_operand.vmem [shape: f32[4,1], index: 12, kind: input, shape index: {}]   ;;  %s5263_s13 = inlined_call_operand.hbm [shape: f32[8,512], index: 13, kind: output, shape index: {}]  }
   0x1   :  { %v45_v0 = vld [vmem:[%s5250_s0] sm:$0xff]  ;;  %v46_v1 = vld [vmem:[%s5250_s0 + $0x8] sm:$0xff]  ;;  %165 = vmatprep.mubr.f32.mxu0 %v5264_v6  ;;  %254 = vmatprep.mubr.f32.mxu1 %v5264_v6  ;;  %v287_v12 = vld [vmem:[%s5254_s4 + $0x10] sm:$0xff] }
   0x2   :  { %v77_v2 = vcombine.high %v45_v0, %v45_v0  ;;  %v283_v3 = vmul.f32 %v45_v0, %v45_v0  ;;  %v78_v4 = vcombine.high %v46_v1, %v46_v1  ;;  %v284_v5 = vmul.f32 %v46_v1, %v46_v1  ;;  %v47_v7 = vld [vmem:[%s5251_s1] sm:$0xff]  ;;  %v48_v10 = vld [vmem:[%s5251_s1 + $0x8] sm:$0xff] }
   0x3   :  { %v285_v11 = vld [vmem:[%s5254_s4] sm:$0xff] }
   0x4   :  { %2663 = vmatprep.subr.msk.mxu0 %vm92_vm0, %v77_v2  ;;  %2669 = vmatprep.subr.msk.mxu1 %vm92_vm0, %v78_v4  ;;  %v311_v8 = vcombine.high %v283_v3, %v283_v3  ;;  %v312_v9 = vcombine.high %v284_v5, %v284_v5 }
   0x5   :  { %2664 = vmatpush1.msk.msra.mxu0 %vm92_vm0, %v45_v0  ;;  %2670 = vmatpush1.msk.msra.mxu1 %vm92_vm0, %v46_v1 }
   0x6   :  { %2665 = vmatmul.mubr.msk.f32.vlgmr.msra.gmra.mrb[0].mxu0 %vm79_vm1, %v47_v7  ;;  %2671 = vmatmul.mubr.msk.f32.vlgmr.msra.gmra.mrb[0].mxu1 %vm79_vm1, %v47_v7 }
   0x7   :  { %171 = vmatprep.mubr.f32.mxu0 %v5264_v6  ;;  %260 = vmatprep.mubr.f32.mxu1 %v5264_v6 }
   0x8   :  { %2675 = vmatprep.subr.msk.mxu0 %vm92_vm0, %v311_v8  ;;  %2681 = vmatprep.subr.msk.mxu1 %vm92_vm0, %v312_v9 }
   0x9   :  { %2676 = vmatpush1.msk.msra.mxu0 %vm92_vm0, %v283_v3  ;;  %2682 = vmatpush1.msk.msra.mxu1 %vm92_vm0, %v284_v5 }
   0xa   :  { %2666 = vmatmul.mubr.msk.f32.gmra.mrb[2].mxu0 %vm79_vm1, %v48_v10  ;;  %2672 = vmatmul.mubr.msk.f32.gmra.mrb[2].mxu1 %vm79_vm1, %v48_v10 }
   0xb   :  { %18 = vsyncpa [#allocation3], 0  ;;  %177 = vmatprep.mubr.f32.mxu0 %v5264_v6  ;;  %266 = vmatprep.mubr.f32.mxu1 %v5264_v6  ;;  %v49_v13 = vld [vmem:[%s5251_s1 + $0x10] sm:$0xff]  ;;  %v3028_v14 = vmov 0   ;;  %v286_v15 = vld [vmem:[%s5254_s4 + $0x8] sm:$0xff] }
   0xc   :  { %2807 = vset.pattern.permute.xlu0 %v3028_v14  ;;  %2808 = vset.pattern.permute.xlu1 %v3028_v14  ;;  %v288_v16 = vld [vmem:[%s5254_s4 + $0x18] sm:$0xff]  ;;  %v51_v18 = vld [vmem:[%s5253_s3] sm:$0xff]  ;;  %v52_v19 = vld [vmem:[%s5253_s3 + $0x8] sm:$0xff] }
   0xd   :  { %291 = vperm.xlu0 %2807, %v285_v11   ;;  %301 = vperm.xlu1 %2808, %v287_v12   ;;  %v50_v17 = vld [vmem:[%s5251_s1 + $0x18] sm:$0xff]  ;;  %v279_v20 = vld [vmem:[%s5252_s2] sm:$0xff]  ;;  %v53_v21 = vld [vmem:[%s5253_s3 + $0x10] sm:$0xff] }
   0xe   :  { %2667 = vmatmul.mubr.msk.f32.gmra.mrb[4].mxu0 %vm79_vm1, %v49_v13  ;;  %2673 = vmatmul.mubr.msk.f32.gmra.mrb[4].mxu1 %vm79_vm1, %v49_v13  ;;  %v54_v22 = vld [vmem:[%s5253_s3 + $0x18] sm:$0xff]  ;;  %v280_v23 = vld [vmem:[%s5252_s2 + $0x8] sm:$0xff]  ;;  %v1422_v24 = vld [vmem:[%s5258_s8] sm:$0xff] }
   0xf   :  { %183 = vmatprep.mubr.f32.mxu0 %v5264_v6  ;;  %272 = vmatprep.mubr.f32.mxu1 %v5264_v6  ;;  %v1423_v25 = vld [vmem:[%s5258_s8 + $0x8] sm:$0xff]  ;;  %v281_v26 = vld [vmem:[%s5252_s2 + $0x10] sm:$0xff]  ;;  %v1425_v28 = vld [vmem:[%s5258_s8 + $0x18] sm:$0xff] }
  0x10   :  { %v1424_v27 = vld [vmem:[%s5258_s8 + $0x10] sm:$0xff]  ;;  %v282_v29 = vld [vmem:[%s5252_s2 + $0x18] sm:$0xff]  ;;  %v1203_v30 = vld [vmem:[%s5257_s7] sm:$0xff] }
  0x11   :  { %296 = vperm.xlu0 %2807, %v286_v15   ;;  %306 = vperm.xlu1 %2808, %v288_v16   ;;  %v1204_v31 = vld [vmem:[%s5257_s7 + $0x8] sm:$0xff]  ;;  %v1205_v32 = vld [vmem:[%s5257_s7 + $0x10] sm:$0xff]  ;;  %v1206_v33 = vld [vmem:[%s5257_s7 + $0x18] sm:$0xff] }
  0x12   :  { %2668 = vmatmul.mubr.msk.f32.gmra.mrb[6].mxu0 %vm79_vm1, %v50_v17  ;;  %2674 = vmatmul.mubr.msk.f32.gmra.mrb[6].mxu1 %vm79_vm1, %v50_v17  ;;  %v2478_v34 = vld [vmem:[%s5262_s12] sm:$0xf] }
  0x13   :  { %397 = vmatprep.mubr.f32.mxu0 %v5264_v6  ;;  %486 = vmatprep.mubr.f32.mxu1 %v5264_v6  ;;  %v2326_v35 = vld [vmem:[%s5261_s11] sm:$0xf] }
  0x15   :  { %57 = vperm.xlu0 %2807, %v51_v18   ;;  %62 = vperm.xlu1 %2808, %v52_v19  }
  0x16   :  { %2677 = vmatmul.mubr.msk.f32.vlgmr.msra.gmra.mrb[8].mxu0 %vm79_vm1, %v279_v20  ;;  %2683 = vmatmul.mubr.msk.f32.vlgmr.msra.gmra.mrb[8].mxu1 %vm79_vm1, %v279_v20 }
  0x17   :  { %403 = vmatprep.mubr.f32.mxu0 %v5264_v6  ;;  %492 = vmatprep.mubr.f32.mxu1 %v5264_v6 }
  0x19   :  { %67 = vperm.xlu0 %2807, %v53_v21   ;;  %72 = vperm.xlu1 %2808, %v54_v22  }
  0x1a   :  { %2678 = vmatmul.mubr.msk.f32.gmra.mrb[10].mxu0 %vm79_vm1, %v280_v23  ;;  %2684 = vmatmul.mubr.msk.f32.gmra.mrb[10].mxu1 %vm79_vm1, %v280_v23 }
  0x1b   :  { %409 = vmatprep.mubr.f32.mxu0 %v5264_v6  ;;  %498 = vmatprep.mubr.f32.mxu1 %v5264_v6 }
  0x1d   :  { %1428 = vperm.xlu0 %2807, %v1422_v24   ;;  %1433 = vperm.xlu1 %2808, %v1423_v25  }
  0x1e   :  { %2679 = vmatmul.mubr.msk.f32.gmra.mrb[12].mxu0 %vm79_vm1, %v281_v26  ;;  %2685 = vmatmul.mubr.msk.f32.gmra.mrb[12].mxu1 %vm79_vm1, %v281_v26 }
  0x1f   :  { %415 = vmatprep.mubr.f32.mxu0 %v5264_v6  ;;  %504 = vmatprep.mubr.f32.mxu1 %v5264_v6 }
  0x21   :  { %1438 = vperm.xlu0 %2807, %v1424_v27   ;;  %1443 = vperm.xlu1 %2808, %v1425_v28  }
  0x22   :  { %2680 = vmatmul.mubr.msk.f32.gmra.mrb[14].mxu0 %vm79_vm1, %v282_v29  ;;  %2686 = vmatmul.mubr.msk.f32.gmra.mrb[14].mxu1 %vm79_vm1, %v282_v29 }
  0x23   :  { %1304 = vmatprep.mubr.f32.mxu0 %v5264_v6  ;;  %1393 = vmatprep.mubr.f32.mxu1 %v5264_v6 }
  0x25   :  { %1209 = vperm.xlu0 %2807, %v1203_v30   ;;  %1214 = vperm.xlu1 %2808, %v1204_v31  }
  0x29   :  { %1219 = vperm.xlu0 %2807, %v1205_v32   ;;  %1224 = vperm.xlu1 %2808, %v1206_v33  }
  0x2d   :  { %2481 = vperm.xlu0 %2807, %v2478_v34   ;;  %2329 = vperm.xlu1 %2808, %v2326_v35  }
  0x8c   :  { %v292_v48 = vpop.permute.xlu0 %291  ;;  %v3291_v20 = vpop.permute.xlu1 %301 }
  0x90   :  { %v3253_v60 = vpop.permute.xlu0 %296  ;;  %v3313_v31 = vpop.permute.xlu1 %306 }
  0x94   :  { %v58_v13 = vpop.permute.xlu0 %57 }
  0xd9   :  { %v167_v36 = vpop.f32.mrb[0].mxu0  ;;  %v256_v37 = vpop.f32.mrb[0].mxu1 }
  0xda   :  { %v169_v38 = vpop.f32.mrb[1].mxu0  ;;  %v3227_v39 = vpop.f32.mrb[1].mxu1  ;;  %v168_v21 = vadd.f32 %v167_v36, %v58_v13  ;;  %v257_v23 = vadd.f32 %v256_v37, %v58_v13 }
  0xdb   :  { %v170_v28 = vadd.f32 %v169_v38, %v58_v13 }
  0xdd   :  { %v3229_v40 = vpop.f32.mrb[2].mxu0  ;;  %v3231_v41 = vpop.f32.mrb[2].mxu1 }
  0xde   :  { %v3233_v42 = vpop.f32.mrb[3].mxu0  ;;  %v3235_v43 = vpop.f32.mrb[3].mxu1 }
  0xe1   :  { %v3237_v44 = vpop.f32.mrb[4].mxu0  ;;  %v3239_v45 = vpop.f32.mrb[4].mxu1 }
  0xe2   :  { %v3241_v46 = vpop.f32.mrb[5].mxu0  ;;  %v3243_v47 = vpop.f32.mrb[5].mxu1 }
  0xe5   :  { %v3245_v49 = vpop.f32.mrb[6].mxu0  ;;  %v3247_v50 = vpop.f32.mrb[6].mxu1 }
  0xe6   :  { %v3249_v51 = vpop.f32.mrb[7].mxu0  ;;  %v3251_v52 = vpop.f32.mrb[7].mxu1 }
  0xe9   :  { %v399_v53 = vpop.f32.mrb[8].mxu0  ;;  %v488_v54 = vpop.f32.mrb[8].mxu1 }
  0xea   :  { %v400_v55 = vadd.f32 %v399_v53, %v292_v48  ;;  %v489_v56 = vadd.f32 %v488_v54, %v292_v48  ;;  %v401_v57 = vpop.f32.mrb[9].mxu0  ;;  %v490_v58 = vpop.f32.mrb[9].mxu1 }
  0xeb   :  { %v402_v59 = vadd.f32 %v401_v57, %v292_v48  ;;  %v491_v2 = vadd.f32 %v490_v58, %v292_v48  ;;  %v259_v48 = vadd.f32 %v3227_v39, %v58_v13 }
  0xec   :  { %v3255_v61 = vadd.f32 1e-06, %v400_v55  ;;  %v3257_v62 = vadd.f32 1e-06, %v489_v56 }
  0xed   :  { %v3259_v63 = vadd.f32 1e-06, %v402_v59  ;;  %v405_v0 = vpop.f32.mrb[10].mxu0  ;;  %v494_v1 = vpop.f32.mrb[10].mxu1  ;;  %v3272_v10 = vadd.f32 1e-06, %v491_v2 }
  0xee   :  { %2811 = vrsqrt.f32 %v3255_v61  ;;  %v407_v3 = vpop.f32.mrb[11].mxu0  ;;  %v3262_v4 = vpop.f32.mrb[11].mxu1  ;;  %v406_v5 = vadd.f32 %v405_v0, %v3253_v60  ;;  %v495_v7 = vadd.f32 %v494_v1, %v3253_v60 }
  0xef   :  { %5366 = vst [vmem:[#allocation5_spill] sm:$0xff] %v3259_v63  ;;  %2813 = vrsqrt.f32 %v3257_v62  ;;  %5367 = vst [vmem:[#allocation6_spill] sm:$0xff] %v3272_v10  ;;  %v408_v34 = vadd.f32 %v407_v3, %v3253_v60  ;;  %v63_v59 = vpop.permute.xlu1 %62 }
  0xf0   :  { %2815 = vrsqrt.f32 %v3259_v63  ;;  %v3278_v14 = vadd.f32 1e-06, %v406_v5  ;;  %v3280_v15 = vadd.f32 1e-06, %v495_v7  ;;  %v174_v39 = vadd.f32 %v3229_v40, %v63_v59 }
  0xf1   :  { %v3268_v8 = vpop.f32.mrb[12].mxu0  ;;  %v3270_v9 = vpop.f32.mrb[12].mxu1  ;;  %2817 = vrsqrt.f32 %v3272_v10  ;;  %v3327_v55 = vadd.f32 1e-06, %v408_v34  ;;  %v263_v2 = vadd.f32 %v3231_v41, %v63_v59  ;;  %v3351_v40 = vadd.f32 %v3235_v43, %v63_v59 }
  0xf2   :  { %v3274_v11 = vpop.f32.mrb[13].mxu0  ;;  %v3276_v12 = vpop.f32.mrb[13].mxu1  ;;  %2819 = vrsqrt.f32 %v3278_v14  ;;  %v497_v43 = vadd.f32 %v3262_v4, %v3253_v60  ;;  %v501_v6 = vadd.f32 %v3270_v9, %v3291_v20 }
  0xf3   :  { %2821 = vrsqrt.f32 %v3280_v15  ;;  %5371 = vst [vmem:[#allocation10_spill] sm:$0xff] %v3327_v55 }
  0xf5   :  { %v3282_v16 = vpop.f32.mrb[14].mxu0  ;;  %v3284_v17 = vpop.f32.mrb[14].mxu1 }
  0xf6   :  { %v3287_v18 = vpop.f32.mrb[15].mxu0  ;;  %v3289_v19 = vpop.f32.mrb[15].mxu1 }
  0xf8   :  { %v3293_v22 = vpop.eup %2811 }
  0xf9   :  { %v3296_v24 = vpop.eup %2813  ;;  %v3299_v25 = vmul.f32 %v3293_v22, %v168_v21  ;;  %v68_v21 = vpop.permute.xlu0 %67 }
  0xfa   :  { %v3302_v26 = vpop.eup %2815  ;;  %v3305_v27 = vmul.f32 %v3296_v24, %v257_v23  ;;  %v176_v23 = vadd.f32 %v3233_v42, %v63_v59 }
  0xfb   :  { %5368 = vst [vmem:[#allocation7_spill] sm:$0xff] %v3302_v26  ;;  %v3308_v29 = vmul.f32 0.70710677, %v3299_v25  ;;  %v3317_v33 = vmul.f32 %v3302_v26, %v170_v28  ;;  %v3321_v37 = vpop.eup %2817  ;;  %v575_v34 = vmul.f32 -0.5, %v3299_v25 }
  0xfc   :  { %v3311_v30 = vmul.f32 0.70710677, %v3305_v27  ;;  %5370 = vst [vmem:[#allocation9_spill] sm:$0xff] %v3321_v37  ;;  %v3329_v56 = vpop.eup %2819  ;;  %v3335_v1 = vmul.f32 %v3321_v37, %v259_v48  ;;  %v577_v42 = vmul.f32 -0.5, %v3305_v27  ;;  %v73_v48 = vpop.permute.xlu1 %72 }
  0xfd   :  { %v687_v32 = vand.u32 2147483647, %v3308_v29  ;;  %5369 = vst [vmem:[#allocation8_spill] sm:$0xff] %v3317_v33  ;;  %v3325_v54 = vmul.f32 0.70710677, %v3317_v33  ;;  %v3331_v58 = vpop.eup %2821  ;;  %v3344_v7 = vmul.f32 %v3329_v56, %v174_v39  ;;  %v3381_v39 = vadd.f32 %v3247_v50, %v73_v48 }
  0xfe   :  { %v689_v35 = vand.u32 2147483647, %v3311_v30  ;;  %v3340_v5 = vmul.f32 0.70710677, %v3335_v1  ;;  %v3347_v13 = vmul.f32 %v3331_v58, %v263_v2  ;;  %v591_v4 = vmul.f32 %v575_v34, %v3299_v25 }
  0xff   :  { %v703_v36 = vmul.f32 0.3275911, %v687_v32  ;;  %v688_v0 = vand.u32 2147483647, %v3325_v54  ;;  %v3355_v32 = vadd.f32 %v3237_v44, %v68_v21  ;;  %v3369_v44 = vadd.f32 %v3241_v46, %v68_v21  ;;  %5376 = vst [vmem:[#allocation15_spill] sm:$0xff] %v3381_v39 }
 0x100   :  { %v705_v38 = vmul.f32 0.3275911, %v689_v35  ;;  %5372 = vst [vmem:[#allocation11_spill] sm:$0xff] %v3340_v5  ;;  %v690_v28 = vand.u32 2147483647, %v3340_v5  ;;  %v579_v35 = vmul.f32 -0.5, %v3344_v7 }
 0x101   :  { %v719_v53 = vadd.f32 1.0, %v703_v36  ;;  %v704_v3 = vmul.f32 0.3275911, %v688_v0  ;;  %v3360_v36 = vmul.f32 0.70710677, %v3344_v7  ;;  %5373 = vst [vmem:[#allocation12_spill] sm:$0xff] %v3369_v44  ;;  %v3375_v0 = vadd.f32 %v3243_v47, %v68_v21 }
 0x102   :  { %v721_v57 = vadd.f32 1.0, %v705_v38  ;;  %v3363_v38 = vadd.f32 %v3239_v45, %v68_v21  ;;  %v581_v59 = vmul.f32 -0.5, %v3347_v13  ;;  %v3378_v45 = vadd.f32 %v3245_v49, %v73_v48 }
 0x103   :  { %2823 = vrcp.f32 %v719_v53  ;;  %v720_v41 = vadd.f32 1.0, %v704_v3  ;;  %v595_v53 = vmul.f32 %v579_v35, %v3344_v7  ;;  %5374 = vst [vmem:[#allocation13_spill] sm:$0xff] %v3375_v0  ;;  %v706_v60 = vmul.f32 0.3275911, %v690_v28 }
 0x104   :  { %2825 = vrcp.f32 %v721_v57  ;;  %v691_v57 = vand.u32 2147483647, %v3360_v36  ;;  %5375 = vst [vmem:[#allocation14_spill] sm:$0xff] %v3378_v45  ;;  %v597_v3 = vmul.f32 %v581_v59, %v3347_v13  ;;  %v3388_v35 = vadd.f32 %v3249_v51, %v73_v48 }
 0x105   :  { %2827 = vrsqrt.f32 %v3327_v55  ;;  %v615_v46 = vmul.f32 1.442695, %v595_v53  ;;  %v593_v47 = vmul.f32 %v577_v42, %v3305_v27  ;;  %v3392_v49 = vmul.f32 0.70710677, %v3347_v13 }
 0x106   :  { %2829 = vrcp.f32 %v720_v41  ;;  %v707_v2 = vmul.f32 0.3275911, %v691_v57  ;;  %5377 = vst [vmem:[#allocation16_spill] sm:$0xff] %v3388_v35  ;;  %v3394_v21 = vadd.f32 1e-06, %v497_v43  ;;  %v412_v53 = vadd.f32 %v3268_v8, %v3291_v20 }
 0x107   :  { %2831 = vpow2.f32 %v615_v46  ;;  %v722_v59 = vadd.f32 1.0, %v706_v60  ;;  %v619_v42 = vmul.f32 1.442695, %v597_v3  ;;  %v607_v43 = vmul.f32 1.442695, %v591_v4 }
 0x108   :  { %5378 = vst [vmem:[#allocation17_spill] sm:$0xff] %v3394_v21  ;;  %v723_v34 = vadd.f32 1.0, %v707_v2  ;;  %v693_v39 = vand.u32 2147483647, %v3392_v49  ;;  %v611_v45 = vmul.f32 1.442695, %v593_v47  ;;  %v414_v8 = vadd.f32 %v3274_v11, %v3291_v20 }
 0x109   :  { %v3417_v3 = vadd.f32 1e-06, %v412_v53  ;;  %v503_v47 = vadd.f32 %v3276_v12, %v3291_v20  ;;  %vm655_vm2 = vcmp.lt.f32.partialorder %v3308_v29, 0.0  ;;  %vm657_vm3 = vcmp.lt.f32.partialorder %v3311_v30, 0.0 }
 0x10a   :  { %2833 = vrcp.f32 %v723_v34  ;;  %v709_v55 = vmul.f32 0.3275911, %v693_v39  ;;  %vm659_vm4 = vcmp.lt.f32.partialorder %v3360_v36, 0.0  ;;  %vm661_vm5 = vcmp.lt.f32.partialorder %v3392_v49, 0.0 }
 0x10b   :  { %2835 = vpow2.f32 %v619_v42  ;;  %5380 = vst [vmem:[#allocation19_spill] sm:$0xff] %v3417_v3  ;;  %vm656_vm6 = vcmp.lt.f32.partialorder %v3325_v54, 0.0 }
 0x10c   :  { %2837 = vrsqrt.f32 %v3394_v21 }
 0x10d   :  { %v3385_v41 = vpop.eup %2823  ;;  %2839 = vrcp.f32 %v722_v59  ;;  %v3431_v59 = vadd.f32 1e-06, %v414_v8 }
 0x10e   :  { %v3396_v50 = vpop.eup %2825  ;;  %v767_v28 = vmul.f32 1.0614054, %v3385_v41  ;;  %2841 = vpow2.f32 %v607_v43 }
 0x10f   :  { %v3401_v57 = vpop.eup %2827  ;;  %v769_v51 = vmul.f32 1.0614054, %v3396_v50  ;;  %2843 = vpow2.f32 %v611_v45  ;;  %5384 = vst [vmem:[#allocation23_spill] sm:$0xff] %v3431_v59  ;;  %v3450_v45 = vadd.f32 %v3287_v18, %v3313_v31  ;;  %v576_v18 = vmul.f32 -0.5, %v3317_v33 }
 0x110   :  { %5379 = vst [vmem:[#allocation18_spill] sm:$0xff] %v3401_v57  ;;  %v783_v35 = vadd.f32 -1.4531521, %v767_v28  ;;  %v3411_v60 = vmul.f32 %v3401_v57, %v176_v23  ;;  %v3414_v9 = vpop.eup %2829  ;;  %v725_v28 = vadd.f32 1.0, %v709_v55  ;;  %v3424_v23 = vadd.f32 %v3251_v52, %v73_v48 }
 0x111   :  { %v785_v46 = vadd.f32 -1.4531521, %v769_v51  ;;  %v768_v53 = vmul.f32 1.0614054, %v3414_v9  ;;  %v3439_v52 = vadd.f32 %v3282_v16, %v3313_v31  ;;  %v3441_v20 = vpop.eup %2831  ;;  %v3446_v48 = vadd.f32 %v3284_v17, %v3313_v31 }
 0x112   :  { %v799_v2 = vmul.f32 %v3385_v41, %v783_v35  ;;  %v3421_v35 = vadd.f32 1e-06, %v501_v6  ;;  %5382 = vst [vmem:[#allocation21_spill] sm:$0xff] %v3424_v23  ;;  %v3427_v34 = vmul.f32 0.70710677, %v3411_v60  ;;  %2845 = vrcp.f32 %v725_v28 }
 0x113   :  { %v801_v4 = vmul.f32 %v3396_v50, %v785_v46  ;;  %2847 = vrsqrt.f32 %v3417_v3  ;;  %v3435_v6 = vadd.f32 1e-06, %v503_v47  ;;  %v3453_v43 = vmul.f32 0.3989423, %v3441_v20 }
 0x114   :  { %v815_v11 = vadd.f32 1.4214138, %v799_v2  ;;  %5381 = vst [vmem:[#allocation20_spill] sm:$0xff] %v3421_v35  ;;  %5383 = vst [vmem:[#allocation22_spill] sm:$0xff] %v3427_v34  ;;  %2849 = vrsqrt.f32 %v3421_v35  ;;  %v692_v16 = vand.u32 2147483647, %v3427_v34  ;;  %v3458_v46 = vadd.f32 %v3289_v19, %v3313_v31  ;;  %v3460_v8 = vpop.eup %2833 }
 0x115   :  { %v817_v39 = vadd.f32 1.4214138, %v801_v4  ;;  %5385 = vst [vmem:[#allocation24_spill] sm:$0xff] %v3435_v6  ;;  %v3464_v17 = vmul.f32 %v3293_v22, %v3255_v61  ;;  %v784_v4 = vadd.f32 -1.4531521, %v768_v53  ;;  %v3468_v47 = vpop.eup %2835  ;;  %v3476_v31 = vmul.f32 %v3453_v43, %v3344_v7 }
 0x116   :  { %v831_v51 = vmul.f32 %v3385_v41, %v815_v11  ;;  %5386 = vst [vmem:[#allocation25_spill] sm:$0xff] %v3458_v46  ;;  %v1055_v11 = vmul.f32 %v3299_v25, %v3299_v25  ;;  %v771_v19 = vmul.f32 1.0614054, %v3460_v8  ;;  %v3478_v22 = vpop.eup %2837  ;;  %v708_v23 = vmul.f32 0.3275911, %v692_v16 }
 0x117   :  { %v833_v12 = vmul.f32 %v3396_v50, %v817_v39  ;;  %v3485_v53 = vpop.eup %2839  ;;  %v592_v21 = vmul.f32 %v576_v18, %v3317_v33 }
 0x118   :  { %v847_v55 = vadd.f32 -0.28449672, %v831_v51  ;;  %v3483_v51 = vmul.f32 0.3989423, %v3468_v47  ;;  %v2842_v35 = vpop.eup %2841  ;;  %v724_v16 = vadd.f32 1.0, %v708_v23 }
 0x119   :  { %v849_v42 = vadd.f32 -0.28449672, %v833_v12  ;;  %v3489_v12 = vmul.f32 %v3296_v24, %v3257_v62  ;;  %v2844_v57 = vpop.eup %2843  ;;  %v1057_v24 = vmul.f32 %v3305_v27, %v3305_v27  ;;  %v770_v37 = vmul.f32 1.0614054, %v3485_v53 }
 0x11a   :  { %v863_v2 = vmul.f32 %v3385_v41, %v847_v55  ;;  %5387 = vst [vmem:[#allocation26_spill] sm:$0xff] %v3483_v51  ;;  %v3496_v34 = vmul.f32 %v3483_v51, %v3347_v13  ;;  %v609_v44 = vmul.f32 1.442695, %v592_v21  ;;  %2851 = vrcp.f32 %v724_v16 }
 0x11b   :  { %v865_v28 = vmul.f32 %v3396_v50, %v849_v42  ;;  %v787_v42 = vadd.f32 -1.4531521, %v771_v19  ;;  %v786_v30 = vadd.f32 -1.4531521, %v770_v37 }
 0x11c   :  { %v879_v39 = vadd.f32 0.2548296, %v863_v2  ;;  %v800_v2 = vmul.f32 %v3414_v9, %v784_v4  ;;  %5388 = vst [vmem:[#allocation27_spill] sm:$0xff] %v3496_v34  ;;  %v3502_v19 = vpop.eup %2845  ;;  %v1073_v34 = vadd.f32 1.0, %v1057_v24  ;;  %2853 = vpow2.f32 %v609_v44 }
 0x11d   :  { %v881_v55 = vadd.f32 0.2548296, %v865_v28  ;;  %v803_v28 = vmul.f32 %v3460_v8, %v787_v42  ;;  %v3508_v10 = vpop.eup %2847  ;;  %v773_v23 = vmul.f32 1.0614054, %v3502_v19  ;;  %2855 = vrsqrt.f32 %v3431_v59 }
 0x11e   :  { %v895_v3 = vmul.f32 %v3385_v41, %v879_v39  ;;  %v5285_v41 = vmov 1.0   ;;  %v1071_v39 = vadd.f32 1.0, %v1055_v11  ;;  %v3514_v26 = vpop.eup %2849  ;;  %v816_v29 = vadd.f32 1.4214138, %v800_v2 }
 0x11f   :  { %v897_v0 = vmul.f32 %v3396_v50, %v881_v55  ;;  %v671_v18 = vsel %vm655_vm2, -1.0, %v5285_v41  ;;  %v673_v50 = vsel %vm657_vm3, -1.0, %v5285_v41  ;;  %v819_v42 = vadd.f32 1.4214138, %v803_v28 }
 0x120   :  { %v911_v4 = vmul.f32 %v2842_v35, %v895_v3  ;;  %v578_v3 = vmul.f32 -0.5, %v3335_v1  ;;  %v789_v46 = vadd.f32 -1.4531521, %v773_v23  ;;  %v991_v28 = vmul.f32 0.3989423, %v2842_v35 }
 0x121   :  { %v913_v55 = vmul.f32 %v2844_v57, %v897_v0  ;;  %v835_v5 = vmul.f32 %v3460_v8, %v819_v42  ;;  %v3520_v0 = vmul.f32 %v3478_v22, %v3351_v40  ;;  %v802_v40 = vmul.f32 %v3485_v53, %v786_v30 }
 0x122   :  { %v927_v63 = vsub.f32 1.0, %v911_v4  ;;  %v805_v21 = vmul.f32 %v3502_v19, %v789_v46  ;;  %v993_v4 = vmul.f32 0.3989423, %v2844_v57  ;;  %v594_v16 = vmul.f32 %v578_v3, %v3335_v1 }
 0x123   :  { %v929_v11 = vsub.f32 1.0, %v913_v55  ;;  %v851_v51 = vadd.f32 -0.28449672, %v835_v5  ;;  %v832_v55 = vmul.f32 %v3414_v9, %v816_v29  ;;  %v3529_v5 = vmul.f32 0.70710677, %v3520_v0 }
 0x124   :  { %v943_v33 = vmul.f32 %v927_v63, %v671_v18  ;;  %v821_v37 = vadd.f32 1.4214138, %v805_v21  ;;  %v818_v21 = vadd.f32 1.4214138, %v802_v40  ;;  %vm1227_vm3 = vcmask 261120  }
 0x125   :  { %v945_v41 = vmul.f32 %v929_v11, %v673_v50  ;;  %v867_v63 = vmul.f32 %v3460_v8, %v851_v51  ;;  %v1105_v51 = vmul.f32 %v993_v4, %v3305_v27  ;;  %v848_v18 = vadd.f32 -0.28449672, %v832_v55 }
 0x126   :  { %v959_v2 = vadd.f32 1.0, %v943_v33  ;;  %v1103_v33 = vmul.f32 %v991_v28, %v3299_v25  ;;  %v837_v35 = vmul.f32 %v3502_v19, %v821_v37  ;;  %vm662_vm9 = vcmp.lt.f32.partialorder %v3529_v5, 0.0 }
 0x127   :  { %v961_v42 = vadd.f32 1.0, %v945_v41  ;;  %v883_v44 = vadd.f32 0.2548296, %v867_v63 }
 0x128   :  { %v975_v24 = vmul.f32 0.5, %v959_v2  ;;  %v853_v3 = vadd.f32 -0.28449672, %v837_v35  ;;  %v694_v2 = vand.u32 2147483647, %v3529_v5 }
 0x129   :  { %v977_v57 = vmul.f32 0.5, %v961_v42  ;;  %v899_v29 = vmul.f32 %v3460_v8, %v883_v44  ;;  %v3538_v42 = vpop.eup %2851  ;;  %v1059_v8 = vmul.f32 %v3344_v7, %v3344_v7 }
 0x12a   :  { %v1007_v46 = vmul.f32 %v975_v24, %v3299_v25  ;;  %v1087_v41 = vmul.f32 %v1071_v39, %v975_v24  ;;  %v869_v39 = vmul.f32 %v3502_v19, %v853_v3  ;;  %v3557_v40 = vpop.eup %2853  ;;  %v613_v3 = vmul.f32 1.442695, %v594_v16 }
 0x12b   :  { %v1009_v50 = vmul.f32 %v977_v57, %v3305_v27  ;;  %v1089_v23 = vmul.f32 %v1073_v34, %v977_v57  ;;  %v915_v25 = vmul.f32 %v3441_v20, %v899_v29  ;;  %v864_v34 = vmul.f32 %v3414_v9, %v848_v18 }
 0x12c   :  { %v1023_v11 = vadd.f32 %v1007_v46, %v991_v28  ;;  %v1119_v30 = vadd.f32 %v1103_v33, %v1087_v41  ;;  %v885_v24 = vadd.f32 0.2548296, %v869_v39  ;;  %v5392_v33 = vmov 1.0   ;;  %v5418_v41 = vld [vmem:[#allocation22_spill] sm:$0xff] }
 0x12d   :  { %v1025_v63 = vadd.f32 %v1009_v50, %v993_v4  ;;  %v1121_v37 = vadd.f32 %v1105_v51, %v1089_v23  ;;  %v931_v20 = vsub.f32 1.0, %v915_v25  ;;  %v675_v57 = vsel %vm659_vm4, -1.0, %v5392_v33 }
 0x12e   :  { %v3543_v55 = vmul.f32 %v1023_v11, %v3464_v17  ;;  %v3546_v27 = vmul.f32 %v1119_v30, %v3255_v61  ;;  %v834_v61 = vmul.f32 %v3485_v53, %v818_v21  ;;  %v901_v35 = vmul.f32 %v3502_v19, %v885_v24 }
 0x12f   :  { %v3552_v28 = vmul.f32 %v1025_v63, %v3489_v12  ;;  %v3555_v4 = vmul.f32 %v1121_v37, %v3257_v62  ;;  %v772_v12 = vmul.f32 1.0614054, %v3538_v42  ;;  %v947_v44 = vmul.f32 %v931_v20, %v675_v57 }
 0x130   :  { %5389 = vst [vmem:[#allocation28_spill] sm:$0xff] %v3543_v55  ;;  %v3561_v17 = vmul.f32 %v3543_v55, %v3543_v55  ;;  %v710_v46 = vmul.f32 0.3275911, %v694_v2  ;;  %v880_v51 = vadd.f32 0.2548296, %v864_v34  ;;  %v917_v23 = vmul.f32 %v3468_v47, %v901_v35  ;;  %v5430_v55 = vld [vmem:[#allocation19_spill] sm:$0xff] }
 0x131   :  { %5390 = vst [vmem:[#allocation29_spill] sm:$0xff] %v3552_v28  ;;  %v3570_v62 = vmul.f32 %v3552_v28, %v3552_v28  ;;  %v3577_v18 = vadd.f32 1e-06, %v3439_v52  ;;  %v963_v50 = vadd.f32 1.0, %v947_v44  ;;  %v850_v11 = vadd.f32 -0.28449672, %v834_v61 }
 0x132   :  { %5391 = vst [vmem:[#allocation30_spill] sm:$0xff] %v3561_v17  ;;  %v726_v29 = vadd.f32 1.0, %v710_v46  ;;  %v788_v19 = vadd.f32 -1.4531521, %v772_v12  ;;  %v1075_v21 = vadd.f32 1.0, %v1059_v8  ;;  %v933_v2 = vsub.f32 1.0, %v917_v23 }
 0x133   :  { %5393 = vst [vmem:[#allocation31_spill] sm:$0xff] %v3570_v62  ;;  %v979_v30 = vmul.f32 0.5, %v963_v50  ;;  %v896_v49 = vmul.f32 %v3414_v9, %v880_v51  ;;  %v677_v52 = vsel %vm661_vm5, -1.0, %v5392_v33  ;;  %v1061_v63 = vmul.f32 %v3347_v13, %v3347_v13 }
 0x134   :  { %2857 = vrcp.f32 %v726_v29  ;;  %v580_v37 = vmul.f32 -0.5, %v3411_v60  ;;  %v949_v25 = vmul.f32 %v933_v2, %v677_v52  ;;  %v3591_v39 = vmul.f32 %v3508_v10, %v3355_v32  ;;  %v5398_v2 = vld [vmem:[#allocation27_spill] sm:$0xff] }
 0x135   :  { %v1011_v47 = vmul.f32 %v979_v30, %v3344_v7  ;;  %v1091_v16 = vmul.f32 %v1075_v21, %v979_v30  ;;  %v866_v34 = vmul.f32 %v3485_v53, %v850_v11  ;;  %v804_v8 = vmul.f32 %v3538_v42, %v788_v19  ;;  %v5397_v30 = vld [vmem:[#allocation26_spill] sm:$0xff] }
 0x136   :  { %2859 = vrsqrt.f32 %v3435_v6  ;;  %v3597_v9 = vadd.f32 1e-06, %v3446_v48  ;;  %v547_v20 = vmul.f32 %v3329_v56, %v3278_v14  ;;  %v965_v61 = vadd.f32 1.0, %v949_v25 }
 0x137   :  { %v1027_v7 = vadd.f32 %v1011_v47, %v3453_v43  ;;  %v1123_v24 = vadd.f32 %v3476_v31, %v1091_v16  ;;  %2861 = vpow2.f32 %v613_v3  ;;  %v1077_v32 = vadd.f32 1.0, %v1061_v63  ;;  %v3626_v3 = vpop.eup %2855 }
 0x138   :  { %v3604_v57 = vmul.f32 0.70710677, %v3591_v39  ;;  %v3607_v12 = vadd.f32 1e-06, %v3450_v45  ;;  %v912_v44 = vmul.f32 %v3557_v40, %v896_v49  ;;  %v981_v35 = vmul.f32 0.5, %v965_v61  ;;  %v5402_v61 = vld [vmem:[#allocation25_spill] sm:$0xff] }
 0x139   :  { %v3610_v48 = vmul.f32 %v1027_v7, %v547_v20  ;;  %v596_v56 = vmul.f32 %v580_v37, %v3411_v60  ;;  %v882_v46 = vadd.f32 0.2548296, %v866_v34  ;;  %v820_v43 = vadd.f32 1.4214138, %v804_v8  ;;  %v5401_v20 = vld [vmem:[#allocation8_spill] sm:$0xff] }
 0x13a   :  { %5394 = vst [vmem:[#allocation32_spill] sm:$0xff] %v3607_v12  ;;  %v695_v31 = vand.u32 2147483647, %v3604_v57  ;;  %v3616_v51 = vmul.f32 %v3514_v26, %v3363_v38  ;;  %v3619_v50 = vmul.f32 %v1123_v24, %v3278_v14  ;;  %v1013_v23 = vmul.f32 %v981_v35, %v3347_v13  ;;  %v5416_v14 = vld [vmem:[#allocation10_spill] sm:$0xff] }
 0x13b   :  { %5395 = vst [vmem:[#allocation33_spill] sm:$0xff] %v3610_v48  ;;  %v3623_v45 = vmul.f32 %v3610_v48, %v3610_v48  ;;  %v1093_v29 = vmul.f32 %v1077_v32, %v981_v35  ;;  %v549_v11 = vmul.f32 %v3331_v58, %v3280_v15  ;;  %2863 = vrsqrt.f32 %v3577_v18  ;;  %v5422_v48 = vld [vmem:[#allocation14_spill] sm:$0xff] }
 0x13c   :  { %v711_v19 = vmul.f32 0.3275911, %v695_v31  ;;  %v1029_v21 = vadd.f32 %v1013_v23, %v5397_v30  ;;  %v617_v49 = vmul.f32 1.442695, %v596_v56  ;;  %v836_v52 = vmul.f32 %v3538_v42, %v820_v43 }
 0x13d   :  { %5396 = vst [vmem:[#allocation34_spill] sm:$0xff] %v3623_v45  ;;  %v1125_v13 = vadd.f32 %v5398_v2, %v1093_v29  ;;  %v582_v63 = vmul.f32 -0.5, %v3520_v0  ;;  %v928_v47 = vsub.f32 1.0, %v912_v44  ;;  %v898_v16 = vmul.f32 %v3485_v53, %v882_v46  ;;  %v5406_v2 = vld [vmem:[#allocation12_spill] sm:$0xff] }
 0x13e   :  { %v3632_v38 = vpop.eup %2857  ;;  %v727_v58 = vadd.f32 1.0, %v711_v19  ;;  %v3642_v25 = vmul.f32 %v1029_v21, %v549_v11  ;;  %v3645_v34 = vmul.f32 0.70710677, %v3616_v51  ;;  %v1056_v7 = vmul.f32 %v5401_v20, %v5401_v20  ;;  %v5405_v21 = vld [vmem:[#allocation11_spill] sm:$0xff] }
 0x13f   :  { %v774_v37 = vmul.f32 1.0614054, %v3632_v38  ;;  %v3652_v32 = vadd.f32 1e-06, %v5402_v61  ;;  %v3655_v35 = vmul.f32 %v1125_v13, %v3280_v15  ;;  %v672_v46 = vsel %vm656_vm6, -1.0, %v5392_v33 }
 0x140   :  { %5399 = vst [vmem:[#allocation26_spill] sm:$0xff] %v3642_v25  ;;  %v3647_v8 = vpop.eup %2859  ;;  %2865 = vrcp.f32 %v727_v58  ;;  %v3659_v53 = vmul.f32 %v3642_v25, %v3642_v25  ;;  %v697_v44 = vand.u32 2147483647, %v3645_v34  ;;  %v1058_v43 = vmul.f32 %v3335_v1, %v3335_v1  ;;  %v5410_v58 = vld [vmem:[#allocation6_spill] sm:$0xff] }
 0x141   :  { %5400 = vst [vmem:[#allocation27_spill] sm:$0xff] %v3647_v8  ;;  %v790_v24 = vadd.f32 -1.4531521, %v774_v37  ;;  %5403 = vst [vmem:[#allocation8_spill] sm:$0xff] %v3652_v32  ;;  %2867 = vpow2.f32 %v617_v49  ;;  %v2862_v56 = vpop.eup %2861  ;;  %v852_v31 = vadd.f32 -0.28449672, %v836_v52  ;;  %v598_v23 = vmul.f32 %v582_v63, %v3520_v0 }
 0x142   :  { %5404 = vst [vmem:[#allocation25_spill] sm:$0xff] %v3659_v53  ;;  %v944_v15 = vmul.f32 %v928_v47, %v672_v46  ;;  %v914_v29 = vmul.f32 %v2862_v56, %v898_v16  ;;  %v713_v19 = vmul.f32 0.3275911, %v697_v44  ;;  %v3671_v30 = vmul.f32 0.3989423, %v3557_v40  ;;  %v5408_v49 = vld [vmem:[#allocation5_spill] sm:$0xff] }
 0x143   :  { %vm658_vm7 = vcmp.lt.f32.partialorder %v5405_v21, 0.0  ;;  %v806_v54 = vmul.f32 %v3632_v38, %v790_v24  ;;  %v3677_v13 = vmul.f32 %v3626_v3, %v5406_v2  ;;  %v5409_v52 = vld [vmem:[#allocation7_spill] sm:$0xff]  ;;  %v1072_v37 = vadd.f32 1.0, %v1056_v7  ;;  %v5411_v47 = vld [vmem:[#allocation9_spill] sm:$0xff] }
 0x144   :  { %v3681_v63 = vmul.f32 %v5409_v52, %v5408_v49  ;;  %v3685_v16 = vmul.f32 %v5411_v47, %v5410_v58  ;;  %v729_v61 = vadd.f32 1.0, %v713_v19  ;;  %v868_v44 = vmul.f32 %v3538_v42, %v852_v31  ;;  %v5413_v21 = vld [vmem:[#allocation13_spill] sm:$0xff]  ;;  %v5417_v31 = vld [vmem:[#allocation18_spill] sm:$0xff] }
 0x145   :  { %5407 = vst [vmem:[#allocation11_spill] sm:$0xff] %v3677_v13  ;;  %v3687_v40 = vpop.eup %2863  ;;  %v621_v46 = vmul.f32 1.442695, %v598_v23  ;;  %v3691_v24 = vmul.f32 0.70710677, %v3677_v13  ;;  %v3695_v2 = vmul.f32 %v3647_v8, %v5413_v21  ;;  %v960_v52 = vadd.f32 1.0, %v944_v15 }
 0x146   :  { %5412 = vst [vmem:[#allocation12_spill] sm:$0xff] %v3685_v16  ;;  %v674_v7 = vsel %vm658_vm7, -1.0, %v5392_v33  ;;  %v930_v11 = vsub.f32 1.0, %v914_v29  ;;  %2869 = vrcp.f32 %v729_v61  ;;  %v1104_v19 = vmul.f32 %v3671_v30, %v5401_v20  ;;  %v5419_v8 = vld [vmem:[#allocation17_spill] sm:$0xff] }
 0x147   :  { %5414 = vst [vmem:[#allocation7_spill] sm:$0xff] %v3695_v2  ;;  %v3700_v47 = vadd.f32 1.0, %v1058_v43  ;;  %v3704_v23 = vmul.f32 %v5417_v31, %v5416_v14  ;;  %v822_v36 = vadd.f32 1.4214138, %v806_v54  ;;  %vm660_vm8 = vcmp.lt.f32.partialorder %v5418_v41, 0.0 }
 0x148   :  { %v1060_v21 = vmul.f32 %v3411_v60, %v3411_v60  ;;  %v583_v15 = vmul.f32 -0.5, %v3591_v39  ;;  %v696_v29 = vand.u32 2147483647, %v3691_v24  ;;  %v884_v58 = vadd.f32 0.2548296, %v868_v44 }
 0x149   :  { %5415 = vst [vmem:[#allocation9_spill] sm:$0xff] %v3700_v47  ;;  %v3715_v43 = vmul.f32 %v3478_v22, %v5419_v8  ;;  %2871 = vpow2.f32 %v621_v46  ;;  %v3718_v31 = vmul.f32 0.70710677, %v3695_v2  ;;  %v3720_v41 = vmul.f32 0.5, %v960_v52 }
 0x14a   :  { %v3711_v61 = vpop.eup %2865  ;;  %v946_v47 = vmul.f32 %v930_v11, %v674_v7  ;;  %v712_v14 = vmul.f32 0.3275911, %v696_v29  ;;  %v3723_v49 = vmul.f32 0.3989423, %v2862_v56  ;;  %v676_v25 = vsel %vm660_vm8, -1.0, %v5392_v33 }
 0x14b   :  { %5420 = vst [vmem:[#allocation13_spill] sm:$0xff] %v3715_v43  ;;  %v2868_v54 = vpop.eup %2867  ;;  %v775_v6 = vmul.f32 1.0614054, %v3711_v61  ;;  %v838_v44 = vmul.f32 %v3632_v38, %v822_v36  ;;  %v1062_v22 = vmul.f32 %v3520_v0, %v3520_v0  ;;  %v3729_v46 = vadd.f32 1.0, %v1060_v21 }
 0x14c   :  { %5421 = vst [vmem:[#allocation18_spill] sm:$0xff] %v3723_v49  ;;  %v599_v8 = vmul.f32 %v583_v15, %v3591_v39  ;;  %v728_v52 = vadd.f32 1.0, %v712_v14  ;;  %v900_v11 = vmul.f32 %v3538_v42, %v884_v58  ;;  %v3733_v7 = vmul.f32 0.3989423, %v2868_v54 }
 0x14d   :  { %v791_v43 = vadd.f32 -1.4531521, %v775_v6  ;;  %v698_v56 = vand.u32 2147483647, %v3718_v31  ;;  %v1088_v29 = vmul.f32 %v1072_v37, %v3720_v41  ;;  %v962_v36 = vadd.f32 1.0, %v946_v47 }
 0x14e   :  { %2873 = vrcp.f32 %v728_v52  ;;  %v854_v21 = vadd.f32 -0.28449672, %v838_v44  ;;  %v3741_v6 = vmul.f32 %v3687_v40, %v5422_v48  ;;  %v3746_v14 = vadd.f32 1.0, %v1062_v22 }
 0x14f   :  { %v807_v28 = vmul.f32 %v3711_v61, %v791_v43  ;;  %v714_v16 = vmul.f32 0.3275911, %v698_v56  ;;  %2875 = vrsqrt.f32 %v3597_v9  ;;  %v623_v58 = vmul.f32 1.442695, %v599_v8 }
 0x150   :  { %v3744_v42 = vpop.eup %2869  ;;  %5423 = vst [vmem:[#allocation22_spill] sm:$0xff] %v3746_v14  ;;  %v585_v37 = vmul.f32 -0.5, %v3616_v51  ;;  %v916_v47 = vmul.f32 %v2868_v54, %v900_v11  ;;  %v3752_v43 = vsel %vm662_vm9, -1.0, %v5392_v33  ;;  %v3755_v52 = vadd.f32 %v1104_v19, %v1088_v29 }
 0x151   :  { %v823_v15 = vadd.f32 1.4214138, %v807_v28  ;;  %v777_v44 = vmul.f32 1.0614054, %v3744_v42  ;;  %v730_v48 = vadd.f32 1.0, %v714_v16  ;;  %v3759_v56 = vmul.f32 %v3733_v7, %v3411_v60 }
 0x152   :  { %5424 = vst [vmem:[#allocation14_spill] sm:$0xff] %v3755_v52  ;;  %v3763_v28 = vmul.f32 0.70710677, %v3741_v6  ;;  %v3765_v22 = vmul.f32 0.5, %v962_v36  ;;  %v870_v5 = vmul.f32 %v3632_v38, %v854_v21  ;;  %v601_v19 = vmul.f32 %v585_v37, %v3616_v51 }
 0x153   :  { %5425 = vst [vmem:[#allocation35_spill] sm:$0xff] %v3759_v56  ;;  %v839_v8 = vmul.f32 %v3711_v61, %v823_v15  ;;  %v2872_v54 = vpop.eup %2871  ;;  %v793_v11 = vadd.f32 -1.4531521, %v777_v44  ;;  %2877 = vrcp.f32 %v730_v48  ;;  %v5426_v14 = vsub.f32 %v3546_v27, %v3561_v17  ;;  %v5440_v17 = vld [vmem:[#allocation16_spill] sm:$0xff] }
 0x154   :  { %2879 = vpow2.f32 %v623_v58  ;;  %v699_v29 = vand.u32 2147483647, %v3763_v28  ;;  %v5428_v52 = vsub.f32 %v3555_v4, %v3570_v62  ;;  %v932_v56 = vsub.f32 1.0, %v916_v47 }
 0x155   :  { %v855_v16 = vadd.f32 -0.28449672, %v839_v8  ;;  %v3773_v15 = vmax.f32 %v5426_v14, 0.0  ;;  %v809_v21 = vmul.f32 %v3744_v42, %v793_v11  ;;  %v3781_v44 = vmul.f32 0.3989423, %v2872_v54 }
 0x156   :  { %v3778_v36 = vmax.f32 %v5428_v52, 0.0  ;;  %v584_v37 = vmul.f32 -0.5, %v3677_v13  ;;  %v715_v48 = vmul.f32 0.3275911, %v699_v29  ;;  %v886_v8 = vadd.f32 0.2548296, %v870_v5 }
 0x157   :  { %5427 = vst [vmem:[#allocation36_spill] sm:$0xff] %v3773_v15  ;;  %v871_v58 = vmul.f32 %v3711_v61, %v855_v16  ;;  %v3787_v27 = vmul.f32 %v3508_v10, %v5430_v55  ;;  %v825_v14 = vadd.f32 1.4214138, %v809_v21  ;;  %2881 = vrsqrt.f32 %v3607_v12  ;;  %v5431_v52 = vld [vmem:[#allocation20_spill] sm:$0xff] }
 0x158   :  { %5429 = vst [vmem:[#allocation37_spill] sm:$0xff] %v3778_v36  ;;  %v3790_v4 = vpop.eup %2873  ;;  %v1063_v47 = vmul.f32 %v3591_v39, %v3591_v39  ;;  %v3796_v11 = vmul.f32 %v3514_v26, %v5431_v52  ;;  %v627_v16 = vmul.f32 1.442695, %v601_v19  ;;  %v731_v36 = vadd.f32 1.0, %v715_v48  ;;  %v5433_v52 = vld [vmem:[#allocation15_spill] sm:$0xff] }
 0x159   :  { %v3798_v29 = vpop.eup %2875  ;;  %v948_v5 = vmul.f32 %v932_v56, %v676_v25  ;;  %vm663_vm10 = vcmp.lt.f32.partialorder %v3604_v57, 0.0  ;;  %v841_v10 = vmul.f32 %v3744_v42, %v825_v14  ;;  %v776_v21 = vmul.f32 1.0614054, %v3790_v4 }
 0x15a   :  { %5432 = vst [vmem:[#allocation19_spill] sm:$0xff] %v3796_v11  ;;  %v887_v12 = vadd.f32 0.2548296, %v871_v58  ;;  %vm665_vm11 = vcmp.lt.f32.partialorder %v3645_v34, 0.0  ;;  %v600_v15 = vmul.f32 %v584_v37, %v3677_v13  ;;  %2883 = vrcp.f32 %v731_v36 }
 0x15b   :  { %v902_v26 = vmul.f32 %v3632_v38, %v886_v8  ;;  %v1065_v19 = vmul.f32 %v3616_v51, %v3616_v51  ;;  %v792_v48 = vadd.f32 -1.4531521, %v776_v21  ;;  %v3810_v25 = vmul.f32 %v3798_v29, %v5433_v52 }
 0x15c   :  { %v679_v57 = vsel %vm663_vm10, -1.0, %v5392_v33  ;;  %v3813_v56 = vadd.f32 1.0, %v1063_v47  ;;  %2885 = vpow2.f32 %v627_v16  ;;  %v857_v58 = vadd.f32 -0.28449672, %v841_v10 }
 0x15d   :  { %v3815_v34 = vpop.eup %2877  ;;  %v5434_v36 = vsub.f32 %v3619_v50, %v3623_v45  ;;  %v964_v37 = vadd.f32 1.0, %v948_v5  ;;  %v3823_v8 = vsel %vm665_vm11, -1.0, %v5392_v33  ;;  %v586_v14 = vmul.f32 -0.5, %v3695_v2 }
 0x15e   :  { %v2880_v52 = vpop.eup %2879  ;;  %v903_v21 = vmul.f32 %v3711_v61, %v887_v12  ;;  %v625_v47 = vmul.f32 1.442695, %v600_v15  ;;  %v808_v16 = vmul.f32 %v3790_v4, %v792_v48  ;;  %v3829_v10 = vmul.f32 0.70710677, %v3810_v25 }
 0x15f   :  { %v3820_v38 = vmax.f32 %v5434_v36, 0.0  ;;  %v918_v62 = vmul.f32 %v2872_v54, %v902_v26  ;;  %v3831_v11 = vadd.f32 1.0, %v1065_v19  ;;  %v3835_v50 = vmul.f32 %v3626_v3, %v3431_v59 }
 0x160   :  { %v587_v5 = vmul.f32 -0.5, %v3741_v6  ;;  %v5437_v36 = vsub.f32 %v3655_v35, %v3659_v53  ;;  %v873_v12 = vmul.f32 %v3744_v42, %v857_v58  ;;  %v778_v61 = vmul.f32 1.0614054, %v3815_v34 }
 0x161   :  { %5435 = vst [vmem:[#allocation15_spill] sm:$0xff] %v3820_v38  ;;  %5436 = vst [vmem:[#allocation38_spill] sm:$0xff] %v3835_v50  ;;  %v701_v15 = vand.u32 2147483647, %v3829_v10  ;;  %v3846_v54 = vpop.eup %2881  ;;  %v980_v26 = vmul.f32 0.5, %v964_v37  ;;  %v1064_v3 = vmul.f32 %v3677_v13, %v3677_v13  ;;  %v602_v48 = vmul.f32 %v586_v14, %v3695_v2 }
 0x162   :  { %v3841_v38 = vmax.f32 %v5437_v36, 0.0  ;;  %5439 = vst [vmem:[#allocation40_spill] sm:$0xff] %v3846_v54  ;;  %v3848_v19 = vmul.f32 0.3989423, %v2880_v52  ;;  %v919_v59 = vmul.f32 %v2880_v52, %v903_v21  ;;  %2887 = vpow2.f32 %v625_v47 }
 0x163   :  { %v824_v35 = vadd.f32 1.4214138, %v808_v16  ;;  %v717_v36 = vmul.f32 0.3275911, %v701_v15  ;;  %v934_v50 = vsub.f32 1.0, %v918_v62  ;;  %vm664_vm12 = vcmp.lt.f32.partialorder %v3691_v24, 0.0 }
 0x164   :  { %5438 = vst [vmem:[#allocation39_spill] sm:$0xff] %v3841_v38  ;;  %v3856_v58 = vmul.f32 %v3687_v40, %v3577_v18  ;;  %v603_v37 = vmul.f32 %v587_v5, %v3741_v6  ;;  %v3859_v38 = vpop.eup %2883  ;;  %v889_v53 = vadd.f32 0.2548296, %v873_v12  ;;  %v794_v45 = vadd.f32 -1.4531521, %v778_v61 }
 0x165   :  { %v733_v13 = vadd.f32 1.0, %v717_v36  ;;  %v3863_v14 = vmul.f32 %v3846_v54, %v5440_v17  ;;  %v3866_v52 = vmul.f32 %v3729_v46, %v980_v26  ;;  %v3870_v62 = vmul.f32 %v3848_v19, %v3591_v39 }
 0x166   :  { %v3872_v40 = vadd.f32 1.0, %v1064_v3  ;;  %v779_v21 = vmul.f32 1.0614054, %v3859_v38  ;;  %v2886_v47 = vpop.eup %2885  ;;  %v935_v16 = vsub.f32 1.0, %v919_v59  ;;  %v840_v5 = vmul.f32 %v3790_v4, %v824_v35 }
 0x167   :  { %v629_v12 = vmul.f32 1.442695, %v602_v48  ;;  %2889 = vrcp.f32 %v733_v13  ;;  %vm666_vm13 = vcmp.lt.f32.partialorder %v3718_v31, 0.0  ;;  %v631_v17 = vmul.f32 1.442695, %v603_v37 }
 0x168   :  { %v795_v61 = vadd.f32 -1.4531521, %v779_v21  ;;  %2891 = vrsqrt.f32 %v3652_v32  ;;  %v950_v46 = vmul.f32 %v934_v50, %v3752_v43  ;;  %v905_v15 = vmul.f32 %v3744_v42, %v889_v53 }
 0x169   :  { %v810_v3 = vmul.f32 %v3815_v34, %v794_v45  ;;  %v3882_v36 = vmul.f32 0.70710677, %v3863_v14  ;;  %v3884_v59 = vmul.f32 0.3989423, %v2886_v47  ;;  %v3889_v13 = vsel %vm664_vm12, -1.0, %v5392_v33 }
 0x16a   :  { %v811_v31 = vmul.f32 %v3859_v38, %v795_v61  ;;  %v1067_v48 = vmul.f32 %v3741_v6, %v3741_v6  ;;  %v951_v43 = vmul.f32 %v935_v16, %v679_v57  ;;  %v856_v50 = vadd.f32 -0.28449672, %v840_v5 }
 0x16b   :  { %2893 = vpow2.f32 %v629_v12  ;;  %v3895_v45 = vsel %vm666_vm13, -1.0, %v5392_v33  ;;  %vm667_vm14 = vcmp.lt.f32.partialorder %v3763_v28, 0.0  ;;  %v1008_v24 = vmul.f32 %v3720_v41, %v5401_v20 }
 0x16c   :  { %2895 = vpow2.f32 %v631_v17  ;;  %v827_v53 = vadd.f32 1.4214138, %v811_v31  ;;  %v2888_v42 = vpop.eup %2887  ;;  %v966_v35 = vadd.f32 1.0, %v950_v46  ;;  %v921_v37 = vmul.f32 %v2886_v47, %v905_v15 }
 0x16d   :  { %v826_v21 = vadd.f32 1.4214138, %v810_v3  ;;  %v700_v61 = vand.u32 2147483647, %v3882_v36  ;;  %v3903_v57 = vmul.f32 %v3884_v59, %v3616_v51  ;;  %v3906_v5 = vadd.f32 1.0, %v1067_v48 }
 0x16e   :  { %v843_v16 = vmul.f32 %v3859_v38, %v827_v53  ;;  %v589_v28 = vmul.f32 -0.5, %v3810_v25  ;;  %v967_v12 = vadd.f32 1.0, %v951_v43  ;;  %v872_v17 = vmul.f32 %v3790_v4, %v856_v50 }
 0x16f   :  { %v683_v20 = vsel %vm667_vm14, -1.0, %v5392_v33  ;;  %v716_v41 = vmul.f32 0.3275911, %v700_v61  ;;  %v3911_v47 = vmul.f32 0.3989423, %v2888_v42  ;;  %v1012_v15 = vmul.f32 %v980_v26, %v3411_v60 }
 0x170   :  { %v859_v46 = vadd.f32 -0.28449672, %v843_v16  ;;  %v1024_v3 = vadd.f32 %v1008_v24, %v3671_v30  ;;  %v3917_v53 = vmul.f32 0.5, %v966_v35  ;;  %v937_v48 = vsub.f32 1.0, %v921_v37 }
 0x171   :  { %v3915_v31 = vpop.eup %2889  ;;  %v842_v32 = vmul.f32 %v3815_v34, %v826_v21  ;;  %v732_v43 = vadd.f32 1.0, %v716_v41  ;;  %v605_v61 = vmul.f32 %v589_v28, %v3810_v25  ;;  %vm669_vm15 = vcmp.lt.f32.partialorder %v3829_v10, 0.0 }
 0x172   :  { %v3920_v54 = vpop.eup %2891  ;;  %v875_v50 = vmul.f32 %v3859_v38, %v859_v46  ;;  %v588_v60 = vmul.f32 -0.5, %v3863_v14  ;;  %v983_v26 = vmul.f32 0.5, %v967_v12  ;;  %v888_v30 = vadd.f32 0.2548296, %v872_v17  ;;  %v5442_v17 = vld [vmem:[#allocation21_spill] sm:$0xff] }
 0x173   :  { %5441 = vst [vmem:[#allocation16_spill] sm:$0xff] %v3920_v54  ;;  %v781_v24 = vmul.f32 1.0614054, %v3915_v31  ;;  %2897 = vrcp.f32 %v732_v43  ;;  %v3929_v37 = vmul.f32 %v3798_v29, %v3597_v9  ;;  %v1028_v21 = vadd.f32 %v1012_v15, %v3733_v7 }
 0x174   :  { %v891_v35 = vadd.f32 0.2548296, %v875_v50  ;;  %v3933_v16 = vmul.f32 %v1024_v3, %v3681_v63  ;;  %v953_v41 = vmul.f32 %v937_v48, %v3823_v8  ;;  %v858_v46 = vadd.f32 -0.28449672, %v842_v32 }
 0x175   :  { %v3935_v28 = vpop.eup %2893  ;;  %v797_v12 = vadd.f32 -1.4531521, %v781_v24  ;;  %v3940_v2 = vmul.f32 %v3920_v54, %v5442_v17  ;;  %v635_v29 = vmul.f32 1.442695, %v605_v61  ;;  %v3946_v7 = vsel %vm669_vm15, -1.0, %v5392_v33 }
 0x176   :  { %v2896_v43 = vpop.eup %2895  ;;  %v907_v50 = vmul.f32 %v3859_v38, %v891_v35  ;;  %v1069_v63 = vmul.f32 %v3810_v25, %v3810_v25  ;;  %v1015_v8 = vmul.f32 %v983_v26, %v3591_v39  ;;  %v904_v32 = vmul.f32 %v3790_v4, %v888_v30 }
 0x177   :  { %v813_v15 = vmul.f32 %v3915_v31, %v797_v12  ;;  %v604_v3 = vmul.f32 %v588_v60, %v3863_v14  ;;  %v1095_v48 = vmul.f32 %v3813_v56, %v983_v26  ;;  %v3956_v61 = vmul.f32 0.70710677, %v3940_v2 }
 0x178   :  { %v923_v38 = vmul.f32 %v2896_v43, %v907_v50  ;;  %v3959_v10 = vmul.f32 %v1028_v21, %v3704_v23  ;;  %v969_v24 = vadd.f32 1.0, %v953_v41  ;;  %v874_v35 = vmul.f32 %v3815_v34, %v858_v46 }
 0x179   :  { %v1003_v17 = vmul.f32 0.3989423, %v2896_v43  ;;  %v829_v39 = vadd.f32 1.4214138, %v813_v15  ;;  %2899 = vpow2.f32 %v635_v29  ;;  %v3962_v4 = vadd.f32 1.0, %v1069_v63 }
 0x17a   :  { %v939_v54 = vsub.f32 1.0, %v923_v38  ;;  %v702_v60 = vand.u32 2147483647, %v3956_v61  ;;  %v1031_v56 = vadd.f32 %v1015_v8, %v3848_v19  ;;  %v920_v26 = vmul.f32 %v2888_v42, %v904_v32 }
 0x17b   :  { %v845_v30 = vmul.f32 %v3915_v31, %v829_v39  ;;  %v633_v12 = vmul.f32 1.442695, %v604_v3  ;;  %v1127_v23 = vadd.f32 %v3870_v62, %v1095_v48  ;;  %v2707_v46 = vpack.c.bf16 %v3959_v10, %v3933_v16  ;;  %v5443_v3 = vld [vmem:[#allocation28_spill] sm:$0xff]  ;;  %v5444_v48 = vld [vmem:[#allocation33_spill] sm:$0xff] }
 0x17c   :  { %v955_v21 = vmul.f32 %v939_v54, %v683_v20  ;;  %v718_v41 = vmul.f32 0.3275911, %v702_v60  ;;  %v985_v50 = vmul.f32 0.5, %v969_v24  ;;  %v890_v29 = vadd.f32 0.2548296, %v874_v35 }
 0x17d   :  { %v3970_v43 = vpop.eup %2897  ;;  %v861_v63 = vadd.f32 -0.28449672, %v845_v30  ;;  %v1010_v15 = vmul.f32 %v3765_v22, %v3335_v1  ;;  %2708 = vmatprep.subr.bf16.mxu0 %v2707_v46  ;;  %v1014_v54 = vmul.f32 %v3917_v53, %v3520_v0  ;;  %v936_v62 = vsub.f32 1.0, %v920_v26  ;;  %v5446_v26 = vld [vmem:[#allocation29_spill] sm:$0xff]  ;;  %v5447_v46 = vld [vmem:[#allocation26_spill] sm:$0xff] }
 0x17e   :  { %v971_v19 = vadd.f32 1.0, %v955_v21  ;;  %v780_v42 = vmul.f32 1.0614054, %v3970_v43  ;;  %v734_v8 = vadd.f32 1.0, %v718_v41  ;;  %v2709_v38 = vpack.c.bf16 %v5444_v48, %v5443_v3  ;;  %v5445_v21 = vld [vmem:[#allocation12_spill] sm:$0xff] }
 0x17f   :  { %v877_v20 = vmul.f32 %v3915_v31, %v861_v63  ;;  %v1026_v32 = vadd.f32 %v1010_v15, %v3723_v49  ;;  %v1030_v39 = vadd.f32 %v1014_v54, %v3781_v44  ;;  %v1017_v60 = vmul.f32 %v985_v50, %v3616_v51 }
 0x180   :  { %v987_v24 = vmul.f32 0.5, %v971_v19  ;;  %v796_v35 = vadd.f32 -1.4531521, %v780_v42  ;;  %2901 = vrcp.f32 %v734_v8  ;;  %2710 = vmatpush1.bf16.msra.mxu0 %v2709_v38  ;;  %v2717_v63 = vpack.c.bf16 %v5447_v46, %v5446_v26  ;;  %v5448_v42 = vld [vmem:[#allocation13_spill] sm:$0xff]  ;;  %v5451_v26 = vld [vmem:[#allocation19_spill] sm:$0xff] }
 0x181   :  { %v893_v30 = vadd.f32 0.2548296, %v877_v20  ;;  %v3984_v41 = vmul.f32 %v1026_v32, %v5445_v21  ;;  %v3992_v8 = vmul.f32 %v1030_v39, %v5448_v42  ;;  %v3995_v54 = vmul.f32 %v1031_v56, %v3787_v27  ;;  %v5453_v42 = vld [vmem:[#allocation25_spill] sm:$0xff] }
 0x182   :  { %v1019_v15 = vmul.f32 %v987_v24, %v3741_v6  ;;  %v1099_v49 = vmul.f32 %v3906_v5, %v987_v24  ;;  %v812_v19 = vmul.f32 %v3970_v43, %v796_v35  ;;  %v906_v51 = vmul.f32 %v3815_v34, %v890_v29 }
 0x183   :  { %v1115_v20 = vmul.f32 %v1003_v17, %v3741_v6  ;;  %v909_v32 = vmul.f32 %v3915_v31, %v893_v30  ;;  %v2900_v3 = vpop.eup %2899  ;;  %v952_v48 = vmul.f32 %v936_v62, %v3889_v13  ;;  %v2715_v5 = vpack.c.bf16 %v3992_v8, %v3984_v41  ;;  %v5450_v62 = vld [vmem:[#allocation34_spill] sm:$0xff] }
 0x184   :  { %v1035_v38 = vadd.f32 %v1019_v15, %v1003_v17  ;;  %v828_v21 = vadd.f32 1.4214138, %v812_v19  ;;  %v1143_v24 = vmul.f32 %v1127_v23, %v5430_v55  ;;  %2903 = vpow2.f32 %v633_v12  ;;  %v5452_v19 = vld [vmem:[#allocation31_spill] sm:$0xff] }
 0x185   :  { %v1131_v35 = vadd.f32 %v1115_v20, %v1099_v49  ;;  %v925_v39 = vmul.f32 %v2900_v3, %v909_v32  ;;  %v1033_v27 = vadd.f32 %v1017_v60, %v3884_v59  ;;  %v590_v31 = vmul.f32 -0.5, %v3940_v2  ;;  %2716 = vmatprep.subr.bf16.mxu1 %v2715_v5  ;;  %v5459_v60 = vld [vmem:[#allocation20_spill] sm:$0xff] }
 0x186   :  { %v4006_v34 = vmul.f32 %v1035_v38, %v3856_v58  ;;  %v844_v6 = vmul.f32 %v3970_v43, %v828_v21  ;;  %v4012_v13 = vmul.f32 %v3995_v54, %v3995_v54  ;;  %v1097_v17 = vmul.f32 %v3831_v11, %v985_v50  ;;  %2718 = vmatpush1.bf16.msra.mxu1 %v2717_v63  ;;  %v5449_v50 = vld [vmem:[#allocation30_spill] sm:$0xff] }
 0x187   :  { %v922_v55 = vmul.f32 %v3935_v28, %v906_v51  ;;  %v941_v49 = vsub.f32 1.0, %v925_v39  ;;  %vm668_vm1 = vcmp.lt.f32.partialorder %v3882_v36, 0.0  ;;  %v968_v59 = vadd.f32 1.0, %v952_v48  ;;  %v5457_v51 = vld [vmem:[#allocation37_spill] sm:$0xff] }
 0x188   :  { %v4019_v58 = vmul.f32 %v4006_v34, %v4006_v34  ;;  %v860_v56 = vadd.f32 -0.28449672, %v844_v6  ;;  %v1147_v23 = vmul.f32 %v1131_v35, %v3577_v18  ;;  %v1005_v11 = vmul.f32 0.3989423, %v2900_v3 }
 0x189   :  { %v957_v29 = vmul.f32 %v941_v49, %v3946_v7  ;;  %v4030_v46 = vmul.f32 %v1033_v27, %v5451_v26  ;;  %v606_v15 = vmul.f32 %v590_v31, %v3940_v2  ;;  %v1175_v18 = vsub.f32 %v1143_v24, %v4012_v13  ;;  %v5454_v49 = vld [vmem:[#allocation36_spill] sm:$0xff] }
 0x18a   :  { %v4027_v30 = vpop.eup %2901  ;;  %v876_v63 = vmul.f32 %v3970_v43, %v860_v56  ;;  %v1179_v7 = vsub.f32 %v1147_v23, %v4019_v58  ;;  %v984_v3 = vmul.f32 0.5, %v968_v59  ;;  %v938_v48 = vsub.f32 1.0, %v922_v55  ;;  %v5455_v59 = vld [vmem:[#allocation15_spill] sm:$0xff] }
 0x18b   :  { %v973_v20 = vadd.f32 1.0, %v957_v29  ;;  %v782_v32 = vmul.f32 1.0614054, %v4027_v30  ;;  %v1129_v5 = vadd.f32 %v3903_v57, %v1097_v17  ;;  %v1117_v39 = vmul.f32 %v1005_v11, %v3810_v25 }
 0x18c   :  { %v892_v38 = vadd.f32 0.2548296, %v876_v63  ;;  %v4045_v24 = vmul.f32 %v4030_v46, %v4030_v46  ;;  %v637_v31 = vmul.f32 1.442695, %v606_v15  ;;  %v4050_v23 = vmax.f32 %v1179_v7, 0.0  ;;  %v5463_v15 = vld [vmem:[#allocation5_spill] sm:$0xff] }
 0x18d   :  { %v989_v35 = vmul.f32 0.5, %v973_v20  ;;  %v798_v27 = vadd.f32 -1.4531521, %v782_v32  ;;  %v954_v26 = vmul.f32 %v938_v48, %v3895_v45  ;;  %v5456_v20 = vld [vmem:[#allocation11_spill] sm:$0xff]  ;;  %v1145_v12 = vmul.f32 %v1129_v5, %v5459_v60 }
 0x18e   :  { %v908_v6 = vmul.f32 %v3970_v43, %v892_v38  ;;  %v2904_v56 = vpop.eup %2903  ;;  %v1016_v32 = vmul.f32 %v984_v3, %v5456_v20  ;;  %v5458_v43 = vld [vmem:[#allocation39_spill] sm:$0xff]  ;;  %v4059_v38 = vmax.f32 %v1175_v18, 0.0  ;;  %2905 = vpow2.f32 %v637_v31 }
 0x18f   :  { %v1021_v29 = vmul.f32 %v989_v35, %v3810_v25  ;;  %v1101_v57 = vmul.f32 %v3962_v4, %v989_v35  ;;  %v814_v17 = vmul.f32 %v4027_v30, %v798_v27  ;;  %v684_v25 = vsel %vm668_vm1, -1.0, %v5392_v33  ;;  %v5460_v31 = vld [vmem:[#allocation35_spill] sm:$0xff] }
 0x190   :  { %v924_v63 = vmul.f32 %v2904_v56, %v908_v6  ;;  %v1068_v48 = vmul.f32 %v3863_v14, %v3863_v14  ;;  %v1177_v35 = vsub.f32 %v1145_v12, %v4045_v24  ;;  %v970_v60 = vadd.f32 1.0, %v954_v26 }
 0x191   :  { %v1037_v55 = vadd.f32 %v1021_v29, %v1005_v11  ;;  %v1133_v21 = vadd.f32 %v1117_v39, %v1101_v57  ;;  %v830_v7 = vadd.f32 1.4214138, %v814_v17  ;;  %v1032_v36 = vadd.f32 %v1016_v32, %v3911_v47  ;;  %v5461_v17 = vld [vmem:[#allocation7_spill] sm:$0xff] }
 0x192   :  { %v940_v4 = vsub.f32 1.0, %v924_v63  ;;  %v1096_v29 = vmul.f32 %v3872_v40, %v984_v3  ;;  %v1004_v57 = vmul.f32 0.3989423, %v2904_v56  ;;  %v1066_v26 = vmul.f32 %v5461_v17, %v5461_v17  ;;  %v5464_v63 = vld [vmem:[#allocation14_spill] sm:$0xff] }
 0x193   :  { %v4066_v45 = vmul.f32 %v1037_v55, %v3929_v37  ;;  %v846_v18 = vmul.f32 %v4027_v30, %v830_v7  ;;  %v1149_v39 = vmul.f32 %v1133_v21, %v3597_v9  ;;  %v1124_v55 = vadd.f32 %v5460_v31, %v3866_v52  ;;  %v5462_v52 = vld [vmem:[#allocation38_spill] sm:$0xff] }
 0x194   :  { %v956_v5 = vmul.f32 %v940_v4, %v684_v25  ;;  %v1112_v32 = vmul.f32 %v3911_v47, %v5456_v20  ;;  %v1084_v25 = vadd.f32 1.0, %v1068_v48  ;;  %v1048_v4 = vmul.f32 %v1032_v36, %v5462_v52  ;;  %v5465_v47 = vld [vmem:[#allocation32_spill] sm:$0xff]  ;;  %v5470_v52 = vld [vmem:[#allocation23_spill] sm:$0xff] }
 0x195   :  { %v4078_v37 = vmul.f32 %v4066_v45, %v4066_v45  ;;  %v862_v27 = vadd.f32 -0.28449672, %v846_v18  ;;  %v4094_v40 = vmax.f32 %v1177_v35, 0.0  ;;  %v986_v3 = vmul.f32 0.5, %v970_v60  ;;  %v5466_v20 = vld [vmem:[#allocation40_spill] sm:$0xff] }
 0x196   :  { %v972_v12 = vadd.f32 1.0, %v956_v5  ;;  %v1128_v5 = vadd.f32 %v1112_v32, %v1096_v29  ;;  %v4102_v11 = vmul.f32 %v5464_v63, %v5463_v15  ;;  %v556_v48 = vmul.f32 %v5466_v20, %v5465_v47  ;;  %v5468_v32 = vld [vmem:[#allocation24_spill] sm:$0xff] }
 0x197   :  { %v1181_v9 = vsub.f32 %v1149_v39, %v4078_v37  ;;  %v878_v21 = vmul.f32 %v4027_v30, %v862_v27  ;;  %v1116_v27 = vmul.f32 %v1004_v57, %v3863_v14  ;;  %vm670_vm2 = vcmp.lt.f32.partialorder %v3956_v61, 0.0 }
 0x198   :  { %v988_v7 = vmul.f32 0.5, %v972_v12  ;;  %v2906_v36 = vpop.eup %2905  ;;  %v1144_v20 = vmul.f32 %v1128_v5, %v5470_v52  ;;  %v1156_v60 = vmul.f32 %v3959_v10, %v3959_v10  ;;  %v686_v61 = vsel %vm670_vm2, -1.0, %v5392_v33 }
 0x199   :  { %v4096_v56 = vmax.f32 %v1181_v9, 0.0  ;;  %v894_v18 = vadd.f32 0.2548296, %v878_v21  ;;  %v1160_v9 = vmul.f32 %v1048_v4, %v1048_v4  ;;  %v5467_v21 = vld [vmem:[#allocation10_spill] sm:$0xff]  ;;  %v1006_v33 = vmul.f32 0.3989423, %v2906_v36 }
 0x19a   :  { %v1100_v39 = vmul.f32 %v1084_v25, %v988_v7  ;;  %v1020_v31 = vmul.f32 %v988_v7, %v3863_v14  ;;  %v1140_v14 = vmul.f32 %v1124_v55, %v5467_v21  ;;  %v5469_v7 = vld [vmem:[#allocation27_spill] sm:$0xff]  ;;  %v1018_v25 = vmul.f32 %v986_v3, %v5461_v17 }
 0x19b   :  { %v910_v35 = vmul.f32 %v4027_v30, %v894_v18  ;;  %v554_v15 = vmul.f32 %v5469_v7, %v5468_v32  ;;  %v1082_v30 = vadd.f32 1.0, %v1066_v26  ;;  %v1152_v55 = vmul.f32 %v3933_v16, %v3933_v16 }
 0x19c   :  { %v1132_v12 = vadd.f32 %v1116_v27, %v1100_v39  ;;  %v1036_v29 = vadd.f32 %v1020_v31, %v1004_v57  ;;  %v1002_v39 = vmul.f32 0.3989423, %v3935_v28  ;;  %v1176_v21 = vsub.f32 %v1144_v20, %v1160_v9 }
 0x19d   :  { %v926_v63 = vmul.f32 %v2906_v36, %v910_v35  ;;  %v1098_v7 = vmul.f32 %v1082_v30, %v986_v3  ;;  %v1070_v26 = vmul.f32 %v3940_v2, %v3940_v2  ;;  %v2723_v10 = vpack.c.bf16 %v1156_v60, %v1152_v55  ;;  %v4132_v3 = vld [vmem:[%s5255_s5] sm:$0xff] }
 0x19e   :  { %v1052_v18 = vmul.f32 %v1036_v29, %v556_v48  ;;  %v1148_v27 = vmul.f32 %v1132_v12, %v5465_v47  ;;  %v1034_v48 = vadd.f32 %v1018_v25, %v1002_v39  ;;  %v1172_v29 = vsub.f32 %v1140_v14, %v1156_v60 }
 0x19f   :  { %v942_v57 = vsub.f32 1.0, %v926_v63  ;;  %v5471_v63 = vld [vmem:[#allocation22_spill] sm:$0xff]  ;;  %v1114_v47 = vmul.f32 %v1002_v39, %v5461_v17  ;;  %v1168_v60 = vsub.f32 %v4102_v11, %v1152_v55  ;;  %v1192_v12 = vmax.f32 %v1176_v21, 0.0 }
 0x1a0   :  { %v2711_v31 = vpack.c.bf16 %v1052_v18, %v1048_v4  ;;  %v1164_v35 = vmul.f32 %v1052_v18, %v1052_v18  ;;  %v1094_v6 = vmul.f32 %v5471_v63, %v3917_v53  ;;  %v5472_v4 = vpack.c.bf16 %v4006_v34, %v3995_v54  ;;  %v5473_v53 = vld [vmem:[#allocation9_spill] sm:$0xff]  ;;  %v5481_v63 = vld [vmem:[#allocation6_spill] sm:$0xff] }
 0x1a1   :  { %v958_v5 = vmul.f32 %v942_v57, %v686_v61  ;;  %v1090_v36 = vmul.f32 %v5473_v53, %v3765_v22  ;;  %v1086_v25 = vadd.f32 1.0, %v1070_v26  ;;  %v1050_v54 = vmul.f32 %v1034_v48, %v554_v15 }
 0x1a2   :  { %2712 = vmatprep.subr.bf16.mxu0 %v2711_v31  ;;  %v2727_v28 = vpack.c.bf16 %v1164_v35, %v1160_v9  ;;  %v1180_v52 = vsub.f32 %v1148_v27, %v1164_v35  ;;  %v1110_v34 = vmul.f32 %v3781_v44, %v3520_v0  ;;  %v1130_v20 = vadd.f32 %v1114_v47, %v1098_v7  ;;  %v1200_v0 = vld [vmem:[%s5255_s5 + $0x8] sm:$0xff]  ;;  %v5477_v27 = vld [vmem:[#allocation8_spill] sm:$0xff] }
 0x1a3   :  { %v974_v16 = vadd.f32 1.0, %v958_v5  ;;  %2714 = vmatpush1.bf16.msra.mxu0 %v5472_v4  ;;  %v1188_v30 = vmax.f32 %v1172_v29, 0.0  ;;  %v1118_v11 = vmul.f32 %v1006_v33, %v3940_v2  ;;  %v5474_v22 = vpack.c.bf16 %v5450_v62, %v5449_v50  ;;  %v5476_v44 = vld [vmem:[#allocation18_spill] sm:$0xff]  ;;  %v5478_v31 = vld [vmem:[#allocation16_spill] sm:$0xff] }
 0x1a4   :  { %2724 = vmatprep.subr.bf16.mxu0 %v2723_v10  ;;  %v1196_v9 = vmax.f32 %v1180_v52, 0.0  ;;  %v5475_v61 = vmov 0.0   ;;  %v1106_v15 = vmul.f32 %v5476_v44, %v3335_v1  ;;  %v1126_v57 = vadd.f32 %v1110_v34, %v1094_v6  ;;  %v5480_v6 = vld [vmem:[#allocation17_spill] sm:$0xff] }
 0x1a5   :  { %v990_v14 = vmul.f32 0.5, %v974_v16  ;;  %v1184_v55 = vmax.f32 %v1168_v60, 0.0  ;;  %v558_v35 = vmul.f32 %v5478_v31, %v5477_v27  ;;  %v1162_v7 = vmul.f32 %v1050_v54, %v1050_v54 }
 0x1a6   :  { %2687 = vmatmul.mubr.msk.f32.vlgmr.msra.gmra.mrb[16].mxu0 %vm1227_vm3, %v4132_v3  ;;  %v2735_v17 = vpack.c.bf16 %v1196_v9, %v1192_v12  ;;  %v1122_v50 = vadd.f32 %v1106_v15, %v1090_v36  ;;  %v1158_v62 = vmul.f32 %v3992_v8, %v3992_v8  ;;  %v1146_v26 = vmul.f32 %v1130_v20, %v5468_v32 }
 0x1a7   :  { %v1102_v18 = vmul.f32 %v1086_v25, %v990_v14  ;;  %v1022_v39 = vmul.f32 %v990_v14, %v3940_v2  ;;  %2726 = vmatpush1.bf16.msra.mxu0 %v5474_v22  ;;  %1310 = vmatprep.mubr.f32.mxu0 %v5475_v61  ;;  %v2731_v5 = vpack.c.bf16 %v1188_v30, %v1184_v55  ;;  %vm1446_vm4 = vcmask 523264  }
 0x1a8   :  { %2728 = vmatprep.subr.bf16.mxu0 %v2727_v28  ;;  %v5479_v1 = vpack.c.bf16 %v4019_v58, %v4012_v13  ;;  %v1142_v10 = vmul.f32 %v1126_v57, %v5480_v6  ;;  %v1154_v8 = vmul.f32 %v3984_v41, %v3984_v41  ;;  %v1178_v52 = vsub.f32 %v1146_v26, %v1162_v7  ;;  %v1202_v41 = vld [vmem:[%s5255_s5 + $0x18] sm:$0xff] }
 0x1a9   :  { %v1134_v2 = vadd.f32 %v1118_v11, %v1102_v18  ;;  %v1038_v21 = vadd.f32 %v1022_v39, %v1006_v33  ;;  %v1201_v33 = vld [vmem:[%s5255_s5 + $0x10] sm:$0xff]  ;;  %v1138_v13 = vmul.f32 %v1122_v50, %v5481_v63  ;;  %v5482_v47 = vpack.c.bf16 %v5455_v59, %v5454_v49  ;;  %v1429_v11 = vpop.permute.xlu0 %1428 }
 0x1aa   :  { %2688 = vmatmul.mubr.msk.f32.gmra.mrb[18].mxu0 %vm1227_vm3, %v1200_v0  ;;  %v2739_v58 = vpack.c.bf16 %v1158_v62, %v1154_v8  ;;  %v1174_v4 = vsub.f32 %v1142_v10, %v1158_v62  ;;  %v5483_v12 = vpack.c.bf16 %v4066_v45, %v4030_v46  ;;  %v1194_v53 = vmax.f32 %v1178_v52, 0.0  ;;  %v1418_v46 = vld [vmem:[%s5256_s6] sm:$0xff] }
 0x1ab   :  { %v1054_v48 = vmul.f32 %v1038_v21, %v558_v35  ;;  %2730 = vmatpush1.bf16.msra.mxu0 %v5479_v1  ;;  %1316 = vmatprep.mubr.f32.mxu0 %v5475_v61  ;;  %v1150_v28 = vmul.f32 %v1134_v2, %v5477_v27  ;;  %v1170_v9 = vsub.f32 %v1138_v13, %v1154_v8  ;;  %v4256_v27 = vpop.permute.xlu1 %1433 }
 0x1ac   :  { %2732 = vmatprep.subr.bf16.mxu0 %v2731_v5  ;;  %v1190_v49 = vmax.f32 %v1174_v4, 0.0  ;;  %v5484_v14 = vpack.c.bf16 %v4050_v23, %v4059_v38  ;;  %v5485_v45 = vpack.c.bf16 %v5453_v42, %v5452_v19  ;;  %v1419_v38 = vld [vmem:[%s5256_s6 + $0x8] sm:$0xff]  ;;  %v5486_v19 = vpack.c.bf16 %v4078_v37, %v4045_v24  ;;  %v1420_v42 = vld [vmem:[%s5256_s6 + $0x10] sm:$0xff]  ;;  %v1421_v24 = vld [vmem:[%s5256_s6 + $0x18] sm:$0xff] }
 0x1ad   :  { %v2719_v32 = vpack.c.bf16 %v1054_v48, %v1050_v54  ;;  %v1166_v29 = vmul.f32 %v1054_v48, %v1054_v48  ;;  %v1186_v25 = vmax.f32 %v1170_v9, 0.0  ;;  %v5488_v37 = vpack.c.bf16 %v4096_v56, %v4094_v40  ;;  %v4264_v50 = vpop.permute.xlu0 %1438 }
 0x1ae   :  { %2689 = vmatmul.mubr.msk.f32.gmra.mrb[20].mxu0 %vm1227_vm3, %v1201_v33 }
 0x1af   :  { %2720 = vmatprep.subr.bf16.mxu1 %v2719_v32  ;;  %v2743_v16 = vpack.c.bf16 %v1166_v29, %v1162_v7  ;;  %2734 = vmatpush1.bf16.msra.mxu0 %v5482_v47  ;;  %v1182_v60 = vsub.f32 %v1150_v28, %v1166_v29  ;;  %v2747_v23 = vpack.c.bf16 %v1190_v49, %v1186_v25  ;;  %v4280_v32 = vpop.permute.xlu1 %1443 }
 0x1b0   :  { %2722 = vmatpush1.bf16.msra.mxu1 %v5483_v12  ;;  %2736 = vmatprep.subr.bf16.mxu0 %v2735_v17  ;;  %5490 = vst [vmem:[#allocation28_spill] sm:$0xff] %v4280_v32 }
 0x1b1   :  { %2740 = vmatprep.subr.bf16.mxu1 %v2739_v58  ;;  %v1198_v36 = vmax.f32 %v1182_v60, 0.0  ;;  %1322 = vmatprep.mubr.f32.mxu0 %v5475_v61  ;;  %v1210_v6 = vpop.permute.xlu0 %1209 }
 0x1b2   :  { %2690 = vmatmul.mubr.msk.f32.gmra.mrb[22].mxu0 %vm1227_vm3, %v1202_v41 }
 0x1b3   :  { %2691 = vmatmul.mubr.msk.f32.vlgmr.msra.gmra.mrb[16].mxu1 %vm1227_vm3, %v4132_v3  ;;  %v2751_v59 = vpack.c.bf16 %v1198_v36, %v1194_v53  ;;  %2738 = vmatpush1.bf16.msra.mxu0 %v5484_v14  ;;  %v5487_v3 = vpack.c.bf16 %v5458_v43, %v5457_v51 }
 0x1b4   :  { %2742 = vmatpush1.bf16.msra.mxu1 %v5485_v45  ;;  %1399 = vmatprep.mubr.f32.mxu1 %v5475_v61 }
 0x1b5   :  { %2744 = vmatprep.subr.bf16.mxu1 %v2743_v16  ;;  %1523 = vmatprep.mubr.f32.mxu0 %v5475_v61 }
 0x1b6   :  { %2695 = vmatmul.mubr.msk.f32.vlgmr.msra.gmra.mrb[24].mxu0 %vm1446_vm4, %v1418_v46 }
 0x1b7   :  { %2692 = vmatmul.mubr.msk.f32.gmra.mrb[18].mxu1 %vm1227_vm3, %v1200_v0  ;;  %1529 = vmatprep.mubr.f32.mxu0 %v5475_v61 }
 0x1b8   :  { %2746 = vmatpush1.bf16.msra.mxu1 %v5486_v19  ;;  %1405 = vmatprep.mubr.f32.mxu1 %v5475_v61 }
 0x1b9   :  { %2748 = vmatprep.subr.bf16.mxu1 %v2747_v23 }
 0x1ba   :  { %2696 = vmatmul.mubr.msk.f32.gmra.mrb[26].mxu0 %vm1446_vm4, %v1419_v38 }
 0x1bb   :  { %2693 = vmatmul.mubr.msk.f32.gmra.mrb[20].mxu1 %vm1227_vm3, %v1201_v33  ;;  %1535 = vmatprep.mubr.f32.mxu0 %v5475_v61 }
 0x1bc   :  { %2750 = vmatpush1.bf16.msra.mxu1 %v5487_v3  ;;  %1411 = vmatprep.mubr.f32.mxu1 %v5475_v61 }
 0x1bd   :  { %2752 = vmatprep.subr.bf16.mxu1 %v2751_v59 }
 0x1be   :  { %2697 = vmatmul.mubr.msk.f32.gmra.mrb[28].mxu0 %vm1446_vm4, %v1420_v42 }
 0x1bf   :  { %2694 = vmatmul.mubr.msk.f32.gmra.mrb[22].mxu1 %vm1227_vm3, %v1202_v41  ;;  %1541 = vmatprep.mubr.f32.mxu0 %v5475_v61 }
 0x1c0   :  { %2754 = vmatpush1.bf16.msra.mxu1 %v5488_v37  ;;  %1612 = vmatprep.mubr.f32.mxu1 %v5475_v61 }
 0x1c2   :  { %2698 = vmatmul.mubr.msk.f32.gmra.mrb[30].mxu0 %vm1446_vm4, %v1421_v24 }
 0x1c3   :  { %2699 = vmatmul.mubr.msk.f32.vlgmr.msra.gmra.mrb[24].mxu1 %vm1446_vm4, %v1418_v46  ;;  %2399 = vmatprep.mubr.f32.mxu0 %v5475_v61  ;;  %v1215_v46 = vpop.permute.xlu1 %1214 }
 0x1c4   :  { %1618 = vmatprep.mubr.f32.mxu1 %v5475_v61 }
 0x1c7   :  { %2700 = vmatmul.mubr.msk.f32.gmra.mrb[26].mxu1 %vm1446_vm4, %v1419_v38 }
 0x1c8   :  { %1624 = vmatprep.mubr.f32.mxu1 %v5475_v61 }
 0x1cb   :  { %2701 = vmatmul.mubr.msk.f32.gmra.mrb[28].mxu1 %vm1446_vm4, %v1420_v42 }
 0x1cc   :  { %1630 = vmatprep.mubr.f32.mxu1 %v5475_v61 }
 0x1cf   :  { %2702 = vmatmul.mubr.msk.f32.gmra.mrb[30].mxu1 %vm1446_vm4, %v1421_v24 }
 0x1d0   :  { %2470 = vmatprep.mubr.f32.mxu1 %v5475_v61 }
 0x279   :  { %v1306_v51 = vpop.f32.mrb[16].mxu0 }
 0x27a   :  { %v1308_v43 = vpop.f32.mrb[17].mxu0  ;;  %v1307_v29 = vadd.f32 %v1306_v51, %v1210_v6 }
 0x27b   :  { %v1309_v58 = vadd.f32 %v1308_v43, %v1210_v6 }
 0x27d   :  { %v1312_v40 = vpop.f32.mrb[18].mxu0 }
 0x27e   :  { %v4236_v56 = vpop.f32.mrb[19].mxu0  ;;  %v1313_v25 = vadd.f32 %v1312_v40, %v1215_v46 }
 0x281   :  { %v4238_v54 = vpop.f32.mrb[20].mxu0 }
 0x282   :  { %v4240_v34 = vpop.f32.mrb[21].mxu0 }
 0x285   :  { %v4242_v20 = vpop.f32.mrb[22].mxu0 }
 0x286   :  { %v4244_v30 = vpop.f32.mrb[16].mxu1  ;;  %v4246_v17 = vpop.f32.mrb[23].mxu0 }
 0x287   :  { %v4248_v18 = vpop.f32.mrb[17].mxu1 }
 0x289   :  { %v1525_v39 = vpop.f32.mrb[24].mxu0 }
 0x28a   :  { %v4250_v22 = vpop.f32.mrb[18].mxu1  ;;  %v1526_v0 = vadd.f32 %v1525_v39, %v1429_v11  ;;  %v1527_v44 = vpop.f32.mrb[25].mxu0 }
 0x28b   :  { %v4252_v15 = vpop.f32.mrb[19].mxu1  ;;  %v1528_v57 = vadd.f32 %v1527_v44, %v1429_v11  ;;  %v1396_v44 = vadd.f32 %v4244_v30, %v1210_v6  ;;  %v1220_v30 = vpop.permute.xlu0 %1219 }
 0x28c   :  { %v4254_v55 = vadd.f32 1e-06, %v1526_v0 }
 0x28d   :  { %v4258_v31 = vadd.f32 1e-06, %v1528_v57  ;;  %v1531_v35 = vpop.f32.mrb[26].mxu0 }
 0x28e   :  { %v4260_v2 = vpop.f32.mrb[20].mxu1  ;;  %2907 = vrsqrt.f32 %v4254_v55  ;;  %v1532_v21 = vadd.f32 %v1531_v35, %v4256_v27  ;;  %v1533_v7 = vpop.f32.mrb[27].mxu0 }
 0x28f   :  { %5489 = vst [vmem:[#allocation21_spill] sm:$0xff] %v4258_v31  ;;  %v4266_v62 = vpop.f32.mrb[21].mxu1  ;;  %2909 = vrsqrt.f32 %v4258_v31  ;;  %v1534_v53 = vadd.f32 %v1533_v7, %v4256_v27 }
 0x290   :  { %v4269_v5 = vadd.f32 1e-06, %v1532_v21 }
 0x291   :  { %v1537_v26 = vpop.f32.mrb[28].mxu0  ;;  %v4311_v38 = vadd.f32 1e-06, %v1534_v53 }
 0x292   :  { %v4271_v48 = vpop.f32.mrb[22].mxu1  ;;  %v1539_v1 = vpop.f32.mrb[29].mxu0  ;;  %2911 = vrsqrt.f32 %v4269_v5 }
 0x293   :  { %v4273_v33 = vpop.f32.mrb[23].mxu1  ;;  %5492 = vst [vmem:[#allocation12_spill] sm:$0xff] %v4311_v38  ;;  %v1540_v53 = vadd.f32 %v1539_v1, %v4264_v50 }
 0x295   :  { %v4276_v10 = vpop.f32.mrb[30].mxu0 }
 0x296   :  { %v1614_v8 = vpop.f32.mrb[24].mxu1  ;;  %v4278_v28 = vpop.f32.mrb[31].mxu0 }
 0x297   :  { %v1615_v52 = vadd.f32 %v1614_v8, %v1429_v11  ;;  %v1616_v63 = vpop.f32.mrb[25].mxu1  ;;  %v1538_v8 = vadd.f32 %v1537_v26, %v4264_v50  ;;  %v4348_v26 = vadd.f32 %v4238_v54, %v1220_v30 }
 0x298   :  { %v4282_v13 = vpop.eup %2907  ;;  %v1617_v16 = vadd.f32 %v1616_v63, %v1429_v11 }
 0x299   :  { %v4284_v4 = vpop.eup %2909  ;;  %v4287_v47 = vmul.f32 %v4282_v13, %v1307_v29  ;;  %v4289_v60 = vadd.f32 1e-06, %v1615_v52  ;;  %v1398_v52 = vadd.f32 %v4248_v18, %v1210_v6  ;;  %v4351_v18 = vadd.f32 %v4240_v34, %v1220_v30 }
 0x29a   :  { %v4292_v41 = vmul.f32 %v4284_v4, %v1309_v58  ;;  %v4294_v12 = vadd.f32 1e-06, %v1617_v16  ;;  %v1620_v9 = vpop.f32.mrb[26].mxu1  ;;  %v4362_v1 = vadd.f32 1e-06, %v1538_v8  ;;  %v1544_v34 = vadd.f32 %v4276_v10, %v4280_v32 }
 0x29b   :  { %v4298_v36 = vmul.f32 0.70710677, %v4287_v47  ;;  %2913 = vrsqrt.f32 %v4289_v60  ;;  %v4301_v49 = vpop.f32.mrb[27].mxu1  ;;  %v1621_v43 = vadd.f32 %v1620_v9, %v4256_v27  ;;  %v1546_v10 = vadd.f32 %v4278_v28, %v4280_v32 }
 0x29c   :  { %5491 = vst [vmem:[#allocation33_spill] sm:$0xff] %v4294_v12  ;;  %v4304_v59 = vmul.f32 0.70710677, %v4292_v41  ;;  %2915 = vrsqrt.f32 %v4294_v12  ;;  %v4307_v14 = vpop.eup %2911  ;;  %5497 = vst [vmem:[#allocation34_spill] sm:$0xff] %v4362_v1  ;;  %v4401_v28 = vadd.f32 1e-06, %v1544_v34 }
 0x29d   :  { %v1813_v45 = vand.u32 2147483647, %v4298_v36  ;;  %v4316_v24 = vmul.f32 %v4307_v14, %v1313_v25  ;;  %2917 = vrsqrt.f32 %v4311_v38  ;;  %v4329_v57 = vadd.f32 1e-06, %v1621_v43 }
 0x29e   :  { %v1814_v23 = vand.u32 2147483647, %v4304_v59  ;;  %v4313_v19 = vpop.f32.mrb[28].mxu1  ;;  %v1315_v25 = vadd.f32 %v4236_v56, %v1215_v46  ;;  %v1701_v56 = vmul.f32 -0.5, %v4287_v47  ;;  %5504 = vst [vmem:[#allocation37_spill] sm:$0xff] %v4401_v28  ;;  %vm1781_vm5 = vcmp.lt.f32.partialorder %v4298_v36, 0.0 }
 0x29f   :  { %v1829_v42 = vmul.f32 0.3275911, %v1813_v45  ;;  %v4318_v37 = vpop.f32.mrb[29].mxu1  ;;  %v1705_v39 = vmul.f32 -0.5, %v4316_v24  ;;  %v4323_v40 = vmul.f32 0.70710677, %v4316_v24  ;;  %v1225_v45 = vpop.permute.xlu1 %1224 }
 0x2a0   :  { %v1830_v3 = vmul.f32 0.3275911, %v1814_v23  ;;  %5493 = vst [vmem:[#allocation29_spill] sm:$0xff] %v4318_v37  ;;  %v4357_v23 = vadd.f32 %v4242_v20, %v1225_v45  ;;  %v4372_v20 = vadd.f32 %v4246_v17, %v1225_v45  ;;  %v4389_v17 = vadd.f32 %v4266_v62, %v1220_v30 }
 0x2a1   :  { %v1845_v51 = vadd.f32 1.0, %v1829_v42  ;;  %v1721_v21 = vmul.f32 %v1705_v39, %v4316_v24  ;;  %v1817_v7 = vand.u32 2147483647, %v4323_v40  ;;  %v4378_v39 = vadd.f32 %v4252_v15, %v1215_v46 }
 0x2a2   :  { %v1846_v11 = vadd.f32 1.0, %v1830_v3  ;;  %v4326_v0 = vpop.f32.mrb[30].mxu1  ;;  %5496 = vst [vmem:[#allocation30_spill] sm:$0xff] %v4357_v23  ;;  %5498 = vst [vmem:[#allocation19_spill] sm:$0xff] %v4372_v20  ;;  %v4407_v62 = vmul.f32 %v4282_v13, %v4254_v55  ;;  %v4421_v13 = vmul.f32 %v4284_v4, %v4258_v31  ;;  %vm1782_vm6 = vcmp.lt.f32.partialorder %v4304_v59, 0.0 }
 0x2a3   :  { %5494 = vst [vmem:[#allocation26_spill] sm:$0xff] %v4326_v0  ;;  %2919 = vrcp.f32 %v1845_v51  ;;  %v4331_v35 = vpop.f32.mrb[31].mxu1  ;;  %v1741_v16 = vmul.f32 1.442695, %v1721_v21  ;;  %v1833_v9 = vmul.f32 0.3275911, %v1817_v7  ;;  %v1402_v51 = vadd.f32 %v4250_v22, %v1215_v46 }
 0x2a4   :  { %5495 = vst [vmem:[#allocation13_spill] sm:$0xff] %v4331_v35  ;;  %2921 = vrcp.f32 %v1846_v11  ;;  %v4375_v11 = vadd.f32 1e-06, %v1540_v53  ;;  %5501 = vst [vmem:[#allocation36_spill] sm:$0xff] %v4389_v17  ;;  %v4392_v22 = vadd.f32 %v4271_v48, %v1225_v45  ;;  %v1717_v46 = vmul.f32 %v1701_v56, %v4287_v47 }
 0x2a5   :  { %v4336_v29 = vpop.eup %2913  ;;  %2923 = vrsqrt.f32 %v4329_v57  ;;  %v1849_v3 = vadd.f32 1.0, %v1833_v9  ;;  %5507 = vst [vmem:[#allocation35_spill] sm:$0xff] %v4421_v13  ;;  %v2182_v35 = vmul.f32 %v4292_v41, %v4292_v41  ;;  %vm1785_vm7 = vcmp.lt.f32.partialorder %v4323_v40, 0.0 }
 0x2a6   :  { %v4340_v63 = vpop.eup %2915  ;;  %v4343_v58 = vmul.f32 %v4336_v29, %v1396_v44  ;;  %2925 = vpow2.f32 %v1741_v16  ;;  %5499 = vst [vmem:[#allocation31_spill] sm:$0xff] %v4375_v11  ;;  %v4381_v44 = vadd.f32 %v4260_v2, %v1220_v30  ;;  %5502 = vst [vmem:[#allocation15_spill] sm:$0xff] %v4392_v22  ;;  %v4397_v2 = vadd.f32 %v4273_v33, %v1225_v45 }
 0x2a7   :  { %v4354_v6 = vmul.f32 %v4340_v63, %v1398_v52  ;;  %v4386_v7 = vpop.eup %2917  ;;  %2927 = vrcp.f32 %v1849_v3  ;;  %v4417_v45 = vadd.f32 1e-06, %v1546_v10  ;;  %v1733_v34 = vmul.f32 1.442695, %v1717_v46 }
 0x2a8   :  { %v4360_v42 = vmul.f32 0.70710677, %v4343_v58  ;;  %5500 = vst [vmem:[#allocation25_spill] sm:$0xff] %v4381_v44  ;;  %5503 = vst [vmem:[#allocation11_spill] sm:$0xff] %v4397_v2  ;;  %2929 = vrsqrt.f32 %v4362_v1  ;;  %v4415_v53 = vmul.f32 %v4386_v7, %v1315_v25  ;;  %v2181_v10 = vmul.f32 %v4287_v47, %v4287_v47 }
 0x2a9   :  { %v4366_v54 = vmul.f32 0.70710677, %v4354_v6  ;;  %2931 = vrsqrt.f32 %v4375_v11  ;;  %5506 = vst [vmem:[#allocation20_spill] sm:$0xff] %v4417_v45  ;;  %v5508_v44 = vmov 1.0   ;;  %v4488_v1 = vmul.f32 %v4307_v14, %v4269_v5 }
 0x2aa   :  { %v1815_v43 = vand.u32 2147483647, %v4360_v42  ;;  %5505 = vst [vmem:[#allocation39_spill] sm:$0xff] %v4415_v53  ;;  %v1623_v40 = vadd.f32 %v4301_v49, %v4256_v27  ;;  %vm1783_vm8 = vcmp.lt.f32.partialorder %v4360_v42, 0.0 }
 0x2ab   :  { %v1816_v21 = vand.u32 2147483647, %v4366_v54  ;;  %vm1784_vm9 = vcmp.lt.f32.partialorder %v4366_v54, 0.0 }
 0x2ac   :  { %v1831_v8 = vmul.f32 0.3275911, %v1815_v43 }
 0x2ad   :  { %v4394_v15 = vpop.eup %2919  ;;  %v1832_v9 = vmul.f32 0.3275911, %v1816_v21 }
 0x2ae   :  { %v4403_v52 = vpop.eup %2921  ;;  %v1893_v48 = vmul.f32 1.0614054, %v4394_v15  ;;  %v1847_v30 = vadd.f32 1.0, %v1831_v8 }
 0x2af   :  { %v4411_v16 = vpop.eup %2923  ;;  %v1894_v33 = vmul.f32 1.0614054, %v4403_v52  ;;  %v1848_v8 = vadd.f32 1.0, %v1832_v9 }
 0x2b0   :  { %v1909_v56 = vadd.f32 -1.4531521, %v1893_v48  ;;  %2933 = vrcp.f32 %v1847_v30  ;;  %v4424_v3 = vmul.f32 %v4411_v16, %v1402_v51  ;;  %v4427_v21 = vpop.eup %2925  ;;  %v1702_v51 = vmul.f32 -0.5, %v4292_v41 }
 0x2b1   :  { %v1910_v43 = vadd.f32 -1.4531521, %v1894_v33  ;;  %2935 = vrsqrt.f32 %v4401_v28  ;;  %v4438_v46 = vmul.f32 0.3989423, %v4427_v21  ;;  %v4441_v30 = vmul.f32 0.70710677, %v4415_v53  ;;  %v4452_v13 = vpop.eup %2927 }
 0x2b2   :  { %v1925_v25 = vmul.f32 %v4394_v15, %v1909_v56  ;;  %v1707_v48 = vmul.f32 -0.5, %v4424_v3  ;;  %v4434_v4 = vmul.f32 0.70710677, %v4424_v3  ;;  %2937 = vrcp.f32 %v1848_v8 }
 0x2b3   :  { %v1926_v9 = vmul.f32 %v4403_v52, %v1910_v43  ;;  %2939 = vpow2.f32 %v1733_v34  ;;  %v4450_v8 = vmul.f32 %v4438_v46, %v4316_v24  ;;  %v1718_v34 = vmul.f32 %v1702_v51, %v4292_v41 }
 0x2b4   :  { %v1941_v33 = vadd.f32 1.4214138, %v1925_v25  ;;  %v1723_v56 = vmul.f32 %v1707_v48, %v4424_v3  ;;  %v1819_v61 = vand.u32 2147483647, %v4434_v4  ;;  %v1703_v25 = vmul.f32 -0.5, %v4343_v58  ;;  %v4456_v48 = vpop.eup %2929 }
 0x2b5   :  { %v1897_v45 = vmul.f32 1.0614054, %v4452_v13  ;;  %v1818_v22 = vand.u32 2147483647, %v4441_v30  ;;  %v4463_v28 = vpop.eup %2931  ;;  %v1942_v17 = vadd.f32 1.4214138, %v1926_v9 }
 0x2b6   :  { %v1957_v2 = vmul.f32 %v4394_v15, %v1941_v33  ;;  %v1745_v43 = vmul.f32 1.442695, %v1723_v56  ;;  %v1835_v20 = vmul.f32 0.3275911, %v1819_v61  ;;  %v1797_v61 = vsel %vm1781_vm5, -1.0, %v5508_v44 }
 0x2b7   :  { %v4468_v56 = vadd.f32 1.0, %v2181_v10  ;;  %v4473_v51 = vsel %vm1782_vm6, -1.0, %v5508_v44  ;;  %v1913_v31 = vadd.f32 -1.4531521, %v1897_v45  ;;  %v1735_v10 = vmul.f32 1.442695, %v1718_v34 }
 0x2b8   :  { %v1973_v11 = vadd.f32 -0.28449672, %v1957_v2  ;;  %2941 = vpow2.f32 %v1745_v43  ;;  %v1851_v33 = vadd.f32 1.0, %v1835_v20  ;;  %v1719_v2 = vmul.f32 %v1703_v25, %v4343_v58 }
 0x2b9   :  { %v1834_v20 = vmul.f32 0.3275911, %v1818_v22  ;;  %v4482_v43 = vadd.f32 1.0, %v2182_v35  ;;  %v1929_v59 = vmul.f32 %v4452_v13, %v1913_v31  ;;  %v1958_v45 = vmul.f32 %v4403_v52, %v1942_v17 }
 0x2ba   :  { %v4475_v0 = vpop.eup %2933  ;;  %v1989_v32 = vmul.f32 %v4394_v15, %v1973_v11  ;;  %2943 = vrcp.f32 %v1851_v33  ;;  %v2185_v35 = vmul.f32 %v4316_v24, %v4316_v24  ;;  %v1737_v31 = vmul.f32 1.442695, %v1719_v2 }
 0x2bb   :  { %v4479_v9 = vpop.eup %2935  ;;  %v1895_v36 = vmul.f32 1.0614054, %v4475_v0  ;;  %5510 = vst [vmem:[#allocation38_spill] sm:$0xff] %v4482_v43  ;;  %v1850_v11 = vadd.f32 1.0, %v1834_v20  ;;  %v1945_v33 = vadd.f32 1.4214138, %v1929_v59 }
 0x2bc   :  { %5509 = vst [vmem:[#allocation7_spill] sm:$0xff] %v4479_v9  ;;  %v2005_v23 = vadd.f32 0.2548296, %v1989_v32  ;;  %v4490_v25 = vpop.eup %2937  ;;  %v1974_v9 = vadd.f32 -0.28449672, %v1958_v45  ;;  %vm1787_vm10 = vcmp.lt.f32.partialorder %v4434_v4, 0.0 }
 0x2bd   :  { %v1911_v22 = vadd.f32 -1.4531521, %v1895_v36  ;;  %v1896_v32 = vmul.f32 1.0614054, %v4490_v25  ;;  %2945 = vrcp.f32 %v1850_v11  ;;  %v2940_v17 = vpop.eup %2939  ;;  %v1961_v20 = vmul.f32 %v4452_v13, %v1945_v33 }
 0x2be   :  { %v2021_v34 = vmul.f32 %v4394_v15, %v2005_v23  ;;  %v4501_v36 = vmul.f32 %v4386_v7, %v4311_v38  ;;  %2947 = vpow2.f32 %v1735_v10  ;;  %v1801_v23 = vsel %vm1785_vm7, -1.0, %v5508_v44 }
 0x2bf   :  { %v1927_v14 = vmul.f32 %v4475_v0, %v1911_v22  ;;  %v1977_v2 = vadd.f32 -0.28449672, %v1961_v20  ;;  %v4506_v11 = vadd.f32 1.0, %v2185_v35  ;;  %v1706_v22 = vmul.f32 -0.5, %v4415_v53 }
 0x2c0   :  { %5511 = vst [vmem:[#allocation5_spill] sm:$0xff] %v4501_v36  ;;  %v2037_v59 = vmul.f32 %v2940_v17, %v2021_v34  ;;  %v4513_v7 = vmul.f32 %v4336_v29, %v4289_v60  ;;  %2949 = vpow2.f32 %v1737_v31  ;;  %v1912_v27 = vadd.f32 -1.4531521, %v1896_v32 }
 0x2c1   :  { %v1943_v15 = vadd.f32 1.4214138, %v1927_v14  ;;  %v1993_v10 = vmul.f32 %v4452_v13, %v1977_v2  ;;  %v4520_v35 = vadd.f32 1e-06, %v1623_v40  ;;  %v2117_v20 = vmul.f32 0.3989423, %v2940_v17 }
 0x2c2   :  { %v4509_v43 = vpop.eup %2941  ;;  %v2053_v33 = vsub.f32 1.0, %v2037_v59  ;;  %v1990_v59 = vmul.f32 %v4403_v52, %v1974_v9  ;;  %v4527_v29 = vmul.f32 %v4340_v63, %v4294_v12  ;;  %v4531_v2 = vmul.f32 %v1706_v22, %v4415_v53 }
 0x2c3   :  { %v1959_v49 = vmul.f32 %v4475_v0, %v1943_v15  ;;  %v4518_v45 = vmul.f32 0.3989423, %v4509_v43  ;;  %5512 = vst [vmem:[#allocation14_spill] sm:$0xff] %v4520_v35  ;;  %v2009_v32 = vadd.f32 0.2548296, %v1993_v10  ;;  %v2183_v40 = vmul.f32 %v4343_v58, %v4343_v58 }
 0x2c4   :  { %v4522_v34 = vpop.eup %2943  ;;  %v2069_v14 = vmul.f32 %v2053_v33, %v1797_v61  ;;  %5513 = vst [vmem:[#allocation32_spill] sm:$0xff] %v4527_v29  ;;  %v1928_v61 = vmul.f32 %v4490_v25, %v1912_v27  ;;  %2951 = vrsqrt.f32 %v4520_v35  ;;  %v2006_v10 = vadd.f32 0.2548296, %v1990_v59 }
 0x2c5   :  { %v1975_v31 = vadd.f32 -0.28449672, %v1959_v49  ;;  %v1899_v15 = vmul.f32 1.0614054, %v4522_v34  ;;  %v4538_v9 = vmul.f32 %v4518_v45, %v4424_v3  ;;  %v2025_v17 = vmul.f32 %v4452_v13, %v2009_v32 }
 0x2c6   :  { %v2085_v38 = vadd.f32 1.0, %v2069_v14  ;;  %v1704_v14 = vmul.f32 -0.5, %v4354_v6  ;;  %v2229_v27 = vmul.f32 %v2117_v20, %v4287_v47  ;;  %v2022_v37 = vmul.f32 %v4403_v52, %v2006_v10 }
 0x2c7   :  { %5514 = vst [vmem:[#allocation40_spill] sm:$0xff] %v4538_v9  ;;  %v1991_v63 = vmul.f32 %v4475_v0, %v1975_v31  ;;  %v1915_v33 = vadd.f32 -1.4531521, %v1899_v15  ;;  %v4543_v49 = vpop.eup %2945  ;;  %v2041_v29 = vmul.f32 %v4427_v21, %v2025_v17  ;;  %v1944_v15 = vadd.f32 1.4214138, %v1928_v61 }
 0x2c8   :  { %v2101_v22 = vmul.f32 0.5, %v2085_v38  ;;  %v4550_v36 = vpop.eup %2947  ;;  %v1898_v38 = vmul.f32 1.0614054, %v4543_v49  ;;  %vm1786_vm11 = vcmp.lt.f32.partialorder %v4441_v30, 0.0 }
 0x2c9   :  { %v2007_v12 = vadd.f32 0.2548296, %v1991_v63  ;;  %v1931_v31 = vmul.f32 %v4522_v34, %v1915_v33  ;;  %v2057_v35 = vsub.f32 1.0, %v2041_v29  ;;  %v4558_v63 = vmul.f32 %v4456_v48, %v4348_v26 }
 0x2ca   :  { %v2133_v13 = vmul.f32 %v2101_v22, %v4287_v47  ;;  %v2213_v32 = vmul.f32 %v4468_v56, %v2101_v22  ;;  %v2950_v21 = vpop.eup %2949  ;;  %v1914_v9 = vadd.f32 -1.4531521, %v1898_v38  ;;  %v1720_v56 = vmul.f32 %v1704_v14, %v4354_v6 }
 0x2cb   :  { %v2023_v59 = vmul.f32 %v4475_v0, %v2007_v12  ;;  %v1947_v53 = vadd.f32 1.4214138, %v1931_v31  ;;  %v2073_v61 = vmul.f32 %v2057_v35, %v1801_v23  ;;  %v1960_v26 = vmul.f32 %v4490_v25, %v1944_v15 }
 0x2cc   :  { %v2149_v17 = vadd.f32 %v2133_v13, %v2117_v20  ;;  %v2245_v33 = vadd.f32 %v2229_v27, %v2213_v32  ;;  %v1930_v20 = vmul.f32 %v4543_v49, %v1914_v9  ;;  %v2199_v27 = vadd.f32 1.0, %v2183_v40 }
 0x2cd   :  { %v2039_v47 = vmul.f32 %v2950_v21, %v2023_v59  ;;  %v1963_v22 = vmul.f32 %v4522_v34, %v1947_v53  ;;  %v2089_v52 = vadd.f32 1.0, %v2073_v61  ;;  %v2038_v53 = vmul.f32 %v4550_v36, %v2022_v37 }
 0x2ce   :  { %v4564_v12 = vmul.f32 %v2149_v17, %v4407_v62  ;;  %v4567_v0 = vmul.f32 %v2245_v33, %v4254_v55  ;;  %v1799_v62 = vsel %vm1783_vm8, -1.0, %v5508_v44  ;;  %v4580_v55 = vmul.f32 0.70710677, %v4558_v63  ;;  %v4582_v23 = vpop.eup %2951 }
 0x2cf   :  { %v2055_v29 = vsub.f32 1.0, %v2039_v47  ;;  %v1979_v10 = vadd.f32 -0.28449672, %v1963_v22  ;;  %v1739_v9 = vmul.f32 1.442695, %v1720_v56  ;;  %v2105_v40 = vmul.f32 0.5, %v2089_v52 }
 0x2d0   :  { %v4573_v14 = vmul.f32 %v4564_v12, %v4564_v12  ;;  %v2119_v32 = vmul.f32 0.3989423, %v2950_v21  ;;  %v1976_v15 = vadd.f32 -0.28449672, %v1960_v26  ;;  %v1946_v38 = vadd.f32 1.4214138, %v1930_v20 }
 0x2d1   :  { %v2071_v35 = vmul.f32 %v2055_v29, %v1799_v62  ;;  %v1995_v31 = vmul.f32 %v4522_v34, %v1979_v10  ;;  %v2137_v59 = vmul.f32 %v2105_v40, %v4316_v24  ;;  %v2217_v37 = vmul.f32 %v4506_v11, %v2105_v40 }
 0x2d2   :  { %5515 = vst [vmem:[#allocation10_spill] sm:$0xff] %v4573_v14  ;;  %v2293_v13 = vsub.f32 %v4567_v0, %v4573_v14  ;;  %v2054_v33 = vsub.f32 1.0, %v2038_v53  ;;  %v4592_v47 = vmul.f32 %v4582_v23, %v4378_v39  ;;  %v1821_v56 = vand.u32 2147483647, %v4580_v55 }
 0x2d3   :  { %v2087_v42 = vadd.f32 1.0, %v2071_v35  ;;  %v2011_v17 = vadd.f32 0.2548296, %v1995_v31  ;;  %v2153_v21 = vadd.f32 %v2137_v59, %v4438_v46  ;;  %v2249_v22 = vadd.f32 %v4450_v8, %v2217_v37 }
 0x2d4   :  { %v2231_v24 = vmul.f32 %v2119_v32, %v4343_v58  ;;  %2953 = vpow2.f32 %v1739_v9  ;;  %v1992_v11 = vmul.f32 %v4490_v25, %v1976_v15  ;;  %v1962_v52 = vmul.f32 %v4543_v49, %v1946_v38 }
 0x2d5   :  { %v2103_v61 = vmul.f32 0.5, %v2087_v42  ;;  %v2027_v26 = vmul.f32 %v4522_v34, %v2011_v17  ;;  %v4603_v29 = vmul.f32 %v2153_v21, %v4488_v1  ;;  %v2070_v46 = vmul.f32 %v2054_v33, %v4473_v51 }
 0x2d6   :  { %v4609_v34 = vmul.f32 0.70710677, %v4592_v47  ;;  %v1837_v10 = vmul.f32 0.3275911, %v1821_v56  ;;  %v4612_v4 = vmul.f32 %v2249_v22, %v4269_v5  ;;  %v2008_v1 = vadd.f32 0.2548296, %v1992_v11 }
 0x2d7   :  { %v2135_v20 = vmul.f32 %v2103_v61, %v4343_v58  ;;  %v2215_v39 = vmul.f32 %v2199_v27, %v2103_v61  ;;  %5516 = vst [vmem:[#allocation24_spill] sm:$0xff] %v4603_v29  ;;  %v2043_v8 = vmul.f32 %v4509_v43, %v2027_v26  ;;  %v4616_v58 = vmul.f32 %v4603_v29, %v4603_v29 }
 0x2d8   :  { %v1803_v27 = vsel %vm1787_vm10, -1.0, %v5508_v44  ;;  %v2187_v51 = vmul.f32 %v4424_v3, %v4424_v3  ;;  %v1978_v40 = vadd.f32 -0.28449672, %v1962_v52  ;;  %v1820_v15 = vand.u32 2147483647, %v4609_v34 }
 0x2d9   :  { %v2151_v62 = vadd.f32 %v2135_v20, %v2119_v32  ;;  %v2247_v53 = vadd.f32 %v2231_v24, %v2215_v39  ;;  %5517 = vst [vmem:[#allocation27_spill] sm:$0xff] %v4616_v58  ;;  %v2059_v35 = vsub.f32 1.0, %v2043_v8  ;;  %v2297_v5 = vsub.f32 %v4612_v4, %v4616_v58 }
 0x2da   :  { %v1743_v32 = vmul.f32 1.442695, %v4531_v2  ;;  %v1709_v38 = vmul.f32 -0.5, %v4558_v63  ;;  %v4637_v59 = vmul.f32 0.3989423, %v4550_v36  ;;  %v1800_v37 = vsel %vm1784_vm9, -1.0, %v5508_v44 }
 0x2db   :  { %v4622_v43 = vmul.f32 %v2151_v62, %v4513_v7  ;;  %v4625_v9 = vmul.f32 %v2247_v53, %v4289_v60  ;;  %v2075_v31 = vmul.f32 %v2059_v35, %v1803_v27  ;;  %v2086_v7 = vadd.f32 1.0, %v2070_v46  ;;  %v5521_v53 = vld [vmem:[#allocation40_spill] sm:$0xff]  ;;  %v5522_v35 = vld [vmem:[#allocation29_spill] sm:$0xff] }
 0x2dc   :  { %v1853_v60 = vadd.f32 1.0, %v1837_v10  ;;  %v2024_v17 = vmul.f32 %v4490_v25, %v2008_v1  ;;  %v1836_v33 = vmul.f32 0.3275911, %v1820_v15  ;;  %v2203_v61 = vadd.f32 1.0, %v2187_v51 }
 0x2dd   :  { %5518 = vst [vmem:[#allocation23_spill] sm:$0xff] %v4622_v43  ;;  %v4634_v42 = vmul.f32 %v4622_v43, %v4622_v43  ;;  %v2091_v2 = vadd.f32 1.0, %v2075_v31  ;;  %v1994_v21 = vmul.f32 %v4543_v49, %v1978_v40  ;;  %v1725_v24 = vmul.f32 %v1709_v38, %v4558_v63 }
 0x2de   :  { %2955 = vrcp.f32 %v1853_v60  ;;  %v2954_v22 = vpop.eup %2953  ;;  %v1852_v36 = vadd.f32 1.0, %v1836_v33  ;;  %v4647_v11 = vmul.f32 0.5, %v2086_v7  ;;  %v2230_v54 = vmul.f32 %v4637_v59, %v4292_v41  ;;  %v5526_v60 = vld [vmem:[#allocation34_spill] sm:$0xff] }
 0x2df   :  { %5519 = vst [vmem:[#allocation22_spill] sm:$0xff] %v4634_v42  ;;  %v2295_v56 = vsub.f32 %v4625_v9, %v4634_v42  ;;  %v2107_v26 = vmul.f32 0.5, %v2091_v2  ;;  %2957 = vpow2.f32 %v1743_v32  ;;  %v1627_v25 = vadd.f32 %v4313_v19, %v4264_v50  ;;  %v5525_v32 = vld [vmem:[#allocation39_spill] sm:$0xff] }
 0x2e0   :  { %v2040_v20 = vmul.f32 %v2954_v22, %v2024_v17  ;;  %2959 = vrcp.f32 %v1852_v36  ;;  %v1675_v46 = vmul.f32 %v4411_v16, %v4329_v57  ;;  %v2010_v8 = vadd.f32 0.2548296, %v1994_v21 }
 0x2e1   :  { %v2139_v39 = vmul.f32 %v2107_v26, %v4424_v3  ;;  %v2219_v52 = vmul.f32 %v2203_v61, %v2107_v26  ;;  %v4657_v10 = vadd.f32 1e-06, %v1627_v25  ;;  %v4661_v62 = vmul.f32 %v4463_v28, %v4351_v18  ;;  %v5523_v18 = vld [vmem:[#allocation38_spill] sm:$0xff]  ;;  %v5530_v26 = vld [vmem:[#allocation7_spill] sm:$0xff] }
 0x2e2   :  { %v1708_v19 = vmul.f32 -0.5, %v4592_v47  ;;  %v1749_v27 = vmul.f32 1.442695, %v1725_v24  ;;  %v1802_v3 = vsel %vm1786_vm11, -1.0, %v5508_v44  ;;  %v1629_v51 = vadd.f32 %v5522_v35, %v4264_v50 }
 0x2e3   :  { %5520 = vst [vmem:[#allocation9_spill] sm:$0xff] %v4661_v62  ;;  %v2155_v30 = vadd.f32 %v2139_v39, %v4518_v45  ;;  %v2251_v1 = vadd.f32 %v5521_v53, %v2219_v52  ;;  %2961 = vrsqrt.f32 %v4657_v10  ;;  %v4669_v16 = vmul.f32 0.70710677, %v4661_v62  ;;  %v5532_v53 = vld [vmem:[#allocation26_spill] sm:$0xff] }
 0x2e4   :  { %v2214_v40 = vmul.f32 %v5523_v18, %v4647_v11  ;;  %v2056_v31 = vsub.f32 1.0, %v2040_v20  ;;  %v2186_v15 = vmul.f32 %v5525_v32, %v5525_v32  ;;  %v4679_v38 = vmul.f32 0.3989423, %v2954_v22 }
 0x2e5   :  { %v4675_v45 = vmul.f32 %v2155_v30, %v1675_v46  ;;  %v2026_v7 = vmul.f32 %v4543_v49, %v2010_v8  ;;  %v4684_v17 = vmul.f32 %v4456_v48, %v5526_v60  ;;  %v1822_v2 = vand.u32 2147483647, %v4669_v16  ;;  %v5529_v48 = vld [vmem:[#allocation30_spill] sm:$0xff]  ;;  %v5531_v30 = vld [vmem:[#allocation28_spill] sm:$0xff] }
 0x2e6   :  { %v4688_v50 = vmul.f32 %v2251_v1, %v4329_v57  ;;  %v1724_v61 = vmul.f32 %v1708_v19, %v4592_v47  ;;  %2963 = vpow2.f32 %v1749_v27  ;;  %vm1789_vm12 = vcmp.lt.f32.partialorder %v4580_v55, 0.0 }
 0x2e7   :  { %5524 = vst [vmem:[#allocation18_spill] sm:$0xff] %v4675_v45  ;;  %v4692_v33 = vmul.f32 %v4675_v45, %v4675_v45  ;;  %v1838_v49 = vmul.f32 0.3275911, %v1822_v2  ;;  %v4698_v22 = vadd.f32 1e-06, %v1629_v51  ;;  %v4702_v36 = vmul.f32 %v5530_v26, %v5529_v48 }
 0x2e8   :  { %v4695_v21 = vpop.eup %2955  ;;  %v2246_v24 = vadd.f32 %v2230_v54, %v2214_v40  ;;  %v2072_v25 = vmul.f32 %v2056_v31, %v1800_v37  ;;  %v1633_v1 = vadd.f32 %v5532_v53, %v5531_v30  ;;  %v4714_v27 = vadd.f32 1.0, %v2186_v15  ;;  %v5534_v40 = vld [vmem:[#allocation21_spill] sm:$0xff]  ;;  %v5539_v53 = vld [vmem:[#allocation14_spill] sm:$0xff] }
 0x2e9   :  { %5527 = vst [vmem:[#allocation8_spill] sm:$0xff] %v4692_v33  ;;  %5528 = vst [vmem:[#allocation16_spill] sm:$0xff] %v4698_v22  ;;  %v2958_v57 = vpop.eup %2957  ;;  %v1901_v39 = vmul.f32 1.0614054, %v4695_v21  ;;  %v1854_v46 = vadd.f32 1.0, %v1838_v49  ;;  %2965 = vrsqrt.f32 %v4698_v22  ;;  %v4723_v18 = vsel %vm1789_vm12, -1.0, %v5508_v44 }
 0x2ea   :  { %v2042_v52 = vmul.f32 %v2958_v57, %v2026_v7  ;;  %v4708_v8 = vmul.f32 0.70710677, %v4702_v36  ;;  %v4712_v19 = vpop.eup %2959  ;;  %5533 = vst [vmem:[#allocation17_spill] sm:$0xff] %v4714_v27  ;;  %v1747_v35 = vmul.f32 1.442695, %v1724_v61  ;;  %v4726_v31 = vmul.f32 %v2246_v24, %v5534_v40 }
 0x2eb   :  { %v1917_v54 = vadd.f32 -1.4531521, %v1901_v39  ;;  %v4717_v37 = vmul.f32 0.3989423, %v2958_v57  ;;  %v1900_v51 = vmul.f32 1.0614054, %v4712_v19  ;;  %2967 = vrcp.f32 %v1854_v46 }
 0x2ec   :  { %5535 = vst [vmem:[#allocation6_spill] sm:$0xff] %v4726_v31  ;;  %v2088_v7 = vadd.f32 1.0, %v2072_v25  ;;  %v1825_v2 = vand.u32 2147483647, %v4708_v8  ;;  %v2058_v49 = vsub.f32 1.0, %v2042_v52  ;;  %vm1788_vm13 = vcmp.lt.f32.partialorder %v4609_v34, 0.0 }
 0x2ed   :  { %v1933_v15 = vmul.f32 %v4695_v21, %v1917_v54  ;;  %v4730_v61 = vpop.eup %2961  ;;  %v1916_v48 = vadd.f32 -1.4531521, %v1900_v51  ;;  %v4733_v57 = vadd.f32 1e-06, %v1633_v1  ;;  %2969 = vpow2.f32 %v1747_v35  ;;  %v5537_v39 = vld [vmem:[#allocation25_spill] sm:$0xff] }
 0x2ee   :  { %v4737_v46 = vmul.f32 %v4730_v61, %v5537_v39  ;;  %v1841_v24 = vmul.f32 0.3275911, %v1825_v2  ;;  %v4742_v25 = vmax.f32 %v2293_v13, 0.0  ;;  %v4746_v52 = vmul.f32 %v4582_v23, %v5539_v53 }
 0x2ef   :  { %5536 = vst [vmem:[#allocation40_spill] sm:$0xff] %v4733_v57  ;;  %v1949_v55 = vadd.f32 1.4214138, %v1933_v15  ;;  %v1932_v34 = vmul.f32 %v4712_v19, %v1916_v48  ;;  %v1710_v1 = vmul.f32 -0.5, %v4661_v62  ;;  %v4750_v54 = vmul.f32 0.5, %v2088_v7 }
 0x2f0   :  { %5538 = vst [vmem:[#allocation29_spill] sm:$0xff] %v4742_v25  ;;  %5540 = vst [vmem:[#allocation38_spill] sm:$0xff] %v4746_v52  ;;  %v2964_v35 = vpop.eup %2963  ;;  %v4753_v51 = vsel %vm1788_vm13, -1.0, %v5508_v44  ;;  %v4757_v0 = vmul.f32 0.70710677, %v4737_v46  ;;  %v2074_v13 = vmul.f32 %v2058_v49, %v1802_v3  ;;  %v1857_v2 = vadd.f32 1.0, %v1841_v24 }
 0x2f1   :  { %v1965_v40 = vmul.f32 %v4695_v21, %v1949_v55  ;;  %v1948_v15 = vadd.f32 1.4214138, %v1932_v34  ;;  %2971 = vrsqrt.f32 %v4733_v57  ;;  %v4763_v23 = vmax.f32 %v2297_v5, 0.0 }
 0x2f2   :  { %v1823_v48 = vand.u32 2147483647, %v4757_v0  ;;  %v1713_v39 = vmul.f32 -0.5, %v4702_v36  ;;  %v4768_v20 = vmul.f32 0.3989423, %v2964_v35  ;;  %v1726_v3 = vmul.f32 %v1710_v1, %v4661_v62 }
 0x2f3   :  { %5541 = vst [vmem:[#allocation39_spill] sm:$0xff] %v4763_v23  ;;  %v1981_v7 = vadd.f32 -0.28449672, %v1965_v40  ;;  %v1964_v55 = vmul.f32 %v4712_v19, %v1948_v15  ;;  %2973 = vrcp.f32 %v1857_v2  ;;  %v4771_v49 = vpop.eup %2965  ;;  %v4776_v4 = vmax.f32 %v2295_v56, 0.0  ;;  %v5543_v2 = vld [vmem:[#allocation36_spill] sm:$0xff] }
 0x2f4   :  { %v2189_v24 = vmul.f32 %v4558_v63, %v4558_v63  ;;  %v1839_v34 = vmul.f32 0.3275911, %v1823_v48  ;;  %v2090_v15 = vadd.f32 1.0, %v2074_v13  ;;  %v1711_v1 = vmul.f32 -0.5, %v4737_v46  ;;  %v5544_v48 = vld [vmem:[#allocation31_spill] sm:$0xff] }
 0x2f5   :  { %5542 = vst [vmem:[#allocation34_spill] sm:$0xff] %v4776_v4  ;;  %v1997_v5 = vmul.f32 %v4695_v21, %v1981_v7  ;;  %v4781_v40 = vpop.eup %2967  ;;  %v1980_v53 = vadd.f32 -0.28449672, %v1964_v55  ;;  %v4786_v27 = vmul.f32 %v4771_v49, %v5543_v2  ;;  %v1729_v7 = vmul.f32 %v1713_v39, %v4702_v36 }
 0x2f6   :  { %v1855_v9 = vadd.f32 1.0, %v1839_v34  ;;  %v1902_v56 = vmul.f32 1.0614054, %v4781_v40  ;;  %v4792_v4 = vmul.f32 %v4768_v20, %v4558_v63  ;;  %v4796_v13 = vmul.f32 %v4463_v28, %v5544_v48 }
 0x2f7   :  { %v2013_v23 = vadd.f32 0.2548296, %v1997_v5  ;;  %v1751_v55 = vmul.f32 1.442695, %v1726_v3  ;;  %v4799_v25 = vmul.f32 0.70710677, %v4786_v27  ;;  %v2970_v2 = vpop.eup %2969  ;;  %v2190_v39 = vmul.f32 %v4661_v62, %v4661_v62 }
 0x2f8   :  { %5545 = vst [vmem:[#allocation30_spill] sm:$0xff] %v4796_v13  ;;  %v4801_v31 = vadd.f32 1.0, %v2189_v24  ;;  %2975 = vrcp.f32 %v1855_v9  ;;  %v1918_v5 = vadd.f32 -1.4531521, %v1902_v56  ;;  %v1727_v42 = vmul.f32 %v1711_v1, %v4737_v46 }
 0x2f9   :  { %v2029_v34 = vmul.f32 %v4695_v21, %v2013_v23  ;;  %vm1790_vm14 = vcmp.lt.f32.partialorder %v4669_v16, 0.0  ;;  %v1824_v28 = vand.u32 2147483647, %v4799_v25  ;;  %v4809_v3 = vmul.f32 0.5, %v2090_v15  ;;  %v5546_v21 = vld [vmem:[#allocation37_spill] sm:$0xff] }
 0x2fa   :  { %v1996_v48 = vmul.f32 %v4712_v19, %v1980_v53  ;;  %v1934_v24 = vmul.f32 %v4781_v40, %v1918_v5  ;;  %v1757_v13 = vmul.f32 1.442695, %v1729_v7  ;;  %v4815_v56 = vmul.f32 0.3989423, %v2970_v2  ;;  %v5548_v53 = vld [vmem:[#allocation15_spill] sm:$0xff] }
 0x2fb   :  { %v4813_v9 = vpop.eup %2971  ;;  %2977 = vpow2.f32 %v1751_v55  ;;  %v1840_v62 = vmul.f32 0.3275911, %v1824_v28  ;;  %v4819_v23 = vmul.f32 %v5530_v26, %v5546_v21  ;;  %v4822_v16 = vsel %vm1790_vm14, -1.0, %v5508_v44  ;;  %v5550_v28 = vld [vmem:[#allocation20_spill] sm:$0xff]  ;;  %v5551_v21 = vld [vmem:[#allocation13_spill] sm:$0xff] }
 0x2fc   :  { %v1950_v15 = vadd.f32 1.4214138, %v1934_v24  ;;  %v4824_v1 = vadd.f32 1.0, %v2190_v39  ;;  %v4828_v5 = vmul.f32 %v4813_v9, %v5548_v53  ;;  %v2045_v58 = vmul.f32 %v2964_v35, %v2029_v34 }
 0x2fd   :  { %v4830_v7 = vpop.eup %2973  ;;  %v1753_v14 = vmul.f32 1.442695, %v1727_v42  ;;  %v1856_v55 = vadd.f32 1.0, %v1840_v62  ;;  %2979 = vrsqrt.f32 %v5550_v28  ;;  %v2012_v45 = vadd.f32 0.2548296, %v1996_v48 }
 0x2fe   :  { %5547 = vst [vmem:[#allocation7_spill] sm:$0xff] %v4824_v1  ;;  %5549 = vst [vmem:[#allocation28_spill] sm:$0xff] %v4828_v5  ;;  %2981 = vpow2.f32 %v1757_v13  ;;  %v1905_v26 = vmul.f32 1.0614054, %v4830_v7  ;;  %v1635_v24 = vadd.f32 %v5551_v21, %v5531_v30  ;;  %v5552_v39 = vsub.f32 %v4688_v50, %v4692_v33 }
 0x2ff   :  { %2983 = vrcp.f32 %v1856_v55  ;;  %v2193_v35 = vmul.f32 %v4702_v36, %v4702_v36  ;;  %v4844_v42 = vmul.f32 0.70710677, %v4828_v5  ;;  %v1966_v62 = vmul.f32 %v4781_v40, %v1950_v15 }
 0x300   :  { %v4839_v1 = vmax.f32 %v5552_v39, 0.0  ;;  %v1712_v48 = vmul.f32 -0.5, %v4786_v27  ;;  %vm1793_vm15 = vcmp.lt.f32.partialorder %v4708_v8, 0.0  ;;  %v1921_v13 = vadd.f32 -1.4531521, %v1905_v26 }
 0x301   :  { %v2061_v30 = vsub.f32 1.0, %v2045_v58  ;;  %2985 = vpow2.f32 %v1753_v14  ;;  %v2191_v50 = vmul.f32 %v4737_v46, %v4737_v46  ;;  %v1827_v34 = vand.u32 2147483647, %v4844_v42 }
 0x302   :  { %5553 = vst [vmem:[#allocation26_spill] sm:$0xff] %v4839_v1  ;;  %v4852_v21 = vpop.eup %2975  ;;  %v2028_v53 = vmul.f32 %v4712_v19, %v2012_v45  ;;  %vm1791_vm1 = vcmp.lt.f32.partialorder %v4757_v0, 0.0  ;;  %v1937_v15 = vmul.f32 %v4830_v7, %v1921_v13  ;;  %v4857_v55 = vadd.f32 1e-06, %v1635_v24 }
 0x303   :  { %v4861_v8 = vmul.f32 %v4730_v61, %v4657_v10  ;;  %v1903_v14 = vmul.f32 1.0614054, %v4852_v21  ;;  %v4865_v58 = vsel %vm1793_vm15, -1.0, %v5508_v44  ;;  %v4867_v26 = vadd.f32 1.0, %v2193_v35 }
 0x304   :  { %5554 = vst [vmem:[#allocation21_spill] sm:$0xff] %v4857_v55  ;;  %v1982_v39 = vadd.f32 -0.28449672, %v1966_v62  ;;  %v1728_v45 = vmul.f32 %v1712_v48, %v4786_v27  ;;  %v1953_v19 = vadd.f32 1.4214138, %v1937_v15  ;;  %v4872_v0 = vmul.f32 %v4647_v11, %v4292_v41 }
 0x305   :  { %v4874_v24 = vpop.eup %2977  ;;  %v2077_v61 = vmul.f32 %v2061_v30, %v4723_v18  ;;  %v4878_v13 = vsel %vm1791_vm1, -1.0, %v5508_v44  ;;  %v1919_v28 = vadd.f32 -1.4531521, %v1903_v14  ;;  %v1843_v1 = vmul.f32 0.3275911, %v1827_v34 }
 0x306   :  { %v2044_v33 = vmul.f32 %v2970_v2, %v2028_v53  ;;  %v4880_v35 = vadd.f32 1.0, %v2191_v50  ;;  %v1969_v62 = vmul.f32 %v4830_v7, %v1953_v19  ;;  %2987 = vrsqrt.f32 %v4857_v55 }
 0x307   :  { %v4884_v48 = vpop.eup %2979  ;;  %v1935_v41 = vmul.f32 %v4852_v21, %v1919_v28  ;;  %vm1792_vm2 = vcmp.lt.f32.partialorder %v4799_v25, 0.0  ;;  %v2192_v11 = vmul.f32 %v4786_v27, %v4786_v27  ;;  %v1859_v18 = vadd.f32 1.0, %v1843_v1 }
 0x308   :  { %5555 = vst [vmem:[#allocation25_spill] sm:$0xff] %v4884_v48  ;;  %v2982_v30 = vpop.eup %2981  ;;  %v1998_v34 = vmul.f32 %v4781_v40, %v1982_v39  ;;  %v4892_v2 = vmul.f32 0.3989423, %v4874_v24  ;;  %v4896_v50 = vmul.f32 %v4771_v49, %v4698_v22  ;;  %v1755_v53 = vmul.f32 1.442695, %v1728_v45 }
 0x309   :  { %v4898_v15 = vpop.eup %2983  ;;  %v2093_v28 = vadd.f32 1.0, %v2077_v61  ;;  %v1951_v14 = vadd.f32 1.4214138, %v1935_v41  ;;  %v1985_v25 = vadd.f32 -0.28449672, %v1969_v62  ;;  %2989 = vrcp.f32 %v1859_v18  ;;  %v5559_v41 = vld [vmem:[#allocation19_spill] sm:$0xff] }
 0x30a   :  { %5556 = vst [vmem:[#allocation36_spill] sm:$0xff] %v4892_v2  ;;  %5557 = vst [vmem:[#allocation15_spill] sm:$0xff] %v4896_v50  ;;  %v2060_v19 = vsub.f32 1.0, %v2044_v33  ;;  %v4901_v1 = vsel %vm1792_vm2, -1.0, %v5508_v44  ;;  %v1904_v39 = vmul.f32 1.0614054, %v4898_v15  ;;  %v4913_v33 = vmul.f32 %v4813_v9, %v4733_v57 }
 0x30b   :  { %v1715_v55 = vmul.f32 -0.5, %v4828_v5  ;;  %v2986_v2 = vpop.eup %2985  ;;  %v1967_v43 = vmul.f32 %v4852_v21, %v1951_v14  ;;  %v4906_v49 = vadd.f32 1.0, %v2192_v11  ;;  %v2001_v45 = vmul.f32 %v4830_v7, %v1985_v25 }
 0x30c   :  { %v4909_v50 = vmul.f32 0.3989423, %v2982_v30  ;;  %v2014_v61 = vadd.f32 0.2548296, %v1998_v34  ;;  %v1920_v62 = vadd.f32 -1.4531521, %v1904_v39  ;;  %v4917_v18 = vmul.f32 %v4884_v48, %v5559_v41 }
 0x30d   :  { %5558 = vst [vmem:[#allocation13_spill] sm:$0xff] %v4913_v33  ;;  %v2109_v22 = vmul.f32 0.5, %v2093_v28  ;;  %v1983_v52 = vadd.f32 -0.28449672, %v1967_v43  ;;  %2991 = vpow2.f32 %v1755_v53  ;;  %v2017_v14 = vadd.f32 0.2548296, %v2001_v45 }
 0x30e   :  { %v2076_v11 = vmul.f32 %v2060_v19, %v4753_v51  ;;  %v4920_v29 = vmul.f32 0.3989423, %v2986_v2  ;;  %v1936_v25 = vmul.f32 %v4898_v15, %v1920_v62  ;;  %v1731_v34 = vmul.f32 %v1715_v55, %v4828_v5 }
 0x30f   :  { %v1999_v39 = vmul.f32 %v4852_v21, %v1983_v52  ;;  %v2033_v9 = vmul.f32 %v4830_v7, %v2017_v14  ;;  %v4928_v41 = vmul.f32 %v4909_v50, %v4702_v36  ;;  %v4931_v43 = vmul.f32 0.70710677, %v4917_v18 }
 0x310   :  { %v4933_v53 = vpop.eup %2987  ;;  %v2030_v51 = vmul.f32 %v4781_v40, %v2014_v61  ;;  %v1952_v28 = vadd.f32 1.4214138, %v1936_v25  ;;  %vm1795_vm5 = vcmp.lt.f32.partialorder %v4844_v42, 0.0  ;;  %v2195_v55 = vmul.f32 %v4828_v5, %v4828_v5  ;;  %v5562_v5 = vld [vmem:[#allocation11_spill] sm:$0xff] }
 0x311   :  { %5560 = vst [vmem:[#allocation19_spill] sm:$0xff] %v4928_v41  ;;  %5561 = vst [vmem:[#allocation41_spill] sm:$0xff] %v4931_v43  ;;  %v2141_v52 = vmul.f32 %v2109_v22, %v4558_v63  ;;  %v2015_v7 = vadd.f32 0.2548296, %v1999_v39  ;;  %v2049_v19 = vmul.f32 %v2982_v30, %v2033_v9  ;;  %v1826_v45 = vand.u32 2147483647, %v4931_v43 }
 0x312   :  { %v2092_v62 = vadd.f32 1.0, %v2076_v11  ;;  %v4943_v14 = vmul.f32 %v4920_v29, %v4737_v46  ;;  %v1968_v48 = vmul.f32 %v4898_v15, %v1952_v28  ;;  %v1761_v40 = vmul.f32 1.442695, %v1731_v34 }
 0x313   :  { %v4946_v61 = vpop.eup %2989  ;;  %v2031_v25 = vmul.f32 %v4852_v21, %v2015_v7  ;;  %v2065_v57 = vsub.f32 1.0, %v2049_v19  ;;  %v1842_v33 = vmul.f32 0.3275911, %v1826_v45  ;;  %v4951_v63 = vmul.f32 %v4933_v53, %v5562_v5 }
 0x314   :  { %v2221_v30 = vmul.f32 %v4801_v31, %v2109_v22  ;;  %v2046_v11 = vmul.f32 %v4874_v24, %v2030_v51  ;;  %v1984_v39 = vadd.f32 -0.28449672, %v1968_v48  ;;  %v1907_v9 = vmul.f32 1.0614054, %v4946_v61 }
 0x315   :  { %v2157_v28 = vadd.f32 %v2141_v52, %v4768_v20  ;;  %v2047_v34 = vmul.f32 %v2986_v2, %v2031_v25  ;;  %v2081_v43 = vmul.f32 %v2065_v57, %v4865_v58  ;;  %v1858_v41 = vadd.f32 1.0, %v1842_v33 }
 0x316   :  { %v4958_v21 = vmul.f32 0.5, %v2092_v62  ;;  %v2000_v7 = vmul.f32 %v4898_v15, %v1984_v39  ;;  %v4964_v5 = vsel %vm1795_vm5, -1.0, %v5508_v44  ;;  %v1923_v22 = vadd.f32 -1.4531521, %v1907_v9 }
 0x317   :  { %v2992_v31 = vpop.eup %2991  ;;  %v2063_v24 = vsub.f32 1.0, %v2047_v34  ;;  %v2097_v48 = vadd.f32 1.0, %v2081_v43  ;;  %2993 = vrcp.f32 %v1858_v41  ;;  %v4967_v20 = vmul.f32 0.70710677, %v4951_v63 }
 0x318   :  { %v2253_v57 = vadd.f32 %v4792_v4, %v2221_v30  ;;  %v2062_v58 = vsub.f32 1.0, %v2046_v11  ;;  %v2016_v2 = vadd.f32 0.2548296, %v2000_v7  ;;  %v1939_v33 = vmul.f32 %v4946_v61, %v1923_v22 }
 0x319   :  { %v4972_v51 = vmul.f32 %v2157_v28, %v4684_v17  ;;  %v2079_v42 = vmul.f32 %v2063_v24, %v4878_v13  ;;  %v1714_v52 = vmul.f32 -0.5, %v4917_v18  ;;  %v1828_v19 = vand.u32 2147483647, %v4967_v20 }
 0x31a   :  { %v2032_v41 = vmul.f32 %v4898_v15, %v2016_v2  ;;  %v4978_v43 = vmul.f32 0.3989423, %v2992_v31  ;;  %2995 = vpow2.f32 %v1761_v40  ;;  %v1955_v45 = vadd.f32 1.4214138, %v1939_v33 }
 0x31b   :  { %v2095_v4 = vadd.f32 1.0, %v2079_v42  ;;  %v2113_v62 = vmul.f32 0.5, %v2097_v48  ;;  %v4980_v25 = vadd.f32 1.0, %v2195_v55  ;;  %v1844_v30 = vmul.f32 0.3275911, %v1828_v19 }
 0x31c   :  { %v4983_v17 = vmul.f32 %v2253_v57, %v5526_v60  ;;  %v2078_v13 = vmul.f32 %v2062_v58, %v4822_v16  ;;  %v2048_v11 = vmul.f32 %v2992_v31, %v2032_v41  ;;  %v1971_v39 = vmul.f32 %v4946_v61, %v1955_v45 }
 0x31d   :  { %v4989_v15 = vmul.f32 %v4972_v51, %v4972_v51  ;;  %v2111_v9 = vmul.f32 0.5, %v2095_v4  ;;  %v1730_v40 = vmul.f32 %v1714_v52, %v4917_v18  ;;  %v1860_v28 = vadd.f32 1.0, %v1844_v30 }
 0x31e   :  { %v2064_v34 = vsub.f32 1.0, %v2048_v11  ;;  %v2240_v55 = vmul.f32 %v4978_v43, %v4786_v27  ;;  %v1987_v7 = vadd.f32 -0.28449672, %v1971_v39  ;;  %v2138_v60 = vmul.f32 %v4809_v3, %v5525_v32  ;;  %v5564_v11 = vld [vmem:[#allocation5_spill] sm:$0xff] }
 0x31f   :  { %v2143_v16 = vmul.f32 %v2111_v9, %v4737_v46  ;;  %v2223_v22 = vmul.f32 %v4880_v35, %v2111_v9  ;;  %v2145_v31 = vmul.f32 %v2113_v62, %v4702_v36  ;;  %v2150_v24 = vadd.f32 %v4872_v0, %v4637_v59 }
 0x320   :  { %v2094_v48 = vadd.f32 1.0, %v2078_v13  ;;  %v2080_v57 = vmul.f32 %v2064_v34, %v4901_v1  ;;  %v2003_v58 = vmul.f32 %v4946_v61, %v1987_v7  ;;  %2997 = vrcp.f32 %v1860_v28 }
 0x321   :  { %v5003_v2 = vpop.eup %2993  ;;  %v2159_v33 = vadd.f32 %v2143_v16, %v4920_v29  ;;  %v2255_v42 = vadd.f32 %v4943_v14, %v2223_v22  ;;  %v1759_v46 = vmul.f32 1.442695, %v1730_v40  ;;  %v2154_v35 = vadd.f32 %v2138_v60, %v4717_v37  ;;  %v5563_v29 = vld [vmem:[#allocation35_spill] sm:$0xff] }
 0x322   :  { %v2096_v52 = vadd.f32 1.0, %v2080_v57  ;;  %v2019_v36 = vadd.f32 0.2548296, %v2003_v58  ;;  %v1906_v19 = vmul.f32 1.0614054, %v5003_v2  ;;  %v1716_v59 = vmul.f32 -0.5, %v4951_v63 }
 0x323   :  { %v5011_v0 = vmul.f32 %v2159_v33, %v4861_v8  ;;  %v5014_v1 = vmul.f32 %v2255_v42, %v4657_v10  ;;  %v2161_v41 = vadd.f32 %v2145_v31, %v4909_v50  ;;  %v2166_v45 = vmul.f32 %v2150_v24, %v5563_v29  ;;  %v5566_v58 = vld [vmem:[#allocation32_spill] sm:$0xff]  ;;  %v5567_v42 = vld [vmem:[#allocation38_spill] sm:$0xff] }
 0x324   :  { %v2996_v14 = vpop.eup %2995  ;;  %v2112_v4 = vmul.f32 0.5, %v2096_v52  ;;  %v2035_v30 = vmul.f32 %v4946_v61, %v2019_v36  ;;  %v1922_v13 = vadd.f32 -1.4531521, %v1906_v19  ;;  %v5020_v39 = vmul.f32 %v2154_v35, %v5564_v11  ;;  %v5568_v52 = vld [vmem:[#allocation16_spill] sm:$0xff] }
 0x325   :  { %v5024_v9 = vmul.f32 %v5011_v0, %v5011_v0  ;;  %v2225_v8 = vmul.f32 %v4867_v26, %v2113_v62  ;;  %v2136_v10 = vmul.f32 %v4750_v54, %v4354_v6  ;;  %v2140_v50 = vmul.f32 %v4958_v21, %v4592_v47 }
 0x326   :  { %v2224_v40 = vmul.f32 %v4906_v49, %v2112_v4  ;;  %v2051_v28 = vmul.f32 %v2996_v14, %v2035_v30  ;;  %v1938_v61 = vmul.f32 %v5003_v2, %v1922_v13  ;;  %v2755_v34 = vpack.c.bf16 %v5020_v39, %v2166_v45  ;;  %v5565_v49 = vld [vmem:[#allocation24_spill] sm:$0xff] }
 0x327   :  { %v2303_v7 = vsub.f32 %v5014_v1, %v5024_v9  ;;  %v5037_v60 = vmul.f32 %v2161_v41, %v4819_v23  ;;  %v2152_v26 = vadd.f32 %v2136_v10, %v4679_v38  ;;  %v2156_v62 = vadd.f32 %v2140_v50, %v4815_v56  ;;  %v5592_v1 = vld [vmem:[#allocation30_spill] sm:$0xff] }
 0x328   :  { %v2256_v16 = vadd.f32 %v2240_v55, %v2224_v40  ;;  %v2067_v22 = vsub.f32 1.0, %v2051_v28  ;;  %v1954_v31 = vadd.f32 1.4214138, %v1938_v61  ;;  %2756 = vmatprep.subr.bf16.mxu0 %v2755_v34  ;;  %v2757_v24 = vpack.c.bf16 %v5565_v49, %v4564_v12  ;;  %v5569_v12 = vld [vmem:[#allocation23_spill] sm:$0xff] }
 0x329   :  { %2999 = vpow2.f32 %v1759_v46  ;;  %v1732_v57 = vmul.f32 %v1716_v59, %v4951_v63  ;;  %v5045_v33 = vmul.f32 %v2152_v26, %v5566_v58  ;;  %v5048_v23 = vmul.f32 %v2156_v62, %v5567_v42  ;;  %v5570_v46 = vld [vmem:[#allocation18_spill] sm:$0xff]  ;;  %v5571_v59 = vld [vmem:[#allocation19_spill] sm:$0xff] }
 0x32a   :  { %v5050_v35 = vpop.eup %2997  ;;  %v5053_v36 = vmul.f32 %v2256_v16, %v5568_v52  ;;  %v2083_v55 = vmul.f32 %v2067_v22, %v4964_v5  ;;  %v1970_v19 = vmul.f32 %v5003_v2, %v1954_v31  ;;  %2758 = vmatpush1.bf16.msra.mxu0 %v2757_v24  ;;  %v2765_v41 = vpack.c.bf16 %v5570_v46, %v5569_v12  ;;  %v5573_v31 = vld [vmem:[#allocation15_spill] sm:$0xff]  ;;  %v5574_v24 = vld [vmem:[#allocation28_spill] sm:$0xff]  ;;  %v5577_v46 = vld [vmem:[#allocation22_spill] sm:$0xff] }
 0x32b   :  { %v2257_v29 = vadd.f32 %v5571_v59, %v2225_v8  ;;  %v1908_v30 = vmul.f32 1.0614054, %v5050_v35  ;;  %v2763_v13 = vpack.c.bf16 %v5048_v23, %v5045_v33  ;;  %v2144_v11 = vmul.f32 %v2112_v4, %v4786_v27  ;;  %v5572_v4 = vld [vmem:[#allocation37_spill] sm:$0xff]  ;;  %v5587_v59 = vld [vmem:[#allocation34_spill] sm:$0xff] }
 0x32c   :  { %v2099_v10 = vadd.f32 1.0, %v2083_v55  ;;  %v2131_v50 = vmul.f32 0.3989423, %v2996_v14  ;;  %v1986_v40 = vadd.f32 -0.28449672, %v1970_v19  ;;  %v2301_v28 = vsub.f32 %v4983_v17, %v4989_v15  ;;  %v5575_v55 = vld [vmem:[#allocation10_spill] sm:$0xff] }
 0x32d   :  { %v5070_v61 = vmul.f32 %v5037_v60, %v5037_v60  ;;  %v1924_v8 = vadd.f32 -1.4531521, %v1908_v30  ;;  %2764 = vmatprep.subr.bf16.mxu1 %v2763_v13  ;;  %v2160_v34 = vadd.f32 %v2144_v11, %v4978_v43  ;;  %v2110_v26 = vmul.f32 0.5, %v2094_v48  ;;  %v5576_v19 = vld [vmem:[#allocation27_spill] sm:$0xff]  ;;  %v5579_v11 = vld [vmem:[#allocation9_spill] sm:$0xff] }
 0x32e   :  { %v2115_v62 = vmul.f32 0.5, %v2099_v10  ;;  %v2002_v27 = vmul.f32 %v5003_v2, %v1986_v40  ;;  %v1763_v14 = vmul.f32 1.442695, %v1732_v57  ;;  %2766 = vmatpush1.bf16.msra.mxu1 %v2765_v41  ;;  %v2273_v16 = vmul.f32 %v2257_v29, %v5572_v4  ;;  %v5578_v41 = vld [vmem:[#allocation8_spill] sm:$0xff]  ;;  %v5591_v40 = vld [vmem:[#allocation17_spill] sm:$0xff] }
 0x32f   :  { %v1940_v22 = vmul.f32 %v5050_v35, %v1924_v8  ;;  %v5077_v17 = vmul.f32 %v2160_v34, %v5573_v31  ;;  %v5079_v49 = vmul.f32 %v2166_v45, %v2166_v45  ;;  %v2243_v43 = vmul.f32 %v2131_v50, %v5574_v24  ;;  %v5580_v8 = vld [vmem:[#allocation6_spill] sm:$0xff]  ;;  %v5589_v34 = vld [vmem:[#allocation7_spill] sm:$0xff] }
 0x330   :  { %v2147_v58 = vmul.f32 %v2115_v62, %v5574_v24  ;;  %v2227_v42 = vmul.f32 %v4980_v25, %v2115_v62  ;;  %v2018_v48 = vadd.f32 0.2548296, %v2002_v27  ;;  %v2305_v52 = vsub.f32 %v2273_v16, %v5070_v61  ;;  %v5581_v27 = vld [vmem:[#allocation13_spill] sm:$0xff]  ;;  %v5583_v24 = vld [vmem:[#allocation40_spill] sm:$0xff] }
 0x331   :  { %v1956_v57 = vadd.f32 1.4214138, %v1940_v22  ;;  %3001 = vpow2.f32 %v1763_v14  ;;  %v2142_v10 = vmul.f32 %v2110_v26, %v5579_v11  ;;  %v5096_v62 = vmax.f32 %v2301_v28, 0.0 }
 0x332   :  { %v2163_v29 = vadd.f32 %v2147_v58, %v2131_v50  ;;  %v2259_v30 = vadd.f32 %v2243_v43, %v2227_v42  ;;  %v2034_v45 = vmul.f32 %v5003_v2, %v2018_v48  ;;  %v5582_v50 = vld [vmem:[#allocation41_spill] sm:$0xff]  ;;  %v5102_v14 = vmax.f32 %v2305_v52, 0.0 }
 0x333   :  { %v3000_v13 = vpop.eup %2999  ;;  %v1972_v25 = vmul.f32 %v5050_v35, %v1956_v57  ;;  %vm1794_vm6 = vcmp.lt.f32.partialorder %v5582_v50, 0.0  ;;  %v2194_v16 = vmul.f32 %v4917_v18, %v4917_v18  ;;  %v5108_v31 = vmul.f32 %v5077_v17, %v5077_v17  ;;  %v5584_v57 = vld [vmem:[#allocation36_spill] sm:$0xff] }
 0x334   :  { %v5099_v4 = vmul.f32 %v2163_v29, %v5581_v27  ;;  %v2050_v2 = vmul.f32 %v3000_v13, %v2034_v45  ;;  %v2275_v58 = vmul.f32 %v2259_v30, %v5583_v24  ;;  %v1810_v48 = vsel %vm1794_vm6, -1.0, %v5508_v44  ;;  %v5585_v45 = vld [vmem:[#allocation29_spill] sm:$0xff] }
 0x335   :  { %v1988_v22 = vadd.f32 -0.28449672, %v1972_v25  ;;  %v2158_v29 = vadd.f32 %v2142_v10, %v5584_v57  ;;  %v5586_v25 = vld [vmem:[#allocation39_spill] sm:$0xff]  ;;  %v2222_v43 = vmul.f32 %v5589_v34, %v2110_v26  ;;  %v2130_v12 = vmul.f32 0.3989423, %v3000_v13 }
 0x336   :  { %v5113_v28 = vmul.f32 %v5099_v4, %v5099_v4  ;;  %v2066_v42 = vsub.f32 1.0, %v2050_v2  ;;  %v5588_v2 = vld [vmem:[#allocation26_spill] sm:$0xff]  ;;  %v5133_v10 = vmax.f32 %v2303_v7, 0.0  ;;  %v2218_v24 = vmul.f32 %v5591_v40, %v4809_v3 }
 0x337   :  { %v2004_v52 = vmul.f32 %v5050_v35, %v1988_v22  ;;  %v2238_v26 = vmul.f32 %v5584_v57, %v5579_v11  ;;  %v2210_v27 = vadd.f32 1.0, %v2194_v16  ;;  %v2174_v7 = vmul.f32 %v2158_v29, %v5592_v1  ;;  %v5593_v29 = vld [vmem:[#allocation20_spill] sm:$0xff] }
 0x338   :  { %v2307_v50 = vsub.f32 %v2275_v58, %v5113_v28  ;;  %v2082_v30 = vmul.f32 %v2066_v42, %v1810_v48  ;;  %5590 = vst [vmem:[#allocation11_spill] sm:$0xff] %v5133_v10  ;;  %v2234_v48 = vmul.f32 %v4717_v37, %v5525_v32  ;;  %vm1796_vm7 = vcmp.lt.f32.partialorder %v4967_v20, 0.0 }
 0x339   :  { %v2020_v5 = vadd.f32 0.2548296, %v2004_v52  ;;  %v2254_v11 = vadd.f32 %v2238_v26, %v2222_v43  ;;  %v2188_v57 = vmul.f32 %v4592_v47, %v4592_v47  ;;  %v1812_v32 = vsel %vm1796_vm7, -1.0, %v5508_v44  ;;  %v5595_v26 = vld [vmem:[#allocation31_spill] sm:$0xff] }
 0x33a   :  { %v5135_v58 = vmax.f32 %v2307_v50, 0.0  ;;  %v2098_v42 = vadd.f32 1.0, %v2082_v30  ;;  %v2184_v30 = vmul.f32 %v4354_v6, %v4354_v6  ;;  %v2250_v16 = vadd.f32 %v2234_v48, %v2218_v24 }
 0x33b   :  { %v2036_v13 = vmul.f32 %v5050_v35, %v2020_v5  ;;  %v3002_v34 = vpop.eup %3001  ;;  %v2242_v35 = vmul.f32 %v2130_v12, %v4917_v18  ;;  %v2286_v20 = vmul.f32 %v2174_v7, %v2174_v7  ;;  %v2196_v43 = vmul.f32 %v4951_v63, %v4951_v63 }
 0x33c   :  { %v2114_v52 = vmul.f32 0.5, %v2098_v42  ;;  %v5594_v42 = vld [vmem:[#allocation25_spill] sm:$0xff]  ;;  %v2282_v48 = vmul.f32 %v5020_v39, %v5020_v39 }
 0x33d   :  { %v2052_v3 = vmul.f32 %v3002_v34, %v2036_v13  ;;  %v1682_v1 = vmul.f32 %v5594_v42, %v5593_v29  ;;  %v2204_v42 = vadd.f32 1.0, %v2188_v57 }
 0x33e   :  { %v2226_v40 = vmul.f32 %v2210_v27, %v2114_v52  ;;  %v2146_v5 = vmul.f32 %v2114_v52, %v4917_v18  ;;  %v2200_v27 = vadd.f32 1.0, %v2184_v30  ;;  %v2270_v18 = vmul.f32 %v2254_v11, %v5595_v26  ;;  %v5596_v52 = vld [vmem:[#allocation12_spill] sm:$0xff] }
 0x33f   :  { %v2068_v50 = vsub.f32 1.0, %v2052_v3  ;;  %v2266_v10 = vmul.f32 %v2250_v16, %v5596_v52  ;;  %v2220_v30 = vmul.f32 %v2204_v42, %v4958_v21  ;;  %v2212_v11 = vadd.f32 1.0, %v2196_v43  ;;  %v2325_v21 = vld [vmem:[%s5259_s9] sm:$0xf] }
 0x340   :  { %v2258_v22 = vadd.f32 %v2242_v35, %v2226_v40  ;;  %v2162_v37 = vadd.f32 %v2146_v5, %v2130_v12  ;;  %v2132_v40 = vmul.f32 0.3989423, %v3002_v34  ;;  %v2216_v5 = vmul.f32 %v2200_v27, %v4750_v54 }
 0x341   :  { %v2084_v13 = vmul.f32 %v2068_v50, %v1812_v32  ;;  %v2302_v50 = vsub.f32 %v2270_v18, %v2286_v20  ;;  %v2236_v34 = vmul.f32 %v4815_v56, %v4592_v47  ;;  %v5597_v54 = vpack.c.bf16 %v5037_v60, %v4972_v51  ;;  %v5598_v56 = vld [vmem:[#allocation21_spill] sm:$0xff] }
 0x342   :  { %v2178_v24 = vmul.f32 %v2162_v37, %v1682_v1  ;;  %v2274_v44 = vmul.f32 %v2258_v22, %v5593_v29  ;;  %v2771_v1 = vpack.c.bf16 %v2282_v48, %v5079_v49  ;;  %v2298_v37 = vsub.f32 %v2266_v10, %v2282_v48 }
 0x343   :  { %v2100_v3 = vadd.f32 1.0, %v2084_v13  ;;  %v2244_v22 = vmul.f32 %v2132_v40, %v4951_v63  ;;  %v2232_v10 = vmul.f32 %v4679_v38, %v4354_v6  ;;  %v2318_v29 = vmax.f32 %v2302_v50, 0.0 }
 0x344   :  { %v2759_v12 = vpack.c.bf16 %v2178_v24, %v2174_v7  ;;  %v2290_v35 = vmul.f32 %v2178_v24, %v2178_v24  ;;  %v2252_v47 = vadd.f32 %v2236_v34, %v2220_v30  ;;  %v1684_v13 = vmul.f32 %v4933_v53, %v5598_v56 }
 0x345   :  { %v2116_v32 = vmul.f32 0.5, %v2100_v3  ;;  %v2248_v27 = vadd.f32 %v2232_v10, %v2216_v5  ;;  %v2284_v51 = vmul.f32 %v5048_v23, %v5048_v23  ;;  %v2314_v60 = vmax.f32 %v2298_v37, 0.0  ;;  %v5602_v23 = vld [vmem:[#allocation14_spill] sm:$0xff] }
 0x346   :  { %2760 = vmatprep.subr.bf16.mxu0 %v2759_v12  ;;  %v2775_v39 = vpack.c.bf16 %v2290_v35, %v2286_v20  ;;  %v2306_v16 = vsub.f32 %v2274_v44, %v2290_v35  ;;  %v5599_v6 = vpack.c.bf16 %v5576_v19, %v5575_v55  ;;  %v5600_v38 = vmov 0.0   ;;  %v5603_v44 = vld [vmem:[#allocation33_spill] sm:$0xff] }
 0x347   :  { %v2228_v57 = vmul.f32 %v2212_v11, %v2116_v32  ;;  %v2148_v7 = vmul.f32 %v2116_v32, %v4951_v63  ;;  %2762 = vmatpush1.bf16.msra.mxu0 %v5597_v54  ;;  %v2280_v53 = vmul.f32 %v5045_v33, %v5045_v33  ;;  %v5601_v24 = vsub.f32 %v5580_v8, %v5079_v49 }
 0x348   :  { %2772 = vmatprep.subr.bf16.mxu0 %v2771_v1  ;;  %v2322_v20 = vmax.f32 %v2306_v16, 0.0  ;;  %v2268_v52 = vmul.f32 %v2252_v47, %v5602_v23  ;;  %v2264_v55 = vmul.f32 %v2248_v27, %v5603_v44  ;;  %v5604_v33 = vpack.c.bf16 %v5070_v61, %v4989_v15 }
 0x349   :  { %v2260_v43 = vadd.f32 %v2244_v22, %v2228_v57  ;;  %v2164_v63 = vadd.f32 %v2148_v7, %v2132_v40  ;;  %v2310_v48 = vmax.f32 %v5601_v24, 0.0  ;;  %v2787_v19 = vpack.c.bf16 %v2284_v51, %v2280_v53  ;;  %v2330_v57 = vpop.permute.xlu1 %2329 }
 0x34a   :  { %2703 = vmatmul.mubr.msk.f32.vlgmr.msra.gmra.mrb[32].mxu0 %vm1227_vm3, %v2325_v21  ;;  %v2783_v26 = vpack.c.bf16 %v2322_v20, %v2318_v29  ;;  %v2300_v49 = vsub.f32 %v2268_v52, %v2284_v51  ;;  %v5605_v50 = vpack.c.bf16 %v5099_v4, %v5011_v0  ;;  %v5606_v5 = vsub.f32 %v5053_v36, %v5108_v31 }
 0x34b   :  { %v2180_v18 = vmul.f32 %v2164_v63, %v1684_v13  ;;  %2774 = vmatpush1.bf16.msra.mxu0 %v5599_v6  ;;  %2551 = vmatprep.mubr.f32.mxu0 %v5600_v38  ;;  %v2276_v42 = vmul.f32 %v2260_v43, %v5598_v56  ;;  %v2779_v12 = vpack.c.bf16 %v2314_v60, %v2310_v48 }
 0x34c   :  { %2776 = vmatprep.subr.bf16.mxu0 %v2775_v39  ;;  %v2320_v30 = vmax.f32 %v5606_v5, 0.0  ;;  %v2316_v11 = vmax.f32 %v2300_v49, 0.0  ;;  %v5607_v15 = vpack.c.bf16 %v5586_v25, %v5585_v45  ;;  %v5608_v0 = vpack.c.bf16 %v5578_v41, %v5577_v46  ;;  %v2477_v45 = vld [vmem:[%s5260_s10] sm:$0xf]  ;;  %v5612_v41 = vld [vmem:[#allocation11_spill] sm:$0xff]  ;;  %s3030_s10 = smov [#allocation2]  }
 0x34d   :  { %v2767_v3 = vpack.c.bf16 %v2180_v18, %v5077_v17  ;;  %v2292_v40 = vmul.f32 %v2180_v18, %v2180_v18  ;;  %v2296_v17 = vsub.f32 %v2264_v55, %v2280_v53  ;;  %v5610_v25 = vpack.c.bf16 %v5113_v28, %v5024_v9  ;;  %v2482_v9 = vpop.permute.xlu0 %2481  ;;  %s2655_s8 = sshll.u32 %s3030_s10, 4  ;;  %s2656_s8 = int_to_ptr.vmem [resolvable:$true] %s2655_s8 }
 0x34e   :  { %v5611_v46 = vpack.c.bf16 %v5588_v2, %v5587_v59  ;;  %s3003_s2 = scalar_lea.vmem %s2656_s8, 512  ;;  %p3008_p1 = scmp.lt.s32.totalorder %s2656_s8, %s2656_s8 }
 0x34f   :  { %2768 = vmatprep.subr.bf16.mxu1 %v2767_v3  ;;  %v2791_v35 = vpack.c.bf16 %v2292_v40, %v5108_v31  ;;  %2778 = vmatpush1.bf16.msra.mxu0 %v5604_v33  ;;  %v2308_v8 = vsub.f32 %v2276_v42, %v2292_v40  ;;  %v2312_v4 = vmax.f32 %v2296_v17, 0.0  ;;  %v5609_v31 = vpack.c.bf16 %v5102_v14, %v5096_v62  ;;  %p3004_p0 = scmp.ne.s32.totalorder %s2656_s8, %s3003_s2  ;;  %p3009_p2 = scmp.lt.s32.totalorder %s3003_s2, %s3003_s2 }
 0x350   :  { %2770 = vmatpush1.bf16.msra.mxu1 %v5605_v50  ;;  %2780 = vmatprep.subr.bf16.mxu0 %v2779_v12  ;;  %v5613_v62 = vpack.c.bf16 %v5135_v58, %v5612_v41 }
 0x351   :  { %2788 = vmatprep.subr.bf16.mxu1 %v2787_v19  ;;  %v2324_v32 = vmax.f32 %v2308_v8, 0.0  ;;  %v2795_v36 = vpack.c.bf16 %v2316_v11, %v2312_v4  ;;  %p3010_p3 = por %p3009_p2, %p3008_p1 }
 0x353   :  { %2704 = vmatmul.mubr.msk.f32.vlgmr.msra.gmra.mrb[32].mxu1 %vm1227_vm3, %v2325_v21  ;;  %2782 = vmatpush1.bf16.msra.mxu0 %v5607_v15  ;;  %v2799_v61 = vpack.c.bf16 %v2324_v32, %v2320_v30  ;;  %p3011_p4 = pnand %p3010_p3, %p3004_p0 }
 0x354   :  { %2790 = vmatpush1.bf16.msra.mxu1 %v5608_v0  ;;  %2784 = vmatprep.subr.bf16.mxu0 %v2783_v26 }
 0x355   :  { %2792 = vmatprep.subr.bf16.mxu1 %v2791_v35  ;;  %2622 = vmatprep.mubr.f32.mxu1 %v5600_v38 }
 0x357   :  { %2786 = vmatpush1.bf16.msra.mxu0 %v5609_v31 }
 0x358   :  { %2794 = vmatpush1.bf16.msra.mxu1 %v5610_v25 }
 0x359   :  { %2796 = vmatprep.subr.bf16.mxu1 %v2795_v36 }
 0x35a   :  { %2705 = vmatmul.mubr.msk.f32.vlgmr.msra.gmra.mrb[34].mxu0 %vm1446_vm4, %v2477_v45 }
 0x35c   :  { %2798 = vmatpush1.bf16.msra.mxu1 %v5611_v46 }
 0x35d   :  { %2800 = vmatprep.subr.bf16.mxu1 %v2799_v61 }
 0x360   :  { %2802 = vmatpush1.bf16.msra.mxu1 %v5613_v62 }
 0x363   :  { %2706 = vmatmul.mubr.msk.f32.vlgmr.msra.gmra.mrb[34].mxu1 %vm1446_vm4, %v2477_v45 }
 0x41d   :  { %v2401_v14 = vpop.f32.mrb[32].mxu0 }
 0x41e   :  { %v2403_v1 = vpop.f32.mrb[33].mxu0  ;;  %v2402_v7 = vadd.f32 %v2401_v14, %v2330_v57 }
 0x41f   :  { %v2404_v2 = vadd.f32 %v2403_v1, %v2330_v57 }
 0x426   :  { %v2472_v39 = vpop.f32.mrb[32].mxu1 }
 0x427   :  { %v2474_v37 = vpop.f32.mrb[33].mxu1  ;;  %v2473_v56 = vadd.f32 %v2472_v39, %v2330_v57 }
 0x428   :  { %v2475_v43 = vadd.f32 %v2474_v37, %v2330_v57 }
 0x42d   :  { %v2553_v28 = vpop.f32.mrb[34].mxu0 }
 0x42e   :  { %v2554_v16 = vadd.f32 %v2553_v28, %v2482_v9  ;;  %v2555_v34 = vpop.f32.mrb[35].mxu0 }
 0x42f   :  { %v2556_v22 = vadd.f32 %v2555_v34, %v2482_v9 }
 0x430   :  { %v2633_v59 = vrot.slane %v2554_v16, 4 }
 0x431   :  { %v2634_v54 = vrot.slane %v2556_v22, 4 }
 0x432   :  { %v2641_v21 = vsel %vm92_vm0, %v2402_v7, %v2633_v59 }
 0x433   :  { %2645 = vst [vmem:[#allocation2] sm:$0xff] %v2641_v21  ;;  %v2642_v58 = vsel %vm92_vm0, %v2404_v2, %v2634_v54 }
 0x434   :  { %2646 = vst [vmem:[#allocation2 + $0x8] sm:$0xff] %v2642_v58 }
 0x436   :  { %v2624_v10 = vpop.f32.mrb[34].mxu1 }
 0x437   :  { %v2625_v29 = vadd.f32 %v2624_v10, %v2482_v9  ;;  %v2626_v20 = vpop.f32.mrb[35].mxu1 }
 0x438   :  { %v2627_v47 = vadd.f32 %v2626_v20, %v2482_v9 }
 0x439   :  { %v2635_v13 = vrot.slane %v2625_v29, 4 }
 0x43a   :  { %v2636_v63 = vrot.slane %v2627_v47, 4 }
 0x43b   :  { %v2643_v27 = vsel %vm92_vm0, %v2473_v56, %v2635_v13 }
 0x43c   :  { %2647 = vst [vmem:[#allocation2 + $0x10] sm:$0xff] %v2643_v27  ;;  %v2644_v51 = vsel %vm92_vm0, %v2475_v43, %v2636_v63 }
 0x43d   :  { %2648 = vst [vmem:[#allocation2 + $0x18] sm:$0xff] %v2644_v51 }
 0x43e   :  { %3014 = shalt.err (!%p3011_p4)
}
 0x43f   :  { %s3015_s15 = scalar_lea.hbm %s5263_s13, 512 }
 0x440   :  { %p3016_p5 = scmp.ne.s32.totalorder %s5263_s13, %s3015_s15  ;;  %p3019_p6 = scmp.lt.u32.totalorder %s3015_s15, %s5263_s13 }
 0x442   :  { %p3021_p7 = pnand %p3019_p6, %p3016_p5 }
 0x444   :  { %3024 = shalt.err (!%p3021_p7)
}
 0x445   :  { %2658 = dma.vmem_to_hbm [thread:$0]  %s2656_s8, 512, %s5263_s13, [#allocation3]  }
 0x446   :  { %3025 = dma.done.wait [#allocation3], 512  }
 0x447   :  { %3026 = vsyncadd [#allocation3], 4294966784 }
 0x448   :  { %2662 = vsyncpa [#allocation3], 1 }

</bundles_post_ra>
